<compile_context>
chip_gen: v5e
topology: v5e:2x2
jax: 0.10.0
libtpu: 0.0.40
codegen_flags: <defaults>
</compile_context>

<pallas_src>
import functools

import jax
import jax.numpy as jnp
from jax import lax
from jax.experimental import pallas as pl
from jax.experimental.pallas import tpu as pltpu


def _contrastive_kernel(x_ref, pos_ref, neg_ref, nll_ref,
                        xn_ref, simpos_ref, acc_ref, *, inv_temp, eps):
    k = pl.program_id(1)

    @pl.when(k == 0)
    def _init():
        # Normalize the resident x / positive tiles once per B tile (f32 math).
        x = x_ref[...].astype(jnp.float32)
        pos = pos_ref[...].astype(jnp.float32)
        # reciprocal-multiply instead of tensor division (EUP instead of VALU);
        # keeps the reference's x / (norm + eps) semantics.
        inv_nx = pl.reciprocal(jnp.sqrt(jnp.sum(x * x, axis=1, keepdims=True)) + eps)
        inv_np = pl.reciprocal(jnp.sqrt(jnp.sum(pos * pos, axis=1, keepdims=True)) + eps)
        # Fold 1/temp into the x-side scale so matmuls directly yield sim/temp.
        xn_s = x * (inv_nx * inv_temp)
        pn = pos * inv_np
        simpos_ref[...] = jnp.sum(xn_s * pn, axis=1, keepdims=True)   # sim_pos / temp
        xn_ref[...] = xn_s.astype(xn_ref.dtype)
        acc_ref[...] = jnp.zeros_like(acc_ref)

    # Normalize the current negatives tile and accumulate sum_j exp(sim_j / temp).
    neg = neg_ref[...].astype(jnp.float32)
    inv_nn = pl.reciprocal(jnp.sqrt(jnp.sum(neg * neg, axis=1, keepdims=True)) + eps)
    nn = (neg * inv_nn).astype(xn_ref.dtype)          # bf16 into MXU if inputs are bf16
    s = lax.dot_general(                              # (TB, TN) == sim_neg / temp
        xn_ref[...], nn,
        dimension_numbers=(((1,), (1,)), ((), ())),   # contract feature dims, no transpose
        preferred_element_type=jnp.float32,
    )
    acc_ref[...] += jnp.sum(jnp.exp(s), axis=1, keepdims=True)

    @pl.when(k == pl.num_programs(1) - 1)
    def _finalize():
        # -log(exp(sim_pos/temp) / (sum_exp_neg + eps)) == log(sum+eps) - sim_pos/temp
        nll_ref[...] = jnp.log(acc_ref[...] + eps) - simpos_ref[...]


def _pick_tile(dim, candidates):
    for t in candidates:
        if dim % t == 0:
            return t
    return dim  # fall back to the full (untiled) extent


def simple_contrastive_loss(x, positive, negative, temp=0.1):
    """Pallas implementation of SimpleContrastiveLoss.forward. Returns scalar f32."""
    B, D = x.shape
    N, Dn = negative.shape
    assert positive.shape == (B, D) and Dn == D

    # Batch tile (MXU rows per step) and negatives tile (streamed, double-buffered).
    # Kept modest so the pipeline fits v7x's smaller (64 MiB) VMEM even at large D.
    TB = _pick_tile(B, (128, 64, 32, 16, 8))
    TN = _pick_tile(N, (512, 256, 128))
    nb, nk = B // TB, N // TN

    # Feed the MXU bf16 when inputs are bf16; all elementwise math stays f32.
    mxu_dtype = jnp.bfloat16 if x.dtype == jnp.bfloat16 else jnp.float32

    kernel = functools.partial(_contrastive_kernel,
                               inv_temp=1.0 / float(temp), eps=1e-6)

    nll = pl.pallas_call(
        kernel,
        out_shape=jax.ShapeDtypeStruct((B, 1), jnp.float32),
        grid_spec=pltpu.PrefetchScalarGridSpec(
            num_scalar_prefetch=0,
            grid=(nb, nk),                                    # reduction axis last
            in_specs=[
                pl.BlockSpec((TB, D), lambda i, k: (i, 0)),   # x: resident per B tile
                pl.BlockSpec((TB, D), lambda i, k: (i, 0)),   # positive: resident
                pl.BlockSpec((TN, D), lambda i, k: (k, 0)),   # negatives: streamed
            ],
            out_specs=pl.BlockSpec((TB, 1), lambda i, k: (i, 0)),
            scratch_shapes=[
                pltpu.VMEM((TB, D), mxu_dtype),               # cached normalized/scaled x
                pltpu.VMEM((TB, 1), jnp.float32),             # sim_pos / temp
                pltpu.VMEM((TB, 1), jnp.float32),             # running sum_exp_neg
            ],
        ),
        compiler_params=pltpu.CompilerParams(
            dimension_semantics=("parallel", "arbitrary"),
            vmem_limit_bytes=32 * 1024 * 1024,
        ),
    )(x, positive, negative)

    # Tiny final reduction (mean NLL over the batch) outside the kernel.
    return jnp.sum(nll) / jnp.float32(B)


def _reference_loss(x, positive, negative, temp=0.1):
    """Pure-JAX reference mirroring the PyTorch forward."""
    eps = 1e-6
    xn = x / (jnp.linalg.norm(x, axis=1, keepdims=True) + eps)
    pn = positive / (jnp.linalg.norm(positive, axis=1, keepdims=True) + eps)
    nn = negative / (jnp.linalg.norm(negative, axis=1, keepdims=True) + eps)
    sim_pos = jnp.sum(xn * pn, axis=1)                       # diagonal(x @ pos.T)
    sim_neg = lax.dot_general(xn, nn, (((1,), (1,)), ((), ())),
                              precision=lax.Precision.HIGHEST)
    exp_pos = jnp.exp(sim_pos / temp)
    exp_neg = jnp.exp(sim_neg / temp)
    prob = exp_pos / (jnp.sum(exp_neg, axis=1) + eps)
    return jnp.sum(-jnp.log(prob)) / x.shape[0]


if __name__ == "__main__":
    key = jax.random.PRNGKey(0)
    k1, k2, k3 = jax.random.split(key, 3)

    # Small but lane/MXU-friendly shapes: D multiple of 128; N spans 3 negative
    # tiles and B spans 2 batch tiles, so both grid axes, the per-tile scratch
    # re-init, and the online sum_exp accumulation are exercised.
    B, D, N = 256, 128, 384
    x = jax.random.normal(k1, (B, D), dtype=jnp.float32)
    positive = jax.random.normal(k2, (B, D), dtype=jnp.float32)
    negative = jax.random.normal(k3, (N, D), dtype=jnp.float32)  # module's self.negative

    loss = jax.block_until_ready(simple_contrastive_loss(x, positive, negative, temp=0.1))
    ref = jax.block_until_ready(_reference_loss(x, positive, negative, temp=0.1))
    assert jnp.allclose(loss, ref, rtol=1e-4, atol=1e-5), (loss, ref)

    print("KERNEL_OK")
</pallas_src>

<mosaic_0001>
module attributes {stable_mosaic.version = 11 : i64} {
  func.func @_contrastive_kernel(%arg0: i32, %arg1: i32, %arg2: memref<128x128xf32, #tpu.memory_space<vmem>>, %arg3: memref<128x128xf32, #tpu.memory_space<vmem>>, %arg4: memref<128x128xf32, #tpu.memory_space<vmem>>, %arg5: memref<128x1xf32, #tpu.memory_space<vmem>>, %arg6: memref<128x128xf32, #tpu.memory_space<vmem>>, %arg7: memref<128x1xf32, #tpu.memory_space<vmem>>, %arg8: memref<128x1xf32, #tpu.memory_space<vmem>>) attributes {dimension_semantics = [#tpu.dimension_semantics<parallel>, #tpu.dimension_semantics<arbitrary>], iteration_bounds = array<i64: 2, 3>, scalar_prefetch = 0 : i64, scratch_operands = 3 : i64, tpu.core_type = #tpu.core_type<tc>, window_params = [{transform_indices = @transform_0, window_bounds = array<i64: 128, 128>}, {transform_indices = @transform_1, window_bounds = array<i64: 128, 128>}, {transform_indices = @transform_2, window_bounds = array<i64: 128, 128>}, {transform_indices = @transform_3, window_bounds = array<i64: 128, 1>}]} {
    %c0_i32 = arith.constant 0 : i32
    %0 = arith.cmpi eq, %arg1, %c0_i32 : i32
    %1 = arith.extui %0 : i1 to i32
    %c0_i32_0 = arith.constant 0 : i32
    %2 = arith.cmpi ne, %1, %c0_i32_0 : i32
    scf.if %2 {
      %c0_12 = arith.constant 0 : index
      %c0_13 = arith.constant 0 : index
      %24 = vector.load %arg2[%c0_12, %c0_13] : memref<128x128xf32, #tpu.memory_space<vmem>>, vector<128x128xf32>
      %c0_14 = arith.constant 0 : index
      %c0_15 = arith.constant 0 : index
      %25 = vector.load %arg3[%c0_14, %c0_15] : memref<128x128xf32, #tpu.memory_space<vmem>>, vector<128x128xf32>
      %26 = arith.mulf %24, %24 : vector<128x128xf32>
      %cst_16 = arith.constant dense<0.000000e+00> : vector<128xf32>
      %27 = vector.multi_reduction <add>, %26, %cst_16 [1] : vector<128x128xf32> to vector<128xf32>
      %28 = vector.shape_cast %27 : vector<128xf32> to vector<128x1xf32>
      %29 = math.sqrt %28 : vector<128x1xf32>
      %cst_17 = arith.constant 9.99999997E-7 : f32
      %30 = vector.broadcast %cst_17 : f32 to vector<128x1xf32>
      %31 = arith.addf %29, %30 : vector<128x1xf32>
      %32 = tpu.reciprocal %31 : vector<128x1xf32> -> vector<128x1xf32>
      %33 = arith.mulf %25, %25 : vector<128x128xf32>
      %cst_18 = arith.constant dense<0.000000e+00> : vector<128xf32>
      %34 = vector.multi_reduction <add>, %33, %cst_18 [1] : vector<128x128xf32> to vector<128xf32>
      %35 = vector.shape_cast %34 : vector<128xf32> to vector<128x1xf32>
      %36 = math.sqrt %35 : vector<128x1xf32>
      %cst_19 = arith.constant 9.99999997E-7 : f32
      %37 = vector.broadcast %cst_19 : f32 to vector<128x1xf32>
      %38 = arith.addf %36, %37 : vector<128x1xf32>
      %39 = tpu.reciprocal %38 : vector<128x1xf32> -> vector<128x1xf32>
      %cst_20 = arith.constant 1.000000e+01 : f32
      %40 = vector.broadcast %cst_20 : f32 to vector<128x1xf32>
      %41 = arith.mulf %32, %40 : vector<128x1xf32>
      %42 = vector.broadcast %41 : vector<128x1xf32> to vector<128x128xf32>
      %43 = arith.mulf %24, %42 : vector<128x128xf32>
      %44 = vector.broadcast %39 : vector<128x1xf32> to vector<128x128xf32>
      %45 = arith.mulf %25, %44 : vector<128x128xf32>
      %46 = arith.mulf %43, %45 : vector<128x128xf32>
      %cst_21 = arith.constant dense<0.000000e+00> : vector<128xf32>
      %47 = vector.multi_reduction <add>, %46, %cst_21 [1] : vector<128x128xf32> to vector<128xf32>
      %48 = vector.shape_cast %47 : vector<128xf32> to vector<128x1xf32>
      %c0_22 = arith.constant 0 : index
      %c0_23 = arith.constant 0 : index
      %49 = vector.load %arg7[%c0_22, %c0_23] : memref<128x1xf32, #tpu.memory_space<vmem>>, vector<128x1xf32>
      tpu.vector_store %arg7[%c0_22, %c0_23], %48 {strides = array<i32>} : memref<128x1xf32, #tpu.memory_space<vmem>>, vector<128x1xf32>,
      %c0_24 = arith.constant 0 : index
      %c0_25 = arith.constant 0 : index
      %50 = vector.load %arg6[%c0_24, %c0_25] : memref<128x128xf32, #tpu.memory_space<vmem>>, vector<128x128xf32>
      tpu.vector_store %arg6[%c0_24, %c0_25], %43 {strides = array<i32>} : memref<128x128xf32, #tpu.memory_space<vmem>>, vector<128x128xf32>,
      %cst_26 = arith.constant 0.000000e+00 : f32
      %51 = vector.broadcast %cst_26 : f32 to vector<128x1xf32>
      %c0_27 = arith.constant 0 : index
      %c0_28 = arith.constant 0 : index
      %52 = vector.load %arg8[%c0_27, %c0_28] : memref<128x1xf32, #tpu.memory_space<vmem>>, vector<128x1xf32>
      tpu.vector_store %arg8[%c0_27, %c0_28], %51 {strides = array<i32>} : memref<128x1xf32, #tpu.memory_space<vmem>>, vector<128x1xf32>,
    } else {
    }
    %c0 = arith.constant 0 : index
    %c0_1 = arith.constant 0 : index
    %3 = vector.load %arg4[%c0, %c0_1] : memref<128x128xf32, #tpu.memory_space<vmem>>, vector<128x128xf32>
    %4 = arith.mulf %3, %3 : vector<128x128xf32>
    %cst = arith.constant dense<0.000000e+00> : vector<128xf32>
    %5 = vector.multi_reduction <add>, %4, %cst [1] : vector<128x128xf32> to vector<128xf32>
    %6 = vector.shape_cast %5 : vector<128xf32> to vector<128x1xf32>
    %7 = math.sqrt %6 : vector<128x1xf32>
    %cst_2 = arith.constant 9.99999997E-7 : f32
    %8 = vector.broadcast %cst_2 : f32 to vector<128x1xf32>
    %9 = arith.addf %7, %8 : vector<128x1xf32>
    %10 = tpu.reciprocal %9 : vector<128x1xf32> -> vector<128x1xf32>
    %11 = vector.broadcast %10 : vector<128x1xf32> to vector<128x128xf32>
    %12 = arith.mulf %3, %11 : vector<128x128xf32>
    %c0_3 = arith.constant 0 : index
    %c0_4 = arith.constant 0 : index
    %13 = vector.load %arg6[%c0_3, %c0_4] : memref<128x128xf32, #tpu.memory_space<vmem>>, vector<128x128xf32>
    %cst_5 = arith.constant dense<0.000000e+00> : vector<128x128xf32>
    %14 = tpu.matmul %13, %12, %cst_5 {dimension_numbers = #tpu.dot_dimension_numbers<[1], [1], [0], [0], [0, 0, 1, 0], [], []>} : vector<128x128xf32>, vector<128x128xf32>, vector<128x128xf32> -> vector<128x128xf32>
    %c0_6 = arith.constant 0 : index
    %c0_7 = arith.constant 0 : index
    %15 = vector.load %arg8[%c0_6, %c0_7] : memref<128x1xf32, #tpu.memory_space<vmem>>, vector<128x1xf32>
    %16 = math.exp %14 : vector<128x128xf32>
    %cst_8 = arith.constant dense<0.000000e+00> : vector<128xf32>
    %17 = vector.multi_reduction <add>, %16, %cst_8 [1] : vector<128x128xf32> to vector<128xf32>
    %18 = vector.shape_cast %17 : vector<128xf32> to vector<128x1xf32>
    %19 = arith.addf %15, %18 : vector<128x1xf32>
    %c0_9 = arith.constant 0 : index
    %c0_10 = arith.constant 0 : index
    %20 = vector.load %arg8[%c0_9, %c0_10] : memref<128x1xf32, #tpu.memory_space<vmem>>, vector<128x1xf32>
    tpu.vector_store %arg8[%c0_9, %c0_10], %19 {strides = array<i32>} : memref<128x1xf32, #tpu.memory_space<vmem>>, vector<128x1xf32>,
    %c2_i32 = arith.constant 2 : i32
    %21 = arith.cmpi eq, %arg1, %c2_i32 : i32
    %22 = arith.extui %21 : i1 to i32
    %c0_i32_11 = arith.constant 0 : i32
    %23 = arith.cmpi ne, %22, %c0_i32_11 : i32
    scf.if %23 {
      %c0_12 = arith.constant 0 : index
      %c0_13 = arith.constant 0 : index
      %24 = vector.load %arg8[%c0_12, %c0_13] : memref<128x1xf32, #tpu.memory_space<vmem>>, vector<128x1xf32>
      %cst_14 = arith.constant 9.99999997E-7 : f32
      %25 = vector.broadcast %cst_14 : f32 to vector<128x1xf32>
      %26 = arith.addf %24, %25 : vector<128x1xf32>
      %27 = math.log %26 : vector<128x1xf32>
      %c0_15 = arith.constant 0 : index
      %c0_16 = arith.constant 0 : index
      %28 = vector.load %arg7[%c0_15, %c0_16] : memref<128x1xf32, #tpu.memory_space<vmem>>, vector<128x1xf32>
      %29 = arith.subf %27, %28 : vector<128x1xf32>
      %c0_17 = arith.constant 0 : index
      %c0_18 = arith.constant 0 : index
      %30 = vector.load %arg5[%c0_17, %c0_18] : memref<128x1xf32, #tpu.memory_space<vmem>>, vector<128x1xf32>
      tpu.vector_store %arg5[%c0_17, %c0_18], %29 {strides = array<i32>} : memref<128x1xf32, #tpu.memory_space<vmem>>, vector<128x1xf32>,
    } else {
    }
    return
  }
  func.func @transform_0(%arg0: i32, %arg1: i32) -> (i32, i32) {
    %c0_i32 = arith.constant 0 : i32
    %c0_i32_0 = arith.constant 0 : i32
    return %arg0, %c0_i32 : i32, i32
  }
  func.func @transform_1(%arg0: i32, %arg1: i32) -> (i32, i32) {
    %c0_i32 = arith.constant 0 : i32
    %c0_i32_0 = arith.constant 0 : i32
    return %arg0, %c0_i32 : i32, i32
  }
  func.func @transform_2(%arg0: i32, %arg1: i32) -> (i32, i32) {
    %c0_i32 = arith.constant 0 : i32
    %c0_i32_0 = arith.constant 0 : i32
    return %arg1, %c0_i32 : i32, i32
  }
  func.func @transform_3(%arg0: i32, %arg1: i32) -> (i32, i32) {
    %c0_i32 = arith.constant 0 : i32
    %c0_i32_0 = arith.constant 0 : i32
    return %arg0, %c0_i32 : i32, i32
  }
}

</mosaic_0001>

<bundles_post_ra>
// kernel: tpu_custom_call.1
= control target key start
LH: loop header
LB: loop body
LE: loop exit
PB: predicated region body
PF: predicated region fallthrough
CT: control target
= control target key end

     0   :  { %s4964_s0 = inlined_call_operand.hbm [shape: f32[256,128], index: 0, kind: input, shape index: {}]   ;;  %s4965_s1 = inlined_call_operand.hbm [shape: f32[256,128], index: 1, kind: input, shape index: {}]   ;;  %s4966_s2 = inlined_call_operand.hbm [shape: f32[384,128], index: 2, kind: input, shape index: {}]   ;;  %s4967_s3 = inlined_call_operand.vmem [shape: f32[256,1], index: 3, kind: output, shape index: {}]  }
   0x1   :  { %5002 = sst [smem:[#allocation34_spill]] %s4964_s0 }
   0x2   :  { %5003 = sst [smem:[#allocation35_spill]] %s4965_s1 }
   0x3   :  { %8 = vsyncpa [#allocation6], 0 }
   0x4   :  { %10 = vsyncpa [#allocation6 + $0x1], 0 }
   0x5   :  { %11 = vsyncpa [#allocation8], 0 }
   0x6   :  { %13 = vsyncpa [#allocation8 + $0x1], 0  ;;  %s3063_s12 = smov 0   ;;  %s3065_s13 = smov 0  }
   0x7   :  { %s3067_s14 = smov 0   ;;  %s3069_s15 = smov 0  }
   0x8   :  { %s3071_s16 = smov 0   ;;  %s3073_s17 = smov 0  }
   0x9   :  { %s3075_s18 = smov 0   ;;  %s3077_s19 = smov 0  }
   0xa   :  { %s3079_s20 = smov 0   ;;  %s3081_s21 = smov 0  }
   0xb   :  { %s3083_s22 = smov 0  }
   0xc LB: > { %s4968_s23 = sadd.s32 4294967295, %s3038_s22   ;;  %p45_p0 = scmp.ne.s32.totalorder %s3018_s17, %s3014_s16  ;;  %s3038_s22 = sphi %s3083_s22, %s19_s22   ;;  %s3034_s21 = sphi %s3081_s21, %s5106_s21   ;;  %s3030_s20 = sphi %s3079_s20, %s5105_s20   ;;  %s3026_s19 = sphi %s3077_s19, %s5104_s19   ;;  %s3022_s18 = sphi %s3075_s18, %s5103_s18   ;;  %s3018_s17 = sphi %s3073_s17, %s5102_s17   ;;  %s3014_s16 = sphi %s3071_s16, %s5101_s16   ;;  %s3010_s15 = sphi %s3069_s15, %s5100_s15   ;;  %s3006_s14 = sphi %s3067_s14, %s5099_s14   ;;  %s3002_s13 = sphi %s3065_s13, %s5098_s13   ;;  %s2998_s12 = sphi %s3063_s12, %s5097_s12  }
   0xd   : > { %p46_p1 = scmp.eq.s32.totalorder %s3038_s22, 0  ;;  %p51_p2 = scmp.ne.s32.totalorder %s3014_s16, %s3010_s15 }
   0xe   : > { %p3125_p3 = scmp.eq.s32.totalorder %s4968_s23, 0  ;;  %p2465_p5 = scmp.lt.s32.totalorder %s3038_s22, 6 }
   0xf   : > { %p47_p4 = por %p46_p1, %p45_p0  ;;  %s153_s28 = sand.u32 1, %s3018_s17  }
  0x10   : > { %p3134_p6 = por %p3125_p3, %p51_p2  ;;  %s2379_s29 = sshll.u32 %s153_s28, 7 }
  0x11   : > { %s2398_s30 = sshll.u32 %s3034_s21, 7  ;;  %p3142_p7 = pnand %p2465_p5, %p47_p4 }
  0x12   : > { %s175_s5 = sand.u32 1, %s3038_s22   ;;  %s5007_s1 = sld [smem:[#allocation35_spill]] }
  0x13   : > { %s179_s10 = scalar_lea.vmem [#allocation7], %s2379_s29  ;;  %s3150_s15 = scalar_lea.sflag [#allocation8], %s175_s5 }
  0x14   : > { %s187_s11 = sshll.u32 %s179_s10, 4  ;;  %s4969_s23 = smov 128   ;;  %s188_s11 = int_to_ptr.vmem [resolvable:$true] %s187_s11 }
  0x15   : > { %s4970_s25 = smov 8   ;;  %p2388_p8 = scmp.ge.s32.totalorder %s3038_s22, 1 }
  0x16   : > { %p217_p9 = scmp.lt.s32.totalorder %s3038_s22, 7  ;;  %s5009_s0 = sld [smem:[#allocation34_spill]] }
  0x17   : > { %s157_s24 = scalar_lea.vmem [#allocation5], %s2379_s29  ;;  %s90_s5 = sadd.s32 1, %s3006_s14 }
  0x18   : > { %s184_s8 = scalar_lea.hbm %s5007_s1, %s2398_s30  ;;  %p3160_p10 = pnand %p2388_p8, %p217_p9 }
  0x19   : > { %s185_s9 = sshll.u32 %s184_s8, 4  ;;  %s28_s1 = sadd.s32 1, %s3030_s20  ;;  %s186_s9 = int_to_ptr.hbm [resolvable:$true] %s185_s9 }
  0x1a   : > { %2461 = dma.hbm_to_vmem [thread:$0]  (!%p3142_p7), %s186_s9, 2048, %s188_s11, %s3150_s15, %s4969_s23, %s4969_s23, %s4970_s25  }
  0x1b   : > { %s165_s9 = sshll.u32 %s157_s24, 4  ;;  %s154_s11 = scalar_lea.sflag [#allocation6], %s153_s28  ;;  %s166_s9 = int_to_ptr.vmem [resolvable:$true] %s165_s9 }
  0x1c   : > { %s162_s8 = scalar_lea.hbm %s5009_s0, %s2398_s30  ;;  %p29_p11 = scmp.ge.s32.totalorder %s28_s1, 3 }
  0x1d   : > { %s163_s10 = sshll.u32 %s162_s8, 4  ;;  %p97_p12 = scmp.ne.s32.totalorder %s3006_s14, %s3002_s13  ;;  %s164_s10 = int_to_ptr.hbm [resolvable:$true] %s163_s10 }
  0x1e   : > { %2458 = dma.hbm_to_vmem [thread:$0]  (!%p3142_p7), %s164_s10, 2048, %s166_s9, %s154_s11, %s4969_s23, %s4969_s23, %s4970_s25  }
  0x1f   : > { %p103_p13 = scmp.ne.s32.totalorder %s3002_s13, %s2998_s12  ;;  %s199_s30 = sand.u32 1, %s3006_s14  }
  0x20   : > { %s5108_s1 = smov (%p29_p11, %s28_s1), 0  ;;  %s5011_s24 = sadd.s32 1, %s3034_s21 }
  0x21   : > { %5010 = sst [smem:[#allocation13_spill]] %s5108_s1  ;;  %s5110_s24 = smov (!%p29_p11, %s5011_s24), %s3034_s21 }
  0x22   : > { %s87_s28 = ssub.s32 %s3030_s20, %s5108_s1  ;;  %p3188_p0 = por %p97_p12, %p46_p1 }
  0x23   : > { %p33_p2 = scmp.ge.s32.totalorder %s5110_s24, 2  ;;  %p88_p4 = scmp.eq.s32.totalorder %s87_s28, 0 }
  0x24   : > { %p3194_p7 = por %p103_p13, %p3125_p3  ;;  %s2385_s4 = sshll.u32 %s199_s30, 7 }
  0x25   : > { %s5112_s24 = smov (%p33_p2, %s5110_s24), 0  ;;  %s2400_s10 = sshll.u32 %s3030_s20, 7 }
  0x26   : > { %s3201_s7 = scalar_select %p88_p4, %s3006_s14, %s90_s5  }
  0x27   : > { %s35_s8 = ssub.s32 %s3034_s21, %s5112_s24  ;;  %s206_s23 = scalar_lea.hbm %s4966_s2, %s2400_s10 }
  0x28   : > { %p36_p1 = scmp.eq.s32.totalorder %s35_s8, 0  ;;  %s201_s28 = scalar_lea.vmem [#allocation9], %s2385_s4 }
  0x29   : > { %s209_s26 = sshll.u32 %s201_s28, 4  ;;  %s5014_s25 = sadd.s32 1, %s3018_s17  ;;  %s210_s26 = int_to_ptr.vmem [resolvable:$true] %s209_s26 }
  0x2a   : > { %s3212_s0 = scalar_select %p36_p1, %s3018_s17, %s5014_s25  }
  0x2b   : > { %s207_s1 = sshll.u32 %s206_s23, 4  ;;  %p2462_p3 = pnand %p2465_p5, %p3188_p0  ;;  %s208_s1 = int_to_ptr.hbm [resolvable:$true] %s207_s1 }
  0x2c   : > { %s5015_s5 = smov 8   ;;  %s5016_s30 = smov 128  }
  0x2d   : > { %2464 = dma.hbm_to_vmem [thread:$0]  (!%p2462_p3), %s208_s1, 2048, %s210_s26, %s3150_s15, %s5016_s30, %s5016_s30, %s5015_s5  }
  0x2e   : > { %221 = sbr.rel (%p3160_p10) target bundleno = 1116 (0x45c), region = 32  ;;  %s223_s4 = sand.u32 (!%p3160_p10), 1, %s3014_s16  }
  0x2f   : > { %s2389_s8 = sshll.u32 (!%p3160_p10), %s223_s4, 7  ;;  %s224_s10 = scalar_lea.sflag (!%p3160_p10), [#allocation6], %s223_s4 }
  0x30   : > { %s3225_s25 = scalar_lea.vmem (!%p3160_p10), [#allocation5], %s2389_s8 }
  0x33   : > { %2985 = dma.done.wait (%p3134_p6), %s224_s10, 2048  }
  0x34   : > { %2987 = vsyncadd (%p3134_p6), %s224_s10, 4294965248  ;;  %s5017_s23 = sadd.s32 4294967295, %s3038_s22   ;;  %s3233_s15 = scalar_lea.vmem [#allocation7], %s2389_s8 }
  0x35   : > { %s233_s29 = sand.u32 1, %s5017_s23  }
  0x36   : > { %s234_s1 = scalar_lea.sflag [#allocation8], %s233_s29 }
  0x37   : > { %2989 = dma.done.wait (%p3134_p6), %s234_s1, 2048  }
  0x38   : > { %2991 = vsyncadd (%p3134_p6), %s234_s1, 4294965248  ;;  %s245_s6 = sand.u32 1, %s3002_s13  }
  0x39   : > { %s2391_s9 = sshll.u32 %s245_s6, 7 }
  0x3a   : > { %s3240_s11 = scalar_lea.vmem [#allocation9], %s2391_s9 }
  0x3b   : > { %2993 = dma.done.wait (%p3194_p7), %s234_s1, 2048  }
  0x3c   : > { %2995 = vsyncadd (%p3194_p7), %s234_s1, 4294965248  ;;  %s2392_s28 = sshll.u32 %s3026_s19, 4  ;;  %p2394_p6 = scmp.ne.s32.totalorder %s3022_s18, 0 }
  0x3d   : > { %p285_p5 = scmp.lt.s32.totalorder %s2392_s28, 31 }
  0x3e   : > { %293 = sbr.rel (%p2394_p6) target bundleno = 541 (0x21d), region = 48 }
  0x3f   : > { %s5114_s28 = smov (!%p285_p5, %s2392_s28), 31 }
  0x40   : > { %s2393_s26 = sshll.u32 %s5114_s28, 3 }
  0x41   : > { %s3250_s27 = scalar_lea.vmem %s4967_s3, %s2393_s26 }
  0x43   : > { %v298_v0 = vld [vmem:[%s3225_s25 + $0x20] sm:$0xff]  ;;  %v296_v1 = vld [vmem:[%s3225_s25 + $0x10] sm:$0xff]  ;;  %v299_v6 = vld [vmem:[%s3225_s25 + $0x28] sm:$0xff] }
  0x44   : > { %v294_v2 = vld [vmem:[%s3225_s25] sm:$0xff]  ;;  %v330_v3 = vmul.f32 %v298_v0, %v298_v0  ;;  %v328_v4 = vmul.f32 %v296_v1, %v296_v1  ;;  %v297_v7 = vld [vmem:[%s3225_s25 + $0x18] sm:$0xff]  ;;  %v295_v8 = vld [vmem:[%s3225_s25 + $0x8] sm:$0xff]  ;;  %v331_v9 = vmul.f32 %v299_v6, %v299_v6 }
  0x45   : > { %v326_v5 = vmul.f32 %v294_v2, %v294_v2  ;;  %v329_v10 = vmul.f32 %v297_v7, %v297_v7  ;;  %v327_v11 = vmul.f32 %v295_v8, %v295_v8  ;;  %v302_v12 = vld [vmem:[%s3225_s25 + $0x40] sm:$0xff]  ;;  %v301_v13 = vld [vmem:[%s3225_s25 + $0x38] sm:$0xff]  ;;  %v300_v14 = vld [vmem:[%s3225_s25 + $0x30] sm:$0xff] }
  0x46   : > { %350 = vadd.xlane.f32.xlu2 %v330_v3  ;;  %346 = vadd.xlane.f32.xlu1 %v328_v4  ;;  %v334_v15 = vmul.f32 %v302_v12, %v302_v12  ;;  %v333_v16 = vmul.f32 %v301_v13, %v301_v13  ;;  %v332_v17 = vmul.f32 %v300_v14, %v300_v14  ;;  %v305_v18 = vld [vmem:[%s3225_s25 + $0x58] sm:$0xff]  ;;  %v304_v19 = vld [vmem:[%s3225_s25 + $0x50] sm:$0xff]  ;;  %v303_v20 = vld [vmem:[%s3225_s25 + $0x48] sm:$0xff] }
  0x47   : > { %342 = vadd.xlane.f32.xlu0 %v326_v5  ;;  %v337_v21 = vmul.f32 %v305_v18, %v305_v18  ;;  %v336_v22 = vmul.f32 %v304_v19, %v304_v19  ;;  %v335_v23 = vmul.f32 %v303_v20, %v303_v20  ;;  %v308_v24 = vld [vmem:[%s3225_s25 + $0x70] sm:$0xff]  ;;  %v307_v25 = vld [vmem:[%s3225_s25 + $0x68] sm:$0xff]  ;;  %v306_v26 = vld [vmem:[%s3225_s25 + $0x60] sm:$0xff] }
  0x48   : > { %v340_v27 = vmul.f32 %v308_v24, %v308_v24  ;;  %v339_v28 = vmul.f32 %v307_v25, %v307_v25  ;;  %v338_v29 = vmul.f32 %v306_v26, %v306_v26  ;;  %v311_v30 = vld [vmem:[%s3233_s15 + $0x8] sm:$0xff]  ;;  %v310_v31 = vld [vmem:[%s3233_s15] sm:$0xff]  ;;  %v309_v32 = vld [vmem:[%s3225_s25 + $0x78] sm:$0xff] }
  0x49   : > { %v807_v33 = vmul.f32 %v311_v30, %v311_v30  ;;  %v806_v34 = vmul.f32 %v310_v31, %v310_v31  ;;  %v341_v35 = vmul.f32 %v309_v32, %v309_v32  ;;  %v314_v36 = vld [vmem:[%s3233_s15 + $0x20] sm:$0xff]  ;;  %v313_v37 = vld [vmem:[%s3233_s15 + $0x18] sm:$0xff]  ;;  %v312_v38 = vld [vmem:[%s3233_s15 + $0x10] sm:$0xff] }
  0x4a   : > { %v810_v39 = vmul.f32 %v314_v36, %v314_v36  ;;  %v809_v40 = vmul.f32 %v313_v37, %v313_v37  ;;  %v808_v41 = vmul.f32 %v312_v38, %v312_v38  ;;  %v317_v42 = vld [vmem:[%s3233_s15 + $0x38] sm:$0xff]  ;;  %v316_v43 = vld [vmem:[%s3233_s15 + $0x30] sm:$0xff]  ;;  %v315_v44 = vld [vmem:[%s3233_s15 + $0x28] sm:$0xff] }
  0x4b   : > { %v813_v45 = vmul.f32 %v317_v42, %v317_v42  ;;  %v812_v46 = vmul.f32 %v316_v43, %v316_v43  ;;  %v811_v47 = vmul.f32 %v315_v44, %v315_v44  ;;  %v320_v48 = vld [vmem:[%s3233_s15 + $0x50] sm:$0xff]  ;;  %v319_v49 = vld [vmem:[%s3233_s15 + $0x48] sm:$0xff]  ;;  %v318_v50 = vld [vmem:[%s3233_s15 + $0x40] sm:$0xff] }
  0x4c   : > { %v816_v51 = vmul.f32 %v320_v48, %v320_v48  ;;  %v815_v52 = vmul.f32 %v319_v49, %v319_v49  ;;  %v814_v53 = vmul.f32 %v318_v50, %v318_v50  ;;  %v323_v54 = vld [vmem:[%s3233_s15 + $0x68] sm:$0xff]  ;;  %v322_v55 = vld [vmem:[%s3233_s15 + $0x60] sm:$0xff]  ;;  %v321_v56 = vld [vmem:[%s3233_s15 + $0x58] sm:$0xff] }
  0x4d   : > { %v819_v57 = vmul.f32 %v323_v54, %v323_v54  ;;  %v818_v58 = vmul.f32 %v322_v55, %v322_v55  ;;  %v817_v59 = vmul.f32 %v321_v56, %v321_v56  ;;  %v325_v60 = vld [vmem:[%s3233_s15 + $0x78] sm:$0xff]  ;;  %v324_v61 = vld [vmem:[%s3233_s15 + $0x70] sm:$0xff] }
  0x4e   : > { %352 = vadd.xlane.f32.xlu2 %v331_v9  ;;  %348 = vadd.xlane.f32.xlu1 %v329_v10  ;;  %v821_v62 = vmul.f32 %v325_v60, %v325_v60  ;;  %v820_v63 = vmul.f32 %v324_v61, %v324_v61 }
  0x4f   : > { %344 = vadd.xlane.f32.xlu0 %v327_v11 }
  0x56   : > { %358 = vadd.xlane.f32.xlu2 %v334_v15  ;;  %356 = vadd.xlane.f32.xlu1 %v333_v16 }
  0x57   : > { %354 = vadd.xlane.f32.xlu0 %v332_v17 }
  0x5e   : > { %364 = vadd.xlane.f32.xlu2 %v337_v21  ;;  %362 = vadd.xlane.f32.xlu1 %v336_v22 }
  0x5f   : > { %360 = vadd.xlane.f32.xlu0 %v335_v23 }
  0x66   : > { %370 = vadd.xlane.f32.xlu2 %v340_v27  ;;  %368 = vadd.xlane.f32.xlu1 %v339_v28 }
  0x67   : > { %366 = vadd.xlane.f32.xlu0 %v338_v29 }
  0x6e   : > { %824 = vadd.xlane.f32.xlu2 %v807_v33  ;;  %822 = vadd.xlane.f32.xlu1 %v806_v34 }
  0x6f   : > { %372 = vadd.xlane.f32.xlu0 %v341_v35 }
  0x76   : > { %830 = vadd.xlane.f32.xlu2 %v810_v39  ;;  %828 = vadd.xlane.f32.xlu1 %v809_v40 }
  0x77   : > { %826 = vadd.xlane.f32.xlu0 %v808_v41 }
  0x7e   : > { %836 = vadd.xlane.f32.xlu2 %v813_v45  ;;  %834 = vadd.xlane.f32.xlu1 %v812_v46 }
  0x7f   : > { %832 = vadd.xlane.f32.xlu0 %v811_v47 }
  0x86   : > { %842 = vadd.xlane.f32.xlu2 %v816_v51  ;;  %840 = vadd.xlane.f32.xlu1 %v815_v52 }
  0x87   : > { %838 = vadd.xlane.f32.xlu0 %v814_v53 }
  0x8e   : > { %848 = vadd.xlane.f32.xlu2 %v819_v57  ;;  %846 = vadd.xlane.f32.xlu1 %v818_v58 }
  0x8f   : > { %844 = vadd.xlane.f32.xlu0 %v817_v59 }
  0x96   : > { %852 = vadd.xlane.f32.xlu1 %v821_v62 }
  0x97   : > { %850 = vadd.xlane.f32.xlu0 %v820_v63 }
  0xb9   : > { %v3285_v0 = vpop.xlane.xlu2 %350  ;;  %v3287_v1 = vpop.xlane.xlu1 %346 }
  0xba   : > { %2557 = vrsqrt.f32 %v3285_v0  ;;  %v3290_v2 = vpop.xlane.xlu0 %342  ;;  %vm429_vm0 = vcmp.eq.f32.partialorder %v3285_v0, inf  ;;  %vm431_vm1 = vcmp.eq.f32.partialorder %v3285_v0, 0.0  ;;  %v432_v20 = vand.u32 2147483648, %v3285_v0 }
  0xbb   : > { %2559 = vrsqrt.f32 %v3287_v1  ;;  %vm405_vm2 = vcmp.eq.f32.partialorder %v3287_v1, inf  ;;  %vm407_vm3 = vcmp.eq.f32.partialorder %v3287_v1, 0.0  ;;  %v408_v32 = vand.u32 2147483648, %v3287_v1 }
  0xbc   : > { %2561 = vrsqrt.f32 %v3290_v2  ;;  %vm381_vm4 = vcmp.eq.f32.partialorder %v3290_v2, inf  ;;  %vm383_vm5 = vcmp.eq.f32.partialorder %v3290_v2, 0.0  ;;  %v384_v46 = vand.u32 2147483648, %v3290_v2 }
  0xc0   : > { %v2558_v3 = vpop.eup %2557 }
  0xc1   : > { %v2560_v4 = vpop.eup %2559  ;;  %v423_v5 = vmul.f32 %v2558_v3, %v3285_v0  ;;  %v3295_v6 = vpop.xlane.xlu2 %352 }
  0xc2   : > { %v3297_v7 = vpop.xlane.xlu1 %348  ;;  %v2562_v8 = vpop.eup %2561  ;;  %v399_v9 = vmul.f32 %v2560_v4, %v3287_v1  ;;  %2563 = vrsqrt.f32 %v3295_v6  ;;  %vm441_vm6 = vcmp.eq.f32.partialorder %v3295_v6, inf  ;;  %vm443_vm7 = vcmp.eq.f32.partialorder %v3295_v6, 0.0 }
  0xc3   : > { %v3301_v10 = vpop.xlane.xlu0 %344  ;;  %v424_v11 = vmul.f32 %v2558_v3, %v423_v5  ;;  %v375_v12 = vmul.f32 %v2562_v8, %v3290_v2  ;;  %2565 = vrsqrt.f32 %v3297_v7  ;;  %v444_v54 = vand.u32 2147483648, %v3295_v6 }
  0xc4   : > { %v400_v13 = vmul.f32 %v2560_v4, %v399_v9  ;;  %2567 = vrsqrt.f32 %v3301_v10  ;;  %vm417_vm8 = vcmp.eq.f32.partialorder %v3297_v7, inf  ;;  %vm419_vm9 = vcmp.eq.f32.partialorder %v3297_v7, 0.0 }
  0xc5   : > { %v425_v14 = vmul.f32 0.5, %v424_v11  ;;  %v376_v15 = vmul.f32 %v2562_v8, %v375_v12  ;;  %vm393_vm10 = vcmp.eq.f32.partialorder %v3301_v10, inf  ;;  %vm395_vm11 = vcmp.eq.f32.partialorder %v3301_v10, 0.0 }
  0xc6   : > { %v401_v16 = vmul.f32 0.5, %v400_v13 }
  0xc7   : > { %v426_v17 = vsub.f32 1.5, %v425_v14  ;;  %v377_v18 = vmul.f32 0.5, %v376_v15 }
  0xc8   : > { %v2564_v19 = vpop.eup %2563  ;;  %v402_v21 = vsub.f32 1.5, %v401_v16  ;;  %v420_v16 = vand.u32 2147483648, %v3297_v7 }
  0xc9   : > { %v2566_v22 = vpop.eup %2565  ;;  %v427_v23 = vmul.f32 %v2558_v3, %v426_v17  ;;  %v378_v24 = vsub.f32 1.5, %v377_v18  ;;  %v435_v25 = vmul.f32 %v2564_v19, %v3295_v6  ;;  %v3311_v26 = vpop.xlane.xlu2 %358  ;;  %v396_v17 = vand.u32 2147483648, %v3301_v10 }
  0xca   : > { %v403_v27 = vmul.f32 %v2560_v4, %v402_v21  ;;  %v411_v28 = vmul.f32 %v2566_v22, %v3297_v7  ;;  %2569 = vrsqrt.f32 %v3311_v26  ;;  %v3316_v29 = vpop.xlane.xlu1 %356  ;;  %v2568_v30 = vpop.eup %2567  ;;  %vm477_vm12 = vcmp.eq.f32.partialorder %v3311_v26, inf }
  0xcb   : > { %v428_v31 = vmul.f32 %v427_v23, %v3285_v0  ;;  %v379_v33 = vmul.f32 %v2562_v8, %v378_v24  ;;  %v436_v34 = vmul.f32 %v2564_v19, %v435_v25  ;;  %v387_v37 = vmul.f32 %v2568_v30, %v3301_v10  ;;  %v3323_v38 = vpop.xlane.xlu0 %354 }
  0xcc   : > { %v404_v35 = vmul.f32 %v403_v27, %v3287_v1  ;;  %v412_v36 = vmul.f32 %v2566_v22, %v411_v28  ;;  %2571 = vrsqrt.f32 %v3316_v29  ;;  %vm479_vm13 = vcmp.eq.f32.partialorder %v3311_v26, 0.0 }
  0xcd   : > { %v430_v39 = vsel %vm429_vm0, %v3285_v0, %v428_v31  ;;  %v380_v40 = vmul.f32 %v379_v33, %v3290_v2  ;;  %v437_v41 = vmul.f32 0.5, %v436_v34  ;;  %v388_v44 = vmul.f32 %v2568_v30, %v387_v37 }
  0xce   : > { %v406_v42 = vsel %vm405_vm2, %v3287_v1, %v404_v35  ;;  %v413_v43 = vmul.f32 0.5, %v412_v36  ;;  %v433_v49 = vsel %vm431_vm1, %v432_v20, %v430_v39  ;;  %2573 = vrsqrt.f32 %v3323_v38 }
  0xcf   : > { %v382_v45 = vsel %vm381_vm4, %v3290_v2, %v380_v40  ;;  %v438_v47 = vsub.f32 1.5, %v437_v41  ;;  %v389_v51 = vmul.f32 0.5, %v388_v44  ;;  %v409_v52 = vsel %vm407_vm3, %v408_v32, %v406_v42 }
  0xd0   : > { %v2570_v48 = vpop.eup %2569  ;;  %v414_v50 = vsub.f32 1.5, %v413_v43  ;;  %v385_v57 = vsel %vm383_vm5, %v384_v46, %v382_v45  ;;  %v3349_v61 = vadd.f32 1e-06, %v433_v49  ;;  %v3353_v0 = vadd.f32 1e-06, %v409_v52 }
  0xd1   : > { %v439_v53 = vmul.f32 %v2564_v19, %v438_v47  ;;  %v471_v55 = vmul.f32 %v2570_v48, %v3311_v26  ;;  %v3344_v56 = vpop.xlane.xlu2 %364  ;;  %v390_v59 = vsub.f32 1.5, %v389_v51  ;;  %v3359_v5 = vadd.f32 1e-06, %v385_v57 }
  0xd2   : > { %v415_v58 = vmul.f32 %v2566_v22, %v414_v50  ;;  %v2572_v60 = vpop.eup %2571  ;;  %v3357_v4 = vpop.xlane.xlu1 %362  ;;  %2575 = vrcp.f32 %v3349_v61  ;;  %v480_v34 = vand.u32 2147483648, %v3311_v26  ;;  %vm465_vm14 = vcmp.eq.f32.partialorder %v3316_v29, inf }
  0xd3   : > { %v440_v62 = vmul.f32 %v439_v53, %v3295_v6  ;;  %v472_v63 = vmul.f32 %v2570_v48, %v471_v55  ;;  %v391_v3 = vmul.f32 %v2568_v30, %v390_v59  ;;  %v459_v2 = vmul.f32 %v2572_v60, %v3316_v29  ;;  %v3371_v15 = vpop.xlane.xlu0 %360 }
  0xd4   : > { %v416_v1 = vmul.f32 %v415_v58, %v3297_v7  ;;  %2577 = vrcp.f32 %v3353_v0  ;;  %v2574_v27 = vpop.eup %2573  ;;  %vm467_vm15 = vcmp.eq.f32.partialorder %v3316_v29, 0.0  ;;  %vm453_vm0 = vcmp.eq.f32.partialorder %v3323_v38, inf }
  0xd5   : > { %v442_v8 = vsel %vm441_vm6, %v3295_v6, %v440_v62  ;;  %v473_v9 = vmul.f32 0.5, %v472_v63  ;;  %v392_v13 = vmul.f32 %v391_v3, %v3301_v10  ;;  %v460_v14 = vmul.f32 %v2572_v60, %v459_v2 }
  0xd6   : > { %v445_v11 = vsel %vm443_vm7, %v444_v54, %v442_v8  ;;  %v418_v12 = vsel %vm417_vm8, %v3297_v7, %v416_v1  ;;  %2579 = vrcp.f32 %v3359_v5  ;;  %vm455_vm1 = vcmp.eq.f32.partialorder %v3323_v38, 0.0 }
  0xd7   : > { %v474_v18 = vsub.f32 1.5, %v473_v9  ;;  %v3377_v6 = vadd.f32 1e-06, %v445_v11  ;;  %v394_v19 = vsel %vm393_vm10, %v3301_v10, %v392_v13  ;;  %v461_v20 = vmul.f32 0.5, %v460_v14 }
  0xd8   : > { %v421_v21 = vsel %vm419_vm9, %v420_v16, %v418_v12  ;;  %v397_v24 = vsel %vm395_vm11, %v396_v17, %v394_v19  ;;  %2581 = vrsqrt.f32 %v3344_v56  ;;  %v447_v10 = vmul.f32 %v2574_v27, %v3323_v38  ;;  %v3398_v33 = vpop.eup %2575 }
  0xd9   : > { %v475_v22 = vmul.f32 %v2570_v48, %v474_v18  ;;  %v3384_v23 = vpop.xlane.xlu2 %370  ;;  %v462_v25 = vsub.f32 1.5, %v461_v20  ;;  %2583 = vrcp.f32 %v3377_v6  ;;  %v3391_v7 = vadd.f32 1e-06, %v421_v21 }
  0xda   : > { %v3394_v31 = vadd.f32 1e-06, %v397_v24  ;;  %2585 = vrsqrt.f32 %v3357_v4  ;;  %v448_v35 = vmul.f32 %v2574_v27, %v447_v10  ;;  %v3402_v36 = vpop.xlane.xlu1 %368  ;;  %v3404_v37 = vpop.eup %2577  ;;  %v456_v51 = vand.u32 2147483648, %v3323_v38 }
  0xdb   : > { %v476_v28 = vmul.f32 %v475_v22, %v3311_v26  ;;  %v463_v30 = vmul.f32 %v2572_v60, %v462_v25  ;;  %2587 = vrsqrt.f32 %v3371_v15  ;;  %v3412_v43 = vpop.xlane.xlu0 %366  ;;  %vm513_vm2 = vcmp.eq.f32.partialorder %v3344_v56, inf }
  0xdc   : > { %2589 = vrsqrt.f32 %v3384_v23  ;;  %v3408_v39 = vpop.eup %2579  ;;  %v449_v42 = vmul.f32 0.5, %v448_v35  ;;  %v516_v59 = vand.u32 2147483648, %v3344_v56  ;;  %vm515_vm3 = vcmp.eq.f32.partialorder %v3344_v56, 0.0 }
  0xdd   : > { %v478_v32 = vsel %vm477_vm12, %v3311_v26, %v476_v28  ;;  %2591 = vrcp.f32 %v3391_v7  ;;  %v464_v41 = vmul.f32 %v463_v30, %v3316_v29  ;;  %v468_v26 = vand.u32 2147483648, %v3316_v29 }
  0xde   : > { %v481_v40 = vsel %vm479_vm13, %v480_v34, %v478_v32  ;;  %v2582_v44 = vpop.eup %2581  ;;  %2593 = vrcp.f32 %v3394_v31  ;;  %v450_v46 = vsub.f32 1.5, %v449_v42  ;;  %vm501_vm4 = vcmp.eq.f32.partialorder %v3357_v4, inf }
  0xdf   : > { %v3418_v45 = vpop.eup %2583  ;;  %v507_v47 = vmul.f32 %v2582_v44, %v3344_v56  ;;  %2595 = vrsqrt.f32 %v3402_v36  ;;  %v3425_v50 = vadd.f32 1e-06, %v481_v40  ;;  %v466_v53 = vsel %vm465_vm14, %v3316_v29, %v464_v41 }
  0xe0   : > { %v2586_v49 = vpop.eup %2585  ;;  %2597 = vrsqrt.f32 %v3412_v43  ;;  %v451_v54 = vmul.f32 %v2574_v27, %v450_v46  ;;  %v469_v9 = vsel %vm467_vm15, %v468_v26, %v466_v53  ;;  %v504_v11 = vand.u32 2147483648, %v3357_v4 }
  0xe1   : > { %v3423_v48 = vpop.xlane.xlu2 %824  ;;  %5018 = vst [vmem:[#allocation14_spill] sm:$0xff] %v3425_v50  ;;  %v2588_v52 = vpop.eup %2587  ;;  %v508_v55 = vmul.f32 %v2582_v44, %v507_v47  ;;  %v495_v57 = vmul.f32 %v2586_v49, %v3357_v4  ;;  %v492_v13 = vand.u32 2147483648, %v3371_v15  ;;  %vm503_vm5 = vcmp.eq.f32.partialorder %v3357_v4, 0.0 }
  0xe2   : > { %v2590_v58 = vpop.eup %2589  ;;  %v483_v60 = vmul.f32 %v2588_v52, %v3371_v15  ;;  %2599 = vrsqrt.f32 %v3423_v48  ;;  %v452_v63 = vmul.f32 %v451_v54, %v3323_v38  ;;  %vm489_vm6 = vcmp.eq.f32.partialorder %v3371_v15, inf  ;;  %v3451_v19 = vpop.xlane.xlu1 %822 }
  0xe3   : > { %v3436_v62 = vpop.eup %2591  ;;  %v509_v1 = vmul.f32 0.5, %v508_v55  ;;  %v496_v3 = vmul.f32 %v2586_v49, %v495_v57  ;;  %v543_v2 = vmul.f32 %v2590_v58, %v3384_v23  ;;  %2601 = vrcp.f32 %v3425_v50  ;;  %v3467_v40 = vpop.xlane.xlu0 %372 }
  0xe4   : > { %v3441_v8 = vpop.eup %2593  ;;  %v484_v12 = vmul.f32 %v2588_v52, %v483_v60  ;;  %v454_v20 = vsel %vm453_vm0, %v3323_v38, %v452_v63  ;;  %vm491_vm7 = vcmp.eq.f32.partialorder %v3371_v15, 0.0  ;;  %vm549_vm8 = vcmp.eq.f32.partialorder %v3384_v23, inf }
  0xe5   : > { %v2596_v14 = vpop.eup %2595  ;;  %v510_v16 = vsub.f32 1.5, %v509_v1  ;;  %v497_v17 = vmul.f32 0.5, %v496_v3  ;;  %v544_v18 = vmul.f32 %v2590_v58, %v543_v2  ;;  %v552_v22 = vand.u32 2147483648, %v3384_v23 }
  0xe6   : > { %v2598_v29 = vpop.eup %2597  ;;  %v485_v21 = vmul.f32 0.5, %v484_v12  ;;  %v531_v24 = vmul.f32 %v2596_v14, %v3402_v36  ;;  %v3460_v25 = vadd.f32 1e-06, %v469_v9  ;;  %vm551_vm9 = vcmp.eq.f32.partialorder %v3384_v23, 0.0 }
  0xe7   : > { %v511_v27 = vmul.f32 %v2582_v44, %v510_v16  ;;  %v498_v28 = vsub.f32 1.5, %v497_v17  ;;  %v545_v30 = vmul.f32 0.5, %v544_v18  ;;  %v519_v35 = vmul.f32 %v2598_v29, %v3412_v43 }
  0xe8   : > { %v3462_v10 = vpop.eup %2599  ;;  %v486_v32 = vsub.f32 1.5, %v485_v21  ;;  %v532_v34 = vmul.f32 %v2596_v14, %v531_v24  ;;  %2603 = vrsqrt.f32 %v3451_v19  ;;  %v457_v41 = vsel %vm455_vm1, %v456_v51, %v454_v20 }
  0xe9   : > { %v512_v42 = vmul.f32 %v511_v27, %v3344_v56  ;;  %v499_v44 = vmul.f32 %v2586_v49, %v498_v28  ;;  %v546_v26 = vsub.f32 1.5, %v545_v30  ;;  %vm537_vm10 = vcmp.eq.f32.partialorder %v3402_v36, inf  ;;  %v3475_v55 = vpop.eup %2601  ;;  %v3482_v49 = vpop.xlane.xlu2 %830 }
  0xea   : > { %v487_v46 = vmul.f32 %v2588_v52, %v486_v32  ;;  %v533_v47 = vmul.f32 0.5, %v532_v34  ;;  %v520_v53 = vmul.f32 %v2598_v29, %v519_v35  ;;  %v867_v54 = vmul.f32 %v3462_v10, %v3423_v48  ;;  %5019 = vst [vmem:[#allocation15_spill] sm:$0xff] %v3475_v55  ;;  %v3507_v27 = vpop.xlane.xlu1 %828 }
  0xeb   : > { %v514_v57 = vsel %vm513_vm2, %v3344_v56, %v512_v42  ;;  %v500_v38 = vmul.f32 %v499_v44, %v3357_v4  ;;  %v547_v51 = vmul.f32 %v2590_v58, %v546_v26  ;;  %vm539_vm11 = vcmp.eq.f32.partialorder %v3402_v36, 0.0  ;;  %v3524_v34 = vpop.xlane.xlu0 %826 }
  0xec   : > { %v517_v52 = vsel %vm515_vm3, %v516_v59, %v514_v57  ;;  %v488_v60 = vmul.f32 %v487_v46, %v3371_v15  ;;  %v534_v63 = vsub.f32 1.5, %v533_v47  ;;  %v521_v1 = vmul.f32 0.5, %v520_v53 }
  0xed   : > { %v3487_v3 = vadd.f32 1e-06, %v457_v41  ;;  %v502_v2 = vsel %vm501_vm4, %v3357_v4, %v500_v38  ;;  %v548_v9 = vmul.f32 %v547_v51, %v3384_v23  ;;  %v868_v58 = vmul.f32 %v3462_v10, %v867_v54 }
  0xee   : > { %v2604_v12 = vpop.eup %2603  ;;  %v505_v16 = vsel %vm503_vm5, %v504_v11, %v502_v2  ;;  %v490_v56 = vsel %vm489_vm6, %v3371_v15, %v488_v60  ;;  %v535_v59 = vmul.f32 %v2596_v14, %v534_v63  ;;  %v522_v17 = vsub.f32 1.5, %v521_v1 }
  0xef   : > { %v3499_v18 = vadd.f32 1e-06, %v517_v52  ;;  %v493_v20 = vsel %vm491_vm7, %v492_v13, %v490_v56  ;;  %v550_v21 = vsel %vm549_vm8, %v3384_v23, %v548_v9  ;;  %v540_v24 = vand.u32 2147483648, %v3402_v36 }
  0xf0   : > { %2605 = vrcp.f32 %v3460_v25  ;;  %v536_v4 = vmul.f32 %v535_v59, %v3402_v36  ;;  %v523_v11 = vmul.f32 %v2598_v29, %v522_v17  ;;  %vm525_vm12 = vcmp.eq.f32.partialorder %v3412_v43, inf }
  0xf1   : > { %5020 = vst [vmem:[#allocation16_spill] sm:$0xff] %v3499_v18  ;;  %v3512_v14 = vadd.f32 1e-06, %v505_v16  ;;  %v553_v15 = vsel %vm551_vm9, %v552_v22, %v550_v21  ;;  %v869_v13 = vmul.f32 0.5, %v868_v58  ;;  %v855_v28 = vmul.f32 %v2604_v12, %v3451_v19  ;;  %v3539_v47 = vpop.xlane.xlu2 %836 }
  0xf2   : > { %2607 = vrcp.f32 %v3487_v3  ;;  %v3518_v30 = vadd.f32 1e-06, %v493_v20  ;;  %v538_v32 = vsel %vm537_vm10, %v3402_v36, %v536_v4  ;;  %v524_v29 = vmul.f32 %v523_v11, %v3412_v43  ;;  %v3557_v60 = vpop.xlane.xlu1 %834 }
  0xf3   : > { %5021 = vst [vmem:[#allocation17_spill] sm:$0xff] %v3512_v14  ;;  %2609 = vrcp.f32 %v3499_v18  ;;  %v528_v23 = vand.u32 2147483648, %v3412_v43  ;;  %v870_v22 = vsub.f32 1.5, %v869_v13  ;;  %v856_v35 = vmul.f32 %v2604_v12, %v855_v28  ;;  %v3572_v56 = vpop.xlane.xlu0 %832 }
  0xf4   : > { %5022 = vst [vmem:[#allocation18_spill] sm:$0xff] %v3518_v30  ;;  %v3528_v41 = vadd.f32 1e-06, %v553_v15  ;;  %v541_v42 = vsel %vm539_vm11, %v540_v24, %v538_v32  ;;  %v526_v44 = vsel %vm525_vm12, %v3412_v43, %v524_v29  ;;  %2611 = vrsqrt.f32 %v3467_v40 }
  0xf5   : > { %2613 = vrcp.f32 %v3512_v14  ;;  %vm527_vm13 = vcmp.eq.f32.partialorder %v3412_v43, 0.0  ;;  %v871_v26 = vmul.f32 %v3462_v10, %v870_v22  ;;  %v857_v46 = vmul.f32 0.5, %v856_v35 }
  0xf6   : > { %5023 = vst [vmem:[#allocation19_spill] sm:$0xff] %v3528_v41  ;;  %v3541_v53 = vpop.eup %2605  ;;  %2615 = vrcp.f32 %v3518_v30  ;;  %v529_v36 = vsel %vm527_vm13, %v528_v23, %v526_v44  ;;  %v3544_v54 = vadd.f32 1e-06, %v541_v42  ;;  %vm873_vm14 = vcmp.eq.f32.partialorder %v3423_v48, inf }
  0xf7   : > { %v872_v57 = vmul.f32 %v871_v26, %v3423_v48  ;;  %v858_v38 = vsub.f32 1.5, %v857_v46  ;;  %2617 = vrsqrt.f32 %v3482_v49  ;;  %v3553_v10 = vadd.f32 1e-06, %v529_v36 }
  0xf8   : > { %5024 = vst [vmem:[#allocation20_spill] sm:$0xff] %v3544_v54  ;;  %v3548_v51 = vpop.eup %2607  ;;  %2619 = vrcp.f32 %v3528_v41  ;;  %v876_v9 = vand.u32 2147483648, %v3423_v48  ;;  %vm875_vm15 = vcmp.eq.f32.partialorder %v3423_v48, 0.0  ;;  %vm861_vm0 = vcmp.eq.f32.partialorder %v3451_v19, inf }
  0xf9   : > { %v3551_v43 = vpop.eup %2609  ;;  %5026 = vst [vmem:[#allocation22_spill] sm:$0xff] %v3553_v10  ;;  %v859_v52 = vmul.f32 %v2604_v12, %v858_v38  ;;  %2621 = vrsqrt.f32 %v3507_v27  ;;  %v874_v1 = vsel %vm873_vm14, %v3423_v48, %v872_v57  ;;  %vm863_vm1 = vcmp.eq.f32.partialorder %v3451_v19, 0.0  ;;  %v3585_v28 = vpop.xlane.xlu2 %842 }
  0xfa   : > { %5025 = vst [vmem:[#allocation21_spill] sm:$0xff] %v3551_v43  ;;  %v2612_v63 = vpop.eup %2611  ;;  %2623 = vrsqrt.f32 %v3524_v34  ;;  %v877_v17 = vsel %vm875_vm15, %v876_v9, %v874_v1  ;;  %v864_v4 = vand.u32 2147483648, %v3451_v19  ;;  %vm561_vm2 = vcmp.eq.f32.partialorder %v3467_v40, inf }
  0xfb   : > { %v3561_v2 = vpop.eup %2613  ;;  %2625 = vrcp.f32 %v3544_v54  ;;  %v860_v58 = vmul.f32 %v859_v52, %v3451_v19  ;;  %v555_v16 = vmul.f32 %v2612_v63, %v3467_v40  ;;  %v564_v13 = vand.u32 2147483648, %v3467_v40 }
  0xfc   : > { %5027 = vst [vmem:[#allocation23_spill] sm:$0xff] %v3561_v2  ;;  %v3567_v12 = vpop.eup %2615  ;;  %2627 = vrsqrt.f32 %v3539_v47  ;;  %v3587_v29 = vadd.f32 1e-06, %v877_v17  ;;  %vm563_vm3 = vcmp.eq.f32.partialorder %v3467_v40, 0.0  ;;  %vm909_vm4 = vcmp.eq.f32.partialorder %v3482_v49, inf }
  0xfd   : > { %5028 = vst [vmem:[#allocation24_spill] sm:$0xff] %v3567_v12  ;;  %v2618_v59 = vpop.eup %2617  ;;  %2629 = vrcp.f32 %v3553_v10  ;;  %v556_v20 = vmul.f32 %v2612_v63, %v555_v16  ;;  %v862_v24 = vsel %vm861_vm0, %v3451_v19, %v860_v58  ;;  %vm911_vm5 = vcmp.eq.f32.partialorder %v3482_v49, 0.0 }
  0xfe   : > { %v3576_v21 = vpop.eup %2619  ;;  %v903_v48 = vmul.f32 %v2618_v59, %v3482_v49  ;;  %2631 = vrsqrt.f32 %v3557_v60  ;;  %v865_v44 = vsel %vm863_vm1, %v864_v4, %v862_v24  ;;  %vm897_vm6 = vcmp.eq.f32.partialorder %v3507_v27, inf }
  0xff   : > { %5029 = vst [vmem:[#allocation25_spill] sm:$0xff] %v3576_v21  ;;  %v2622_v11 = vpop.eup %2621  ;;  %v557_v15 = vmul.f32 0.5, %v556_v20  ;;  %2633 = vrsqrt.f32 %v3572_v56  ;;  %v3607_v20 = vpop.xlane.xlu1 %840  ;;  %v3610_v4 = vadd.f32 1e-06, %v865_v44  ;;  %vm899_vm7 = vcmp.eq.f32.partialorder %v3507_v27, 0.0 }
 0x100   : > { %v2624_v32 = vpop.eup %2623  ;;  %v904_v23 = vmul.f32 %v2618_v59, %v903_v48  ;;  %v891_v35 = vmul.f32 %v2622_v11, %v3507_v27  ;;  %2635 = vrsqrt.f32 %v3585_v28  ;;  %vm885_vm8 = vcmp.eq.f32.partialorder %v3524_v34, inf }
 0x101   : > { %v3592_v42 = vpop.eup %2625  ;;  %v558_v26 = vsub.f32 1.5, %v557_v15  ;;  %v879_v36 = vmul.f32 %v2624_v32, %v3524_v34  ;;  %2637 = vrcp.f32 %v3587_v29  ;;  %vm887_vm9 = vcmp.eq.f32.partialorder %v3524_v34, 0.0 }
 0x102   : > { %5030 = vst [vmem:[#allocation26_spill] sm:$0xff] %v3592_v42  ;;  %v2628_v57 = vpop.eup %2627  ;;  %v905_v38 = vmul.f32 0.5, %v904_v23  ;;  %v892_v52 = vmul.f32 %v2622_v11, %v891_v35  ;;  %vm945_vm10 = vcmp.eq.f32.partialorder %v3539_v47, inf  ;;  %2639 = vrsqrt.f32 %v3607_v20 }
 0x103   : > { %v3602_v9 = vpop.eup %2629  ;;  %v559_v19 = vmul.f32 %v2612_v63, %v558_v26  ;;  %v880_v58 = vmul.f32 %v2624_v32, %v879_v36  ;;  %v939_v16 = vmul.f32 %v2628_v57, %v3539_v47  ;;  %vm947_vm11 = vcmp.eq.f32.partialorder %v3539_v47, 0.0 }
 0x104   : > { %5031 = vst [vmem:[#allocation27_spill] sm:$0xff] %v3602_v9  ;;  %v2632_v24 = vpop.eup %2631  ;;  %v906_v48 = vsub.f32 1.5, %v905_v38  ;;  %v893_v15 = vmul.f32 0.5, %v892_v52  ;;  %v3620_v38 = vpop.xlane.xlu0 %838  ;;  %vm933_vm12 = vcmp.eq.f32.partialorder %v3557_v60, inf  ;;  %vm935_vm13 = vcmp.eq.f32.partialorder %v3557_v60, 0.0 }
 0x105   : > { %v2634_v63 = vpop.eup %2633  ;;  %v560_v23 = vmul.f32 %v559_v19, %v3467_v40  ;;  %v881_v35 = vmul.f32 0.5, %v880_v58  ;;  %v940_v26 = vmul.f32 %v2628_v57, %v939_v16  ;;  %v927_v36 = vmul.f32 %v2632_v24, %v3557_v60 }
 0x106   : > { %v907_v17 = vmul.f32 %v2618_v59, %v906_v48  ;;  %v894_v1 = vsub.f32 1.5, %v893_v15  ;;  %v915_v44 = vmul.f32 %v2634_v63, %v3572_v56  ;;  %v2636_v46 = vpop.eup %2635  ;;  %v936_v15 = vand.u32 2147483648, %v3557_v60 }
 0x107   : > { %v562_v52 = vsel %vm561_vm2, %v3467_v40, %v560_v23  ;;  %v882_v19 = vsub.f32 1.5, %v881_v35  ;;  %v941_v58 = vmul.f32 0.5, %v940_v26  ;;  %v928_v16 = vmul.f32 %v2632_v24, %v927_v36  ;;  %v3631_v23 = vpop.eup %2637 }
 0x108   : > { %v908_v59 = vmul.f32 %v907_v17, %v3482_v49  ;;  %v895_v48 = vmul.f32 %v2622_v11, %v894_v1  ;;  %v916_v22 = vmul.f32 %v2634_v63, %v915_v44  ;;  %v565_v21 = vsel %vm563_vm3, %v564_v13, %v562_v52  ;;  %v2640_v36 = vpop.eup %2639 }
 0x109   : > { %v883_v41 = vmul.f32 %v2624_v32, %v882_v19  ;;  %v942_v43 = vsub.f32 1.5, %v941_v58  ;;  %v929_v18 = vmul.f32 0.5, %v928_v16  ;;  %vm921_vm14 = vcmp.eq.f32.partialorder %v3572_v56, inf }
 0x10a   : > { %v910_v35 = vsel %vm909_vm4, %v3482_v49, %v908_v59  ;;  %v896_v17 = vmul.f32 %v895_v48, %v3507_v27  ;;  %v917_v11 = vmul.f32 0.5, %v916_v22  ;;  %v975_v40 = vmul.f32 %v2636_v46, %v3585_v28 }
 0x10b   : > { %v5032_v13 = vand.u32 2147483648, %v3482_v49  ;;  %v884_v1 = vmul.f32 %v883_v41, %v3524_v34  ;;  %v943_v26 = vmul.f32 %v2628_v57, %v942_v43  ;;  %vm923_vm15 = vcmp.eq.f32.partialorder %v3572_v56, 0.0 }
 0x10c   : > { %v3646_v44 = vadd.f32 1e-06, %v565_v21  ;;  %v898_v22 = vsel %vm897_vm6, %v3507_v27, %v896_v17  ;;  %v930_v52 = vsub.f32 1.5, %v929_v18  ;;  %v918_v19 = vsub.f32 1.5, %v917_v11  ;;  %v3671_v11 = vpop.xlane.xlu1 %846 }
 0x10d   : > { %v913_v32 = vsel %vm911_vm5, %v5032_v13, %v910_v35  ;;  %v5034_v58 = vand.u32 2147483648, %v3507_v27  ;;  %v886_v41 = vsel %vm885_vm8, %v3524_v34, %v884_v1  ;;  %v944_v43 = vmul.f32 %v943_v26, %v3539_v47  ;;  %v3680_v1 = vpop.xlane.xlu0 %844 }
 0x10e   : > { %5033 = vst [vmem:[#allocation28_spill] sm:$0xff] %v3646_v44  ;;  %v976_v57 = vmul.f32 %v2636_v46, %v975_v40  ;;  %2641 = vrcp.f32 %v3610_v4  ;;  %v3660_v21 = vadd.f32 1e-06, %v913_v32  ;;  %v5035_v16 = vand.u32 2147483648, %v3524_v34 }
 0x10f   : > { %v901_v49 = vsel %vm899_vm7, %v5034_v58, %v898_v22  ;;  %v931_v59 = vmul.f32 %v2632_v24, %v930_v52  ;;  %v946_v27 = vsel %vm945_vm10, %v3539_v47, %v944_v43  ;;  %v919_v35 = vmul.f32 %v2634_v63, %v918_v19 }
 0x110   : > { %v889_v18 = vsel %vm887_vm9, %v5035_v16, %v886_v41  ;;  %v3666_v48 = vadd.f32 1e-06, %v901_v49  ;;  %v977_v17 = vmul.f32 0.5, %v976_v57  ;;  %v5036_v40 = vand.u32 2147483648, %v3539_v47 }
 0x111   : > { %v932_v32 = vmul.f32 %v931_v59, %v3557_v60  ;;  %v924_v34 = vand.u32 2147483648, %v3572_v56  ;;  %v963_v24 = vmul.f32 %v2640_v36, %v3607_v20  ;;  %2643 = vrcp.f32 %v3646_v44 }
 0x112   : > { %v949_v13 = vsel %vm947_vm11, %v5036_v40, %v946_v27  ;;  %v3683_v26 = vadd.f32 1e-06, %v889_v18  ;;  %v920_v63 = vmul.f32 %v919_v35, %v3572_v56  ;;  %v978_v22 = vsub.f32 1.5, %v977_v17 }
 0x113   : > { %2645 = vrcp.f32 %v3660_v21  ;;  %v3687_v52 = vadd.f32 1e-06, %v949_v13  ;;  %v934_v47 = vsel %vm933_vm12, %v3557_v60, %v932_v32  ;;  %v964_v19 = vmul.f32 %v2640_v36, %v963_v24 }
 0x114   : > { %2647 = vrcp.f32 %v3666_v48  ;;  %v937_v58 = vsel %vm935_vm13, %v936_v15, %v934_v47  ;;  %v922_v49 = vsel %vm921_vm14, %v3572_v56, %v920_v63  ;;  %v979_v41 = vmul.f32 %v2636_v46, %v978_v22  ;;  %v3698_v43 = vpop.eup %2641  ;;  %v3707_v15 = vpop.xlane.xlu2 %848 }
 0x115   : > { %v3700_v57 = vadd.f32 1e-06, %v937_v58  ;;  %v925_v16 = vsel %vm923_vm15, %v924_v34, %v922_v49  ;;  %v965_v18 = vmul.f32 0.5, %v964_v19  ;;  %2649 = vrsqrt.f32 %v3620_v38  ;;  %v3725_v34 = vpop.xlane.xlu1 %852 }
 0x116   : > { %2651 = vrcp.f32 %v3683_v26  ;;  %v980_v60 = vmul.f32 %v979_v41, %v3585_v28  ;;  %vm981_vm0 = vcmp.eq.f32.partialorder %v3585_v28, inf  ;;  %v984_v46 = vand.u32 2147483648, %v3585_v28 }
 0x117   : > { %2653 = vrcp.f32 %v3687_v52  ;;  %v966_v59 = vsub.f32 1.5, %v965_v18  ;;  %v3712_v27 = vpop.eup %2643  ;;  %v3715_v56 = vadd.f32 1e-06, %v925_v16  ;;  %vm983_vm1 = vcmp.eq.f32.partialorder %v3585_v28, 0.0 }
 0x118   : > { %5037 = vst [vmem:[#allocation29_spill] sm:$0xff] %v3712_v27  ;;  %2655 = vrcp.f32 %v3700_v57  ;;  %v982_v35 = vsel %vm981_vm0, %v3585_v28, %v980_v60  ;;  %vm969_vm2 = vcmp.eq.f32.partialorder %v3607_v20, inf  ;;  %v3732_v28 = vpop.xlane.xlu0 %850  ;;  %vm971_vm3 = vcmp.eq.f32.partialorder %v3607_v20, 0.0 }
 0x119   : > { %v3719_v17 = vpop.eup %2645  ;;  %v985_v40 = vsel %vm983_vm1, %v984_v46, %v982_v35  ;;  %v967_v13 = vmul.f32 %v2640_v36, %v966_v59  ;;  %2657 = vrsqrt.f32 %v3707_v15  ;;  %v972_v47 = vand.u32 2147483648, %v3607_v20 }
 0x11a   : > { %v3722_v32 = vpop.eup %2647  ;;  %2659 = vrsqrt.f32 %v3671_v11  ;;  %v3727_v63 = vadd.f32 1e-06, %v985_v40  ;;  %vm957_vm4 = vcmp.eq.f32.partialorder %v3620_v38, inf  ;;  %vm959_vm5 = vcmp.eq.f32.partialorder %v3620_v38, 0.0 }
 0x11b   : > { %v2650_v24 = vpop.eup %2649  ;;  %v968_v22 = vmul.f32 %v967_v13, %v3607_v20  ;;  %2661 = vrsqrt.f32 %v3680_v1  ;;  %v583_v13 = vmul.f32 %v3408_v39, %v3359_v5  ;;  %vm587_vm6 = vweird.f32 %v3359_v5 }
 0x11c   : > { %5038 = vst [vmem:[#allocation30_spill] sm:$0xff] %v3727_v63  ;;  %v3734_v36 = vpop.eup %2651  ;;  %2663 = vrcp.f32 %v3715_v56  ;;  %v951_v19 = vmul.f32 %v2650_v24, %v3620_v38  ;;  %vm588_vm7 = vweird.f32 %v3408_v39  ;;  %vm1017_vm8 = vcmp.eq.f32.partialorder %v3707_v15, inf }
 0x11d   : > { %v3740_v58 = vpop.eup %2653  ;;  %v970_v49 = vsel %vm969_vm2, %v3607_v20, %v968_v22  ;;  %2665 = vrsqrt.f32 %v3725_v34  ;;  %v584_v41 = vsub.f32 1.0, %v583_v13  ;;  %v593_v13 = vand.u32 2147483648, %v3359_v5  ;;  %vm3797_vm1 = vmor %vm587_vm6, %vm588_vm7 }
 0x11e   : > { %v3746_v18 = vpop.eup %2655  ;;  %v973_v60 = vsel %vm971_vm3, %v972_v47, %v970_v49  ;;  %v952_v46 = vmul.f32 %v2650_v24, %v951_v19  ;;  %2667 = vrsqrt.f32 %v3732_v28  ;;  %v1063_v10 = vmul.f32 %v3698_v43, %v3610_v4 }
 0x11f   : > { %v2658_v35 = vpop.eup %2657  ;;  %2669 = vrcp.f32 %v3727_v63  ;;  %v3751_v40 = vadd.f32 1e-06, %v973_v60  ;;  %v585_v19 = vmul.f32 %v3408_v39, %v584_v41  ;;  %vm1019_vm9 = vcmp.eq.f32.partialorder %v3707_v15, 0.0 }
 0x120   : > { %v2660_v22 = vpop.eup %2659  ;;  %v953_v16 = vmul.f32 0.5, %v952_v46  ;;  %v1011_v47 = vmul.f32 %v2658_v35, %v3707_v15  ;;  %vm1005_vm10 = vcmp.eq.f32.partialorder %v3671_v11, inf  ;;  %vm1007_vm11 = vcmp.eq.f32.partialorder %v3671_v11, 0.0 }
 0x121   : > { %5039 = vst [vmem:[#allocation31_spill] sm:$0xff] %v3751_v40  ;;  %v2662_v59 = vpop.eup %2661  ;;  %v999_v60 = vmul.f32 %v2660_v22, %v3671_v11  ;;  %2671 = vrcp.f32 %v3751_v40  ;;  %vm993_vm12 = vcmp.eq.f32.partialorder %v3680_v1, inf  ;;  %v586_v40 = vadd.f32 %v3408_v39, %v585_v19 }
 0x122   : > { %v3764_v20 = vpop.eup %2663  ;;  %v954_v46 = vsub.f32 1.5, %v953_v16  ;;  %v1012_v27 = vmul.f32 %v2658_v35, %v1011_v47  ;;  %v987_v44 = vmul.f32 %v2662_v59, %v3680_v1  ;;  %vm995_vm13 = vcmp.eq.f32.partialorder %v3680_v1, 0.0 }
 0x123   : > { %5040 = vst [vmem:[#allocation32_spill] sm:$0xff] %v3764_v20  ;;  %v2666_v9 = vpop.eup %2665  ;;  %v1000_v49 = vmul.f32 %v2660_v22, %v999_v60  ;;  %vm1041_vm14 = vcmp.eq.f32.partialorder %v3725_v34, inf  ;;  %v1064_v63 = vsub.f32 1.0, %v1063_v10  ;;  %vm1043_vm15 = vcmp.eq.f32.partialorder %v3725_v34, 0.0 }
 0x124   : > { %v2668_v42 = vpop.eup %2667  ;;  %v955_v54 = vmul.f32 %v2650_v24, %v954_v46  ;;  %v1013_v55 = vmul.f32 0.5, %v1012_v27  ;;  %v988_v16 = vmul.f32 %v2662_v59, %v987_v44  ;;  %v1035_v47 = vmul.f32 %v2666_v9, %v3725_v34 }
 0x125   : > { %v3776_v50 = vpop.eup %2669  ;;  %v1001_v60 = vmul.f32 0.5, %v1000_v49  ;;  %v1023_v41 = vmul.f32 %v2668_v42, %v3732_v28  ;;  %v591_v27 = vand.u32 2147483647, %v3359_v5  ;;  %vm1029_vm0 = vcmp.eq.f32.partialorder %v3732_v28, inf }
 0x126   : > { %5041 = vst [vmem:[#allocation33_spill] sm:$0xff] %v3776_v50  ;;  %v956_v24 = vmul.f32 %v955_v54, %v3620_v38  ;;  %v1014_v46 = vsub.f32 1.5, %v1013_v55  ;;  %v989_v12 = vmul.f32 0.5, %v988_v16  ;;  %v1036_v44 = vmul.f32 %v2666_v9, %v1035_v47 }
 0x127   : > { %v1002_v30 = vsub.f32 1.5, %v1001_v60  ;;  %v1024_v49 = vmul.f32 %v2668_v42, %v1023_v41  ;;  %v594_v50 = vor.u32 1.1754944e-38, %v593_v13  ;;  %v3786_v2 = vpop.eup %2671  ;;  %v5044_v10 = vand.u32 2147483648, %v3620_v38 }
 0x128   : > { %v958_v19 = vsel %vm957_vm4, %v3620_v38, %v956_v24  ;;  %v1015_v14 = vmul.f32 %v2658_v35, %v1014_v46  ;;  %v990_v20 = vsub.f32 1.5, %v989_v12  ;;  %v1037_v54 = vmul.f32 0.5, %v1036_v44 }
 0x129   : > { %v961_v13 = vsel %vm959_vm5, %v5044_v10, %v958_v19  ;;  %v1003_v35 = vmul.f32 %v2660_v22, %v1002_v30  ;;  %v1025_v12 = vmul.f32 0.5, %v1024_v49  ;;  %v590_v16 = vsel %vm3797_vm1, %v3408_v39, %v586_v40 }
 0x12a   : > { %v3808_v47 = vadd.f32 1e-06, %v961_v13  ;;  %v1016_v60 = vmul.f32 %v1015_v14, %v3707_v15  ;;  %v991_v5 = vmul.f32 %v2662_v59, %v990_v20  ;;  %v1038_v41 = vsub.f32 1.5, %v1037_v54 }
 0x12b   : > { %v1004_v24 = vmul.f32 %v1003_v35, %v3671_v11  ;;  %v1026_v46 = vsub.f32 1.5, %v1025_v12  ;;  %vm592_vm2 = vcmp.eq.f32.partialorder %v591_v27, 8.507059e+37  ;;  %v1065_v44 = vmul.f32 %v3698_v43, %v1064_v63 }
 0x12c   : > { %v1018_v30 = vsel %vm1017_vm8, %v3707_v15, %v1016_v60  ;;  %v992_v38 = vmul.f32 %v991_v5, %v3680_v1  ;;  %v1039_v22 = vmul.f32 %v2666_v9, %v1038_v41  ;;  %v595_v39 = vsel %vm592_vm2, %v594_v50, %v590_v16 }
 0x12d   : > { %2673 = vrcp.f32 %v3808_v47  ;;  %v5045_v14 = vand.u32 2147483648, %v3707_v15  ;;  %v1006_v40 = vsel %vm1005_vm10, %v3671_v11, %v1004_v24  ;;  %v1027_v63 = vmul.f32 %v2668_v42, %v1026_v46 }
 0x12e   : > { %v5046_v27 = vand.u32 2147483648, %v3671_v11  ;;  %v994_v50 = vsel %vm993_vm12, %v3680_v1, %v992_v38  ;;  %v1040_v49 = vmul.f32 %v1039_v22, %v3725_v34  ;;  %v5047_v19 = vand.u32 2147483648, %v3680_v1 }
 0x12f   : > { %v1021_v59 = vsel %vm1019_vm9, %v5045_v14, %v1018_v30  ;;  %v1028_v54 = vmul.f32 %v1027_v63, %v3732_v28  ;;  %v1066_v55 = vadd.f32 %v3698_v43, %v1065_v44  ;;  %vm1068_vm3 = vweird.f32 %v3698_v43  ;;  %v2685_v14 = vld [vmem:[%s3225_s25] sm:$0xff] }
 0x130   : > { %v3825_v20 = vadd.f32 1e-06, %v1021_v59  ;;  %v1009_v9 = vsel %vm1007_vm11, %v5046_v27, %v1006_v40  ;;  %v997_v42 = vsel %vm995_vm13, %v5047_v19, %v994_v50  ;;  %v1042_v11 = vsel %vm1041_vm14, %v3725_v34, %v1040_v49  ;;  %v2686_v49 = vld [vmem:[%s3233_s15] sm:$0xff] }
 0x131   : > { %v3835_v15 = vadd.f32 1e-06, %v1009_v9  ;;  %v3843_v10 = vadd.f32 1e-06, %v997_v42  ;;  %v1071_v13 = vand.u32 2147483647, %v3610_v4  ;;  %v1030_v12 = vsel %vm1029_vm0, %v3732_v28, %v1028_v54 }
 0x132   : > { %2675 = vrcp.f32 %v3825_v20  ;;  %v5048_v35 = vand.u32 2147483648, %v3725_v34  ;;  %vm1031_vm4 = vcmp.eq.f32.partialorder %v3732_v28, 0.0  ;;  %v5049_v60 = vand.u32 2147483648, %v3732_v28 }
 0x133   : > { %2677 = vrcp.f32 %v3835_v15  ;;  %vm1067_vm5 = vweird.f32 %v3610_v4  ;;  %v3865_v41 = vpop.eup %2673  ;;  %v1073_v46 = vand.u32 2147483648, %v3610_v4  ;;  %v1286_v44 = vmul.f32 10.0, %v595_v39 }
 0x134   : > { %v1045_v1 = vsel %vm1043_vm15, %v5048_v35, %v1042_v11  ;;  %v1033_v5 = vsel %vm1031_vm4, %v5049_v60, %v1030_v12  ;;  %vm3869_vm6 = vmor %vm1067_vm5, %vm1068_vm3  ;;  %v597_v30 = vmul.f32 %v3441_v8, %v3394_v31  ;;  %2679 = vrcp.f32 %v3843_v10 }
 0x135   : > { %v3860_v16 = vadd.f32 1e-06, %v1045_v1  ;;  %v3867_v34 = vadd.f32 1e-06, %v1033_v5  ;;  %v1070_v28 = vsel %vm3869_vm6, %v3698_v43, %v1066_v55  ;;  %vm1072_vm7 = vcmp.eq.f32.partialorder %v1071_v13, 8.507059e+37 }
 0x136   : > { %v605_v38 = vand.u32 2147483647, %v3394_v31  ;;  %v1074_v22 = vor.u32 1.1754944e-38, %v1073_v46  ;;  %v1302_v59 = vmul.f32 %v2685_v14, %v1286_v44  ;;  %v598_v4 = vsub.f32 1.0, %v597_v30 }
 0x137   : > { %2681 = vrcp.f32 %v3860_v16  ;;  %vm601_vm8 = vweird.f32 %v3394_v31  ;;  %vm602_vm9 = vweird.f32 %v3441_v8  ;;  %v607_v39 = vand.u32 2147483648, %v3394_v31 }
 0x138   : > { %v1077_v40 = vmul.f32 %v3631_v23, %v3587_v29  ;;  %v3888_v43 = vpop.eup %2675  ;;  %2683 = vrcp.f32 %v3867_v34  ;;  %v1075_v63 = vsel %vm1072_vm7, %v1074_v22, %v1070_v28  ;;  %1399 = vst [vmem:[#allocation2 + $0x30] sm:$0xff] %v1302_v59  ;;  %v599_v27 = vmul.f32 %v3441_v8, %v598_v4  ;;  %vm603_vm13 = vmor %vm601_vm8, %vm602_vm9 }
 0x139   : > { %v1085_v9 = vand.u32 2147483647, %v3587_v29  ;;  %v3893_v50 = vpop.eup %2677  ;;  %v1318_v19 = vmul.f32 %v2686_v49, %v1075_v63  ;;  %vm3896_vm10 = vcmp.eq.f32.partialorder %v605_v38, 8.507059e+37  ;;  %v1087_v55 = vand.u32 2147483648, %v3587_v29  ;;  %v2687_v49 = vld [vmem:[%s3225_s25 + $0x8] sm:$0xff] }
 0x13a   : > { %v1078_v54 = vsub.f32 1.0, %v1077_v40  ;;  %v600_v11 = vadd.f32 %v3441_v8, %v599_v27  ;;  %vm1081_vm11 = vweird.f32 %v3587_v29  ;;  %vm1082_vm12 = vweird.f32 %v3631_v23  ;;  %v3906_v35 = vpop.eup %2679 }
 0x13b   : > { %v625_v13 = vmul.f32 %v3436_v62, %v3391_v7  ;;  %v1334_v1 = vmul.f32 %v1318_v19, %v1302_v59  ;;  %v608_v12 = vor.u32 1.1754944e-38, %v607_v39  ;;  %vm3913_vm14 = vcmp.eq.f32.partialorder %v1085_v9, 8.507059e+37  ;;  %vm1083_vm0 = vmor %vm1081_vm11, %vm1082_vm12 }
 0x13c   : > { %v1079_v60 = vmul.f32 %v3631_v23, %v1078_v54  ;;  %v604_v46 = vsel %vm603_vm13, %v3441_v8, %v600_v11  ;;  %vm629_vm15 = vweird.f32 %v3391_v7  ;;  %v635_v30 = vand.u32 2147483648, %v3391_v7  ;;  %v2688_v54 = vld [vmem:[%s3233_s15 + $0x8] sm:$0xff] }
 0x13d   : > { %v3917_v24 = vpop.eup %2681  ;;  %v626_v44 = vsub.f32 1.0, %v625_v13  ;;  %1350 = vadd.xlane.f32.xlu2 %v1334_v1  ;;  %v609_v31 = vsel %vm3896_vm10, %v608_v12, %v604_v46  ;;  %v1088_v38 = vor.u32 1.1754944e-38, %v1087_v55  ;;  %v1105_v22 = vmul.f32 %v3722_v32, %v3666_v48 }
 0x13e   : > { %v1080_v28 = vadd.f32 %v3631_v23, %v1079_v60  ;;  %v3927_v14 = vpop.eup %2683  ;;  %v1287_v8 = vmul.f32 10.0, %v609_v31  ;;  %vm630_vm1 = vweird.f32 %v3436_v62  ;;  %v633_v4 = vand.u32 2147483647, %v3391_v7 }
 0x13f   : > { %v627_v59 = vmul.f32 %v3436_v62, %v626_v44  ;;  %v636_v40 = vor.u32 1.1754944e-38, %v635_v30  ;;  %v1106_v63 = vsub.f32 1.0, %v1105_v22  ;;  %v1113_v27 = vand.u32 2147483647, %v3666_v48  ;;  %vm631_vm2 = vmor %vm629_vm15, %vm630_vm1 }
 0x140   : > { %v1084_v39 = vsel %vm1083_vm0, %v3631_v23, %v1080_v28  ;;  %v1303_v19 = vmul.f32 %v2687_v49, %v1287_v8  ;;  %v1115_v42 = vand.u32 2147483648, %v3666_v48  ;;  %vm1110_vm3 = vweird.f32 %v3722_v32  ;;  %v2690_v8 = vld [vmem:[%s3233_s15 + $0x18] sm:$0xff] }
 0x141   : > { %v1089_v9 = vsel %vm3913_vm14, %v1088_v38, %v1084_v39  ;;  %v628_v29 = vadd.f32 %v3436_v62, %v627_v59  ;;  %v1107_v23 = vmul.f32 %v3722_v32, %v1106_v63  ;;  %v639_v11 = vmul.f32 %v3398_v33, %v3349_v61  ;;  %v2689_v38 = vld [vmem:[%s3225_s25 + $0x18] sm:$0xff] }
 0x142   : > { %v1319_v55 = vmul.f32 %v2688_v54, %v1089_v9  ;;  %1400 = vst [vmem:[#allocation2] sm:$0xff] %v1303_v19  ;;  %vm634_vm4 = vcmp.eq.f32.partialorder %v633_v4, 8.507059e+37  ;;  %vm1109_vm5 = vweird.f32 %v3666_v48  ;;  %vm1114_vm6 = vcmp.eq.f32.partialorder %v1113_v27, 8.507059e+37 }
 0x143   : > { %v632_v13 = vsel %vm631_vm2, %v3436_v62, %v628_v29  ;;  %v1108_v7 = vadd.f32 %v3722_v32, %v1107_v23  ;;  %v640_v60 = vsub.f32 1.0, %v639_v11  ;;  %vm1111_vm7 = vmor %vm1109_vm5, %vm1110_vm3  ;;  %v1116_v5 = vor.u32 1.1754944e-38, %v1115_v42 }
 0x144   : > { %v1335_v1 = vmul.f32 %v1319_v55, %v1303_v19  ;;  %v637_v12 = vsel %vm634_vm4, %v636_v40, %v632_v13  ;;  %v649_v44 = vand.u32 2147483648, %v3349_v61  ;;  %v1119_v30 = vmul.f32 %v3719_v17, %v3660_v21 }
 0x145   : > { %v1289_v46 = vmul.f32 10.0, %v637_v12  ;;  %v1112_v62 = vsel %vm1111_vm7, %v3722_v32, %v1108_v7  ;;  %v641_v48 = vmul.f32 %v3398_v33, %v640_v60  ;;  %vm644_vm8 = vweird.f32 %v3398_v33  ;;  %v2691_v12 = vld [vmem:[%s3225_s25 + $0x20] sm:$0xff] }
 0x146   : > { %1352 = vadd.xlane.f32.xlu0 %v1335_v1  ;;  %v647_v31 = vand.u32 2147483647, %v3349_v61  ;;  %v1117_v28 = vsel %vm1114_vm6, %v1116_v5, %v1112_v62  ;;  %vm643_vm9 = vweird.f32 %v3349_v61  ;;  %vm1123_vm10 = vweird.f32 %v3660_v21 }
 0x147   : > { %v1305_v22 = vmul.f32 %v2689_v38, %v1289_v46  ;;  %v1321_v59 = vmul.f32 %v2690_v8, %v1117_v28  ;;  %v642_v4 = vadd.f32 %v3398_v33, %v641_v48  ;;  %v1120_v39 = vsub.f32 1.0, %v1119_v30  ;;  %vm645_vm12 = vmor %vm643_vm9, %vm644_vm8  ;;  %v2692_v30 = vld [vmem:[%s3233_s15 + $0x20] sm:$0xff] }
 0x148   : > { %vm1124_vm11 = vweird.f32 %v3719_v17  ;;  %v650_v32 = vor.u32 1.1754944e-38, %v649_v44  ;;  %v1127_v40 = vand.u32 2147483647, %v3660_v21  ;;  %v1129_v63 = vand.u32 2147483648, %v3660_v21 }
 0x149   : > { %1402 = vst [vmem:[#allocation2 + $0x18] sm:$0xff] %v1305_v22  ;;  %v611_v27 = vmul.f32 %v3404_v37, %v3353_v0  ;;  %v1337_v61 = vmul.f32 %v1321_v59, %v1305_v22  ;;  %v646_v9 = vsel %vm645_vm12, %v3398_v33, %v642_v4  ;;  %vm648_vm13 = vcmp.eq.f32.partialorder %v647_v31, 8.507059e+37  ;;  %vm1125_vm0 = vmor %vm1123_vm10, %vm1124_vm11 }
 0x14a   : > { %v1121_v49 = vmul.f32 %v3719_v17, %v1120_v39  ;;  %v651_v19 = vsel %vm648_vm13, %v650_v32, %v646_v9  ;;  %vm615_vm14 = vweird.f32 %v3353_v0  ;;  %vm616_vm15 = vweird.f32 %v3404_v37  ;;  %v2694_v9 = vld [vmem:[%s3233_s15 + $0x10] sm:$0xff] }
 0x14b   : > { %v612_v29 = vsub.f32 1.0, %v611_v27  ;;  %1356 = vadd.xlane.f32.xlu2 %v1337_v61  ;;  %v1290_v54 = vmul.f32 10.0, %v651_v19  ;;  %v621_v55 = vand.u32 2147483648, %v3353_v0  ;;  %v1091_v33 = vmul.f32 %v3734_v36, %v3683_v26  ;;  %vm617_vm3 = vmor %vm615_vm14, %vm616_vm15  ;;  %v2693_v27 = vld [vmem:[%s3225_s25 + $0x10] sm:$0xff] }
 0x14c   : > { %v1122_v42 = vadd.f32 %v3719_v17, %v1121_v49  ;;  %vm1128_vm1 = vcmp.eq.f32.partialorder %v1127_v40, 8.507059e+37  ;;  %v1130_v23 = vor.u32 1.1754944e-38, %v1129_v63  ;;  %v619_v13 = vand.u32 2147483647, %v3353_v0 }
 0x14d   : > { %v613_v11 = vmul.f32 %v3404_v37, %v612_v29  ;;  %v1306_v7 = vmul.f32 %v2691_v12, %v1290_v54  ;;  %v1092_v60 = vsub.f32 1.0, %v1091_v33  ;;  %vm1096_vm2 = vweird.f32 %v3734_v36 }
 0x14e   : > { %v1126_v1 = vsel %vm1125_vm0, %v3719_v17, %v1122_v42  ;;  %v1099_v44 = vand.u32 2147483647, %v3683_v26  ;;  %v1101_v21 = vand.u32 2147483648, %v3683_v26  ;;  %v622_v17 = vor.u32 1.1754944e-38, %v621_v55 }
 0x14f   : > { %v1131_v5 = vsel %vm1128_vm1, %v1130_v23, %v1126_v1  ;;  %v614_v46 = vadd.f32 %v3404_v37, %v613_v11  ;;  %1403 = vst [vmem:[#allocation2 + $0x50] sm:$0xff] %v1306_v7  ;;  %v1093_v48 = vmul.f32 %v3734_v36, %v1092_v60  ;;  %v681_v31 = vmul.f32 %v3541_v53, %v3460_v25 }
 0x150   : > { %v1322_v62 = vmul.f32 %v2692_v30, %v1131_v5  ;;  %vm620_vm4 = vcmp.eq.f32.partialorder %v619_v13, 8.507059e+37  ;;  %vm1095_vm5 = vweird.f32 %v3683_v26  ;;  %vm1100_vm6 = vcmp.eq.f32.partialorder %v1099_v44, 8.507059e+37 }
 0x151   : > { %v618_v28 = vsel %vm617_vm3, %v3404_v37, %v614_v46  ;;  %v1094_v8 = vadd.f32 %v3734_v36, %v1093_v48  ;;  %v682_v59 = vsub.f32 1.0, %v681_v31  ;;  %vm1097_vm7 = vmor %vm1095_vm5, %vm1096_vm2  ;;  %v1102_v0 = vor.u32 1.1754944e-38, %v1101_v21  ;;  %v2695_v21 = vld [vmem:[%s3225_s25 + $0x38] sm:$0xff] }
 0x152   : > { %v1338_v38 = vmul.f32 %v1322_v62, %v1306_v7  ;;  %v623_v22 = vsel %vm620_vm4, %v622_v17, %v618_v28  ;;  %v691_v39 = vand.u32 2147483648, %v3460_v25  ;;  %v1161_v37 = vmul.f32 %v3740_v58, %v3687_v52  ;;  %v2696_v28 = vld [vmem:[%s3233_s15 + $0x38] sm:$0xff] }
 0x153   : > { %v1288_v4 = vmul.f32 10.0, %v623_v22  ;;  %v1098_v26 = vsel %vm1097_vm7, %v3734_v36, %v1094_v8  ;;  %v683_v32 = vmul.f32 %v3541_v53, %v682_v59  ;;  %vm686_vm8 = vweird.f32 %v3541_v53 }
 0x154   : > { %1358 = vadd.xlane.f32.xlu0 %v1338_v38  ;;  %v689_v40 = vand.u32 2147483647, %v3460_v25  ;;  %v1103_v63 = vsel %vm1100_vm6, %v1102_v0, %v1098_v26  ;;  %vm685_vm9 = vweird.f32 %v3460_v25  ;;  %vm1165_vm10 = vweird.f32 %v3687_v52 }
 0x155   : > { %v1304_v61 = vmul.f32 %v2693_v27, %v1288_v4  ;;  %v1320_v49 = vmul.f32 %v2694_v9, %v1103_v63  ;;  %v684_v19 = vadd.f32 %v3541_v53, %v683_v32  ;;  %v1162_v29 = vsub.f32 1.0, %v1161_v37  ;;  %vm687_vm12 = vmor %vm685_vm9, %vm686_vm8  ;;  %v2697_v9 = vld [vmem:[%s3225_s25 + $0x30] sm:$0xff] }
 0x156   : > { %vm1166_vm11 = vweird.f32 %v3740_v58  ;;  %v692_v36 = vor.u32 1.1754944e-38, %v691_v39  ;;  %v1169_v42 = vand.u32 2147483647, %v3687_v52  ;;  %v1171_v54 = vand.u32 2147483648, %v3687_v52 }
 0x157   : > { %1401 = vst [vmem:[#allocation2 + $0x58] sm:$0xff] %v1304_v61  ;;  %v667_v55 = vmul.f32 %v3548_v51, %v3487_v3  ;;  %v1336_v25 = vmul.f32 %v1320_v49, %v1304_v61  ;;  %v688_v33 = vsel %vm687_vm12, %v3541_v53, %v684_v19  ;;  %vm690_vm13 = vcmp.eq.f32.partialorder %v689_v40, 8.507059e+37  ;;  %vm1167_vm0 = vmor %vm1165_vm10, %vm1166_vm11  ;;  %v2698_v19 = vld [vmem:[%s3233_s15 + $0x30] sm:$0xff] }
 0x158   : > { %v1163_v23 = vmul.f32 %v3740_v58, %v1162_v29  ;;  %v693_v11 = vsel %vm690_vm13, %v692_v36, %v688_v33  ;;  %vm671_vm14 = vweird.f32 %v3487_v3  ;;  %vm672_vm15 = vweird.f32 %v3548_v51  ;;  %v5058_v33 = vld [vmem:[#allocation23_spill] sm:$0xff] }
 0x159   : > { %v668_v13 = vsub.f32 1.0, %v667_v55  ;;  %1354 = vadd.xlane.f32.xlu1 %v1336_v25  ;;  %v1293_v12 = vmul.f32 10.0, %v693_v11  ;;  %v677_v7 = vand.u32 2147483648, %v3487_v3  ;;  %v1147_v53 = vmul.f32 %v3746_v18, %v3700_v57  ;;  %vm673_vm3 = vmor %vm671_vm14, %vm672_vm15  ;;  %v5057_v25 = vld [vmem:[#allocation17_spill] sm:$0xff] }
 0x15a   : > { %v1164_v1 = vadd.f32 %v3740_v58, %v1163_v23  ;;  %vm1170_vm1 = vcmp.eq.f32.partialorder %v1169_v42, 8.507059e+37  ;;  %v1172_v60 = vor.u32 1.1754944e-38, %v1171_v54  ;;  %v675_v46 = vand.u32 2147483647, %v3487_v3 }
 0x15b   : > { %v669_v5 = vmul.f32 %v3548_v51, %v668_v13  ;;  %v1309_v30 = vmul.f32 %v2695_v21, %v1293_v12  ;;  %v1148_v62 = vsub.f32 1.0, %v1147_v53  ;;  %vm1152_vm2 = vweird.f32 %v3746_v18 }
 0x15c   : > { %v1168_v44 = vsel %vm1167_vm0, %v3740_v58, %v1164_v1  ;;  %v1155_v31 = vand.u32 2147483647, %v3700_v57  ;;  %v1157_v52 = vand.u32 2147483648, %v3700_v57  ;;  %v678_v58 = vor.u32 1.1754944e-38, %v677_v7 }
 0x15d   : > { %v1173_v17 = vsel %vm1170_vm1, %v1172_v60, %v1168_v44  ;;  %v670_v48 = vadd.f32 %v3548_v51, %v669_v5  ;;  %1406 = vst [vmem:[#allocation2 + $0x48] sm:$0xff] %v1309_v30  ;;  %v1149_v22 = vmul.f32 %v3746_v18, %v1148_v62  ;;  %v653_v8 = vmul.f32 %v3418_v45, %v3377_v6  ;;  %v5059_v5 = vld [vmem:[#allocation30_spill] sm:$0xff] }
 0x15e   : > { %v1325_v38 = vmul.f32 %v2696_v28, %v1173_v17  ;;  %vm676_vm4 = vcmp.eq.f32.partialorder %v675_v46, 8.507059e+37  ;;  %vm1151_vm5 = vweird.f32 %v3700_v57  ;;  %vm1156_vm6 = vcmp.eq.f32.partialorder %v1155_v31, 8.507059e+37  ;;  %v5060_v46 = vld [vmem:[#allocation33_spill] sm:$0xff]  ;;  %v2699_v17 = vld [vmem:[%s3225_s25 + $0x28] sm:$0xff] }
 0x15f   : > { %v674_v59 = vsel %vm673_vm3, %v3548_v51, %v670_v48  ;;  %v1150_v39 = vadd.f32 %v3746_v18, %v1149_v22  ;;  %v654_v37 = vsub.f32 1.0, %v653_v8  ;;  %vm1153_vm7 = vmor %vm1151_vm5, %vm1152_vm2  ;;  %v1158_v3 = vor.u32 1.1754944e-38, %v1157_v52  ;;  %v5056_v51 = vld [vmem:[#allocation32_spill] sm:$0xff] }
 0x160   : > { %v1341_v0 = vmul.f32 %v1325_v38, %v1309_v30  ;;  %v679_v4 = vsel %vm676_vm4, %v678_v58, %v674_v59  ;;  %v663_v32 = vand.u32 2147483648, %v3377_v6  ;;  %v1133_v40 = vmul.f32 %v5056_v51, %v3715_v56  ;;  %v2700_v58 = vld [vmem:[%s3233_s15 + $0x28] sm:$0xff] }
 0x161   : > { %v1292_v26 = vmul.f32 10.0, %v679_v4  ;;  %v1154_v57 = vsel %vm1153_vm7, %v3746_v18, %v1150_v39  ;;  %v655_v63 = vmul.f32 %v3418_v45, %v654_v37  ;;  %vm658_vm8 = vweird.f32 %v3418_v45  ;;  %v5062_v4 = vld [vmem:[#allocation24_spill] sm:$0xff] }
 0x162   : > { %1364 = vadd.xlane.f32.xlu0 %v1341_v0  ;;  %v661_v27 = vand.u32 2147483647, %v3377_v6  ;;  %v1159_v61 = vsel %vm1156_vm6, %v1158_v3, %v1154_v57  ;;  %vm657_vm9 = vweird.f32 %v3377_v6  ;;  %vm1137_vm10 = vweird.f32 %v3715_v56  ;;  %v5061_v0 = vld [vmem:[#allocation18_spill] sm:$0xff] }
 0x163   : > { %v1308_v49 = vmul.f32 %v2697_v9, %v1292_v26  ;;  %v1324_v29 = vmul.f32 %v2698_v19, %v1159_v61  ;;  %v656_v36 = vadd.f32 %v3418_v45, %v655_v63  ;;  %v1134_v42 = vsub.f32 1.0, %v1133_v40  ;;  %vm659_vm12 = vmor %vm657_vm9, %vm658_vm8 }
 0x164   : > { %vm1138_vm11 = vweird.f32 %v5056_v51  ;;  %v664_v18 = vor.u32 1.1754944e-38, %v663_v32  ;;  %v1141_v54 = vand.u32 2147483647, %v3715_v56  ;;  %v1143_v55 = vand.u32 2147483648, %v3715_v56 }
 0x165   : > { %1405 = vst [vmem:[#allocation2 + $0x8] sm:$0xff] %v1308_v49  ;;  %v723_v23 = vmul.f32 %v5058_v33, %v5057_v25  ;;  %v1340_v6 = vmul.f32 %v1324_v29, %v1308_v49  ;;  %v660_v11 = vsel %vm659_vm12, %v3418_v45, %v656_v36  ;;  %vm662_vm13 = vcmp.eq.f32.partialorder %v661_v27, 8.507059e+37  ;;  %vm1139_vm0 = vmor %vm1137_vm10, %vm1138_vm11  ;;  %v5063_v27 = vld [vmem:[#allocation31_spill] sm:$0xff]  ;;  %v2701_v36 = vld [vmem:[%s3225_s25 + $0x50] sm:$0xff] }
 0x166   : > { %v1135_v13 = vmul.f32 %v5056_v51, %v1134_v42  ;;  %v665_v1 = vsel %vm662_vm13, %v664_v18, %v660_v11  ;;  %vm727_vm14 = vweird.f32 %v5057_v25  ;;  %vm728_vm15 = vweird.f32 %v5058_v33  ;;  %v2702_v18 = vld [vmem:[%s3233_s15 + $0x50] sm:$0xff]  ;;  %v5064_v11 = vld [vmem:[#allocation14_spill] sm:$0xff] }
 0x167   : > { %v724_v12 = vsub.f32 1.0, %v723_v23  ;;  %1362 = vadd.xlane.f32.xlu2 %v1340_v6  ;;  %v1291_v53 = vmul.f32 10.0, %v665_v1  ;;  %v733_v60 = vand.u32 2147483648, %v5057_v25  ;;  %v1203_v45 = vmul.f32 %v5060_v46, %v5059_v5  ;;  %vm729_vm3 = vmor %vm727_vm14, %vm728_vm15 }
 0x168   : > { %v1136_v7 = vadd.f32 %v5056_v51, %v1135_v13  ;;  %vm1142_vm1 = vcmp.eq.f32.partialorder %v1141_v54, 8.507059e+37  ;;  %v1144_v44 = vor.u32 1.1754944e-38, %v1143_v55  ;;  %v731_v30 = vand.u32 2147483647, %v5057_v25  ;;  %v5065_v13 = vld [vmem:[#allocation15_spill] sm:$0xff] }
 0x169   : > { %v725_v21 = vmul.f32 %v5058_v33, %v724_v12  ;;  %v1307_v48 = vmul.f32 %v2699_v17, %v1291_v53  ;;  %v1204_v31 = vsub.f32 1.0, %v1203_v45  ;;  %vm1208_vm2 = vweird.f32 %v5060_v46 }
 0x16a   : > { %v1140_v62 = vsel %vm1139_vm0, %v5056_v51, %v1136_v7  ;;  %v1211_v38 = vand.u32 2147483647, %v5059_v5  ;;  %v1213_v56 = vand.u32 2147483648, %v5059_v5  ;;  %v734_v8 = vor.u32 1.1754944e-38, %v733_v60 }
 0x16b   : > { %v1145_v52 = vsel %vm1142_vm1, %v1144_v44, %v1140_v62  ;;  %v726_v28 = vadd.f32 %v5058_v33, %v725_v21  ;;  %1404 = vst [vmem:[#allocation2 + $0x68] sm:$0xff] %v1307_v48  ;;  %v1205_v59 = vmul.f32 %v5060_v46, %v1204_v31  ;;  %v709_v39 = vmul.f32 %v5062_v4, %v5061_v0  ;;  %v2703_v31 = vld [vmem:[%s3225_s25 + $0x48] sm:$0xff] }
 0x16c   : > { %v1323_v22 = vmul.f32 %v2700_v58, %v1145_v52  ;;  %vm732_vm4 = vcmp.eq.f32.partialorder %v731_v30, 8.507059e+37  ;;  %vm1207_vm5 = vweird.f32 %v5059_v5  ;;  %vm1212_vm6 = vcmp.eq.f32.partialorder %v1211_v38, 8.507059e+37 }
 0x16d   : > { %v730_v37 = vsel %vm729_vm3, %v5058_v33, %v726_v28  ;;  %v1206_v32 = vadd.f32 %v5060_v46, %v1205_v59  ;;  %v710_v51 = vsub.f32 1.0, %v709_v39  ;;  %vm1209_vm7 = vmor %vm1207_vm5, %vm1208_vm2  ;;  %v1214_v40 = vor.u32 1.1754944e-38, %v1213_v56  ;;  %v5067_v39 = vld [vmem:[#allocation26_spill] sm:$0xff] }
 0x16e   : > { %v1339_v3 = vmul.f32 %v1323_v22, %v1307_v48  ;;  %v735_v26 = vsel %vm732_vm4, %v734_v8, %v730_v37  ;;  %v719_v63 = vand.u32 2147483648, %v5061_v0  ;;  %v1189_v61 = vmul.f32 %v3786_v2, %v5063_v27  ;;  %v2704_v8 = vld [vmem:[%s3233_s15 + $0x48] sm:$0xff] }
 0x16f   : > { %v1296_v57 = vmul.f32 10.0, %v735_v26  ;;  %v1210_v9 = vsel %vm1209_vm7, %v5060_v46, %v1206_v32  ;;  %v711_v49 = vmul.f32 %v5062_v4, %v710_v51  ;;  %vm714_vm8 = vweird.f32 %v5062_v4 }
 0x170   : > { %1360 = vadd.xlane.f32.xlu1 %v1339_v3  ;;  %v717_v19 = vand.u32 2147483647, %v5061_v0  ;;  %v1215_v29 = vsel %vm1212_vm6, %v1214_v40, %v1210_v9  ;;  %vm713_vm9 = vweird.f32 %v5061_v0  ;;  %vm1193_vm10 = vweird.f32 %v5063_v27 }
 0x171   : > { %v1312_v42 = vmul.f32 %v2701_v36, %v1296_v57  ;;  %v1328_v54 = vmul.f32 %v2702_v18, %v1215_v29  ;;  %v712_v55 = vadd.f32 %v5062_v4, %v711_v49  ;;  %v1190_v25 = vsub.f32 1.0, %v1189_v61  ;;  %vm715_vm12 = vmor %vm713_vm9, %vm714_vm8  ;;  %v2705_v29 = vld [vmem:[%s3225_s25 + $0x40] sm:$0xff] }
 0x172   : > { %vm1194_vm11 = vweird.f32 %v3786_v2  ;;  %v720_v33 = vor.u32 1.1754944e-38, %v719_v63  ;;  %v1197_v23 = vand.u32 2147483647, %v5063_v27  ;;  %v1199_v6 = vand.u32 2147483648, %v5063_v27 }
 0x173   : > { %1409 = vst [vmem:[#allocation2 + $0x10] sm:$0xff] %v1312_v42  ;;  %v695_v1 = vmul.f32 %v5065_v13, %v5064_v11  ;;  %v1344_v12 = vmul.f32 %v1328_v54, %v1312_v42  ;;  %v716_v7 = vsel %vm715_vm12, %v5062_v4, %v712_v55  ;;  %vm718_vm13 = vcmp.eq.f32.partialorder %v717_v19, 8.507059e+37  ;;  %vm1195_vm0 = vmor %vm1193_vm10, %vm1194_vm11  ;;  %v5066_v4 = vld [vmem:[#allocation20_spill] sm:$0xff]  ;;  %v2706_v42 = vld [vmem:[%s3233_s15 + $0x40] sm:$0xff] }
 0x174   : > { %v1191_v53 = vmul.f32 %v3786_v2, %v1190_v25  ;;  %v721_v60 = vsel %vm718_vm13, %v720_v33, %v716_v7  ;;  %vm699_vm14 = vweird.f32 %v5064_v11  ;;  %vm700_vm15 = vweird.f32 %v5065_v13 }
 0x175   : > { %v696_v5 = vsub.f32 1.0, %v695_v1  ;;  %1370 = vadd.xlane.f32.xlu0 %v1344_v12  ;;  %v1295_v45 = vmul.f32 10.0, %v721_v60  ;;  %v705_v44 = vand.u32 2147483648, %v5064_v11  ;;  %v1175_v21 = vmul.f32 %v3865_v41, %v3808_v47  ;;  %vm701_vm3 = vmor %vm699_vm14, %vm700_vm15 }
 0x176   : > { %v1192_v46 = vadd.f32 %v3786_v2, %v1191_v53  ;;  %vm1198_vm1 = vcmp.eq.f32.partialorder %v1197_v23, 8.507059e+37  ;;  %v1200_v30 = vor.u32 1.1754944e-38, %v1199_v6  ;;  %v703_v17 = vand.u32 2147483647, %v5064_v11  ;;  %v5068_v23 = vld [vmem:[#allocation22_spill] sm:$0xff]  ;;  %v5069_v6 = vld [vmem:[#allocation27_spill] sm:$0xff] }
 0x177   : > { %v697_v62 = vmul.f32 %v5065_v13, %v696_v5  ;;  %v1311_v52 = vmul.f32 %v2703_v31, %v1295_v45  ;;  %v1176_v28 = vsub.f32 1.0, %v1175_v21  ;;  %vm1180_vm2 = vweird.f32 %v3865_v41 }
 0x178   : > { %v1196_v48 = vsel %vm1195_vm0, %v3786_v2, %v1192_v46  ;;  %v1183_v58 = vand.u32 2147483647, %v3808_v47  ;;  %v1185_v22 = vand.u32 2147483648, %v3808_v47  ;;  %v706_v2 = vor.u32 1.1754944e-38, %v705_v44 }
 0x179   : > { %v1201_v38 = vsel %vm1198_vm1, %v1200_v30, %v1196_v48  ;;  %v698_v56 = vadd.f32 %v5065_v13, %v697_v62  ;;  %1408 = vst [vmem:[#allocation2 + $0x20] sm:$0xff] %v1311_v52  ;;  %v1177_v0 = vmul.f32 %v3865_v41, %v1176_v28  ;;  %v765_v37 = vmul.f32 %v5067_v39, %v5066_v4 }
 0x17a   : > { %v1327_v59 = vmul.f32 %v2704_v8, %v1201_v38  ;;  %vm704_vm4 = vcmp.eq.f32.partialorder %v703_v17, 8.507059e+37  ;;  %vm1179_vm5 = vweird.f32 %v3808_v47  ;;  %vm1184_vm6 = vcmp.eq.f32.partialorder %v1183_v58, 8.507059e+37  ;;  %v2707_v17 = vld [vmem:[%s3225_s25 + $0x68] sm:$0xff]  ;;  %v5070_v8 = vld [vmem:[#allocation16_spill] sm:$0xff] }
 0x17b   : > { %v702_v3 = vsel %vm701_vm3, %v5065_v13, %v698_v56  ;;  %v1178_v51 = vadd.f32 %v3865_v41, %v1177_v0  ;;  %v766_v40 = vsub.f32 1.0, %v765_v37  ;;  %vm1181_vm7 = vmor %vm1179_vm5, %vm1180_vm2  ;;  %v1186_v57 = vor.u32 1.1754944e-38, %v1185_v22  ;;  %v2708_v56 = vld [vmem:[%s3233_s15 + $0x68] sm:$0xff] }
 0x17c   : > { %v1343_v26 = vmul.f32 %v1327_v59, %v1311_v52  ;;  %v707_v32 = vsel %vm704_vm4, %v706_v2, %v702_v3  ;;  %v775_v27 = vand.u32 2147483648, %v5066_v4  ;;  %v1245_v61 = vmul.f32 %v3888_v43, %v3825_v20  ;;  %v5071_v59 = vld [vmem:[#allocation21_spill] sm:$0xff] }
 0x17d   : > { %v1294_v63 = vmul.f32 10.0, %v707_v32  ;;  %v1182_v47 = vsel %vm1181_vm7, %v3865_v41, %v1178_v51  ;;  %v767_v9 = vmul.f32 %v5067_v39, %v766_v40  ;;  %vm770_vm8 = vweird.f32 %v5067_v39 }
 0x17e   : > { %1368 = vadd.xlane.f32.xlu2 %v1343_v26  ;;  %v773_v49 = vand.u32 2147483647, %v5066_v4  ;;  %v1187_v19 = vsel %vm1184_vm6, %v1186_v57, %v1182_v47  ;;  %vm769_vm9 = vweird.f32 %v5066_v4  ;;  %vm1249_vm10 = vweird.f32 %v3825_v20 }
 0x17f   : > { %v1310_v36 = vmul.f32 %v2705_v29, %v1294_v63  ;;  %v1326_v18 = vmul.f32 %v2706_v42, %v1187_v19  ;;  %v768_v54 = vadd.f32 %v5067_v39, %v767_v9  ;;  %v1246_v55 = vsub.f32 1.0, %v1245_v61  ;;  %vm771_vm12 = vmor %vm769_vm9, %vm770_vm8  ;;  %v2709_v61 = vld [vmem:[%s3225_s25 + $0x60] sm:$0xff] }
 0x180   : > { %vm1250_vm11 = vweird.f32 %v3888_v43  ;;  %v776_v41 = vor.u32 1.1754944e-38, %v775_v27  ;;  %v1253_v25 = vand.u32 2147483647, %v3825_v20  ;;  %v1255_v33 = vand.u32 2147483648, %v3825_v20  ;;  %v2710_v9 = vld [vmem:[%s3233_s15 + $0x60] sm:$0xff] }
 0x181   : > { %1407 = vst [vmem:[#allocation2 + $0x40] sm:$0xff] %v1310_v36  ;;  %v751_v11 = vmul.f32 %v5069_v6, %v5068_v23  ;;  %v1342_v13 = vmul.f32 %v1326_v18, %v1310_v36  ;;  %v772_v1 = vsel %vm771_vm12, %v5067_v39, %v768_v54  ;;  %vm774_vm13 = vcmp.eq.f32.partialorder %v773_v49, 8.507059e+37  ;;  %vm1251_vm0 = vmor %vm1249_vm10, %vm1250_vm11  ;;  %v5072_v18 = vld [vmem:[#allocation28_spill] sm:$0xff]  ;;  %v5073_v54 = vld [vmem:[#allocation29_spill] sm:$0xff] }
 0x182   : > { %v1247_v12 = vmul.f32 %v3888_v43, %v1246_v55  ;;  %v777_v7 = vsel %vm774_vm13, %v776_v41, %v772_v1  ;;  %vm755_vm14 = vweird.f32 %v5068_v23  ;;  %vm756_vm15 = vweird.f32 %v5069_v6 }
 0x183   : > { %v752_v53 = vsub.f32 1.0, %v751_v11  ;;  %1366 = vadd.xlane.f32.xlu1 %v1342_v13  ;;  %v1299_v5 = vmul.f32 10.0, %v777_v7  ;;  %v761_v46 = vand.u32 2147483648, %v5068_v23  ;;  %v1231_v45 = vmul.f32 %v3893_v50, %v3835_v15  ;;  %vm757_vm3 = vmor %vm755_vm14, %vm756_vm15 }
 0x184   : > { %v1248_v60 = vadd.f32 %v3888_v43, %v1247_v12  ;;  %vm1254_vm1 = vcmp.eq.f32.partialorder %v1253_v25, 8.507059e+37  ;;  %v1256_v44 = vor.u32 1.1754944e-38, %v1255_v33  ;;  %v759_v30 = vand.u32 2147483647, %v5068_v23 }
 0x185   : > { %v753_v21 = vmul.f32 %v5069_v6, %v752_v53  ;;  %v1315_v48 = vmul.f32 %v2707_v17, %v1299_v5  ;;  %v1232_v31 = vsub.f32 1.0, %v1231_v45  ;;  %vm1236_vm2 = vweird.f32 %v3893_v50  ;;  %v2712_v17 = vld [vmem:[%s3233_s15 + $0x58] sm:$0xff] }
 0x186   : > { %v1252_v62 = vsel %vm1251_vm0, %v3888_v43, %v1248_v60  ;;  %v1239_v38 = vand.u32 2147483647, %v3835_v15  ;;  %v1241_v20 = vand.u32 2147483648, %v3835_v15  ;;  %v762_v43 = vor.u32 1.1754944e-38, %v761_v46  ;;  %v2711_v46 = vld [vmem:[%s3225_s25 + $0x58] sm:$0xff] }
 0x187   : > { %v1257_v52 = vsel %vm1254_vm1, %v1256_v44, %v1252_v62  ;;  %v754_v28 = vadd.f32 %v5069_v6, %v753_v21  ;;  %1412 = vst [vmem:[#allocation2 + $0x70] sm:$0xff] %v1315_v48  ;;  %v1233_v22 = vmul.f32 %v3893_v50, %v1232_v31  ;;  %v737_v2 = vmul.f32 %v5071_v59, %v5070_v8 }
 0x188   : > { %v1331_v58 = vmul.f32 %v2708_v56, %v1257_v52  ;;  %vm760_vm4 = vcmp.eq.f32.partialorder %v759_v30, 8.507059e+37  ;;  %vm1235_vm5 = vweird.f32 %v3835_v15  ;;  %vm1240_vm6 = vcmp.eq.f32.partialorder %v1239_v38, 8.507059e+37  ;;  %v5074_v52 = vld [vmem:[#allocation19_spill] sm:$0xff] }
 0x189   : > { %v758_v0 = vsel %vm757_vm3, %v5069_v6, %v754_v28  ;;  %v1234_v37 = vadd.f32 %v3893_v50, %v1233_v22  ;;  %v738_v3 = vsub.f32 1.0, %v737_v2  ;;  %vm1237_vm7 = vmor %vm1235_vm5, %vm1236_vm2  ;;  %v1242_v26 = vor.u32 1.1754944e-38, %v1241_v20  ;;  %v5075_v28 = vld [vmem:[#allocation25_spill] sm:$0xff] }
 0x18a   : > { %v1347_v4 = vmul.f32 %v1331_v58, %v1315_v48  ;;  %v763_v39 = vsel %vm760_vm4, %v762_v43, %v758_v0  ;;  %v747_v51 = vand.u32 2147483648, %v5070_v8  ;;  %v1217_v40 = vmul.f32 %v3906_v35, %v3843_v10 }
 0x18b   : > { %v1298_v32 = vmul.f32 10.0, %v763_v39  ;;  %v1238_v15 = vsel %vm1237_vm7, %v3893_v50, %v1234_v37  ;;  %v739_v57 = vmul.f32 %v5071_v59, %v738_v3  ;;  %vm742_vm8 = vweird.f32 %v5071_v59  ;;  %v2713_v3 = vld [vmem:[%s3225_s25 + $0x78] sm:$0xff] }
 0x18c   : > { %1376 = vadd.xlane.f32.xlu0 %v1347_v4  ;;  %v745_v63 = vand.u32 2147483647, %v5070_v8  ;;  %v1243_v27 = vsel %vm1240_vm6, %v1242_v26, %v1238_v15  ;;  %vm741_vm9 = vweird.f32 %v5070_v8  ;;  %vm1221_vm10 = vweird.f32 %v3843_v10 }
 0x18d   : > { %v1314_v47 = vmul.f32 %v2709_v61, %v1298_v32  ;;  %v1330_v49 = vmul.f32 %v2710_v9, %v1243_v27  ;;  %v740_v19 = vadd.f32 %v5071_v59, %v739_v57  ;;  %v1218_v29 = vsub.f32 1.0, %v1217_v40  ;;  %vm743_vm12 = vmor %vm741_vm9, %vm742_vm8  ;;  %v2714_v32 = vld [vmem:[%s3233_s15 + $0x78] sm:$0xff] }
 0x18e   : > { %vm1222_vm11 = vweird.f32 %v3906_v35  ;;  %v748_v50 = vor.u32 1.1754944e-38, %v747_v51  ;;  %v1225_v36 = vand.u32 2147483647, %v3843_v10  ;;  %v1227_v42 = vand.u32 2147483648, %v3843_v10 }
 0x18f   : > { %1411 = vst [vmem:[#allocation2 + $0x60] sm:$0xff] %v1314_v47  ;;  %v793_v55 = vmul.f32 %v5073_v54, %v5072_v18  ;;  %v1346_v41 = vmul.f32 %v1330_v49, %v1314_v47  ;;  %v744_v25 = vsel %vm743_vm12, %v5071_v59, %v740_v19  ;;  %vm746_vm13 = vcmp.eq.f32.partialorder %v745_v63, 8.507059e+37  ;;  %vm1223_vm0 = vmor %vm1221_vm10, %vm1222_vm11 }
 0x190   : > { %v1219_v33 = vmul.f32 %v3906_v35, %v1218_v29  ;;  %v749_v23 = vsel %vm746_vm13, %v748_v50, %v744_v25  ;;  %vm797_vm14 = vweird.f32 %v5072_v18  ;;  %vm798_vm15 = vweird.f32 %v5073_v54 }
 0x191   : > { %v794_v6 = vsub.f32 1.0, %v793_v55  ;;  %1374 = vadd.xlane.f32.xlu2 %v1346_v41  ;;  %v1297_v13 = vmul.f32 10.0, %v749_v23  ;;  %v803_v1 = vand.u32 2147483648, %v5072_v18  ;;  %v1273_v12 = vmul.f32 %v3917_v24, %v3860_v16  ;;  %vm799_vm3 = vmor %vm797_vm14, %vm798_vm15 }
 0x192   : > { %v1220_v11 = vadd.f32 %v3906_v35, %v1219_v33  ;;  %vm1226_vm1 = vcmp.eq.f32.partialorder %v1225_v36, 8.507059e+37  ;;  %v1228_v7 = vor.u32 1.1754944e-38, %v1227_v42  ;;  %v801_v60 = vand.u32 2147483647, %v5072_v18  ;;  %v2715_v42 = vld [vmem:[%s3225_s25 + $0x70] sm:$0xff] }
 0x193   : > { %v795_v53 = vmul.f32 %v5073_v54, %v794_v6  ;;  %v1313_v45 = vmul.f32 %v2711_v46, %v1297_v13  ;;  %v1274_v44 = vsub.f32 1.0, %v1273_v12  ;;  %vm1278_vm2 = vweird.f32 %v3917_v24 }
 0x194   : > { %v1224_v5 = vsel %vm1223_vm0, %v3906_v35, %v1220_v11  ;;  %v804_v62 = vor.u32 1.1754944e-38, %v803_v1  ;;  %v1283_v10 = vand.u32 2147483648, %v3860_v16  ;;  %v1281_v31 = vand.u32 2147483647, %v3860_v16 }
 0x195   : > { %v1229_v21 = vsel %vm1226_vm1, %v1228_v7, %v1224_v5  ;;  %v796_v30 = vadd.f32 %v5073_v54, %v795_v53  ;;  %1410 = vst [vmem:[#allocation2 + $0x38] sm:$0xff] %v1313_v45  ;;  %v1275_v35 = vmul.f32 %v3917_v24, %v1274_v44  ;;  %v779_v38 = vmul.f32 %v5075_v28, %v5074_v52 }
 0x196   : > { %v1329_v48 = vmul.f32 %v2712_v17, %v1229_v21  ;;  %vm802_vm4 = vcmp.eq.f32.partialorder %v801_v60, 8.507059e+37  ;;  %vm1277_vm5 = vweird.f32 %v3860_v16  ;;  %v1284_v56 = vor.u32 1.1754944e-38, %v1283_v10 }
 0x197   : > { %v800_v20 = vsel %vm799_vm3, %v5073_v54, %v796_v30  ;;  %v1276_v22 = vadd.f32 %v3917_v24, %v1275_v35  ;;  %v780_v8 = vsub.f32 1.0, %v779_v38  ;;  %vm1279_vm6 = vmor %vm1277_vm5, %vm1278_vm2  ;;  %v787_v2 = vand.u32 2147483647, %v5074_v52 }
 0x198   : > { %v1345_v58 = vmul.f32 %v1329_v48, %v1313_v45  ;;  %v805_v43 = vsel %vm802_vm4, %v804_v62, %v800_v20  ;;  %v789_v0 = vand.u32 2147483648, %v5074_v52  ;;  %v1259_v4 = vmul.f32 %v3927_v14, %v3867_v34 }
 0x199   : > { %v1301_v59 = vmul.f32 10.0, %v805_v43  ;;  %v1280_v16 = vsel %vm1279_vm6, %v3917_v24, %v1276_v22  ;;  %vm1282_vm7 = vcmp.eq.f32.partialorder %v1281_v31, 8.507059e+37  ;;  %v781_v39 = vmul.f32 %v5075_v28, %v780_v8 }
 0x19a   : > { %1372 = vadd.xlane.f32.xlu1 %v1345_v58  ;;  %vm784_vm8 = vweird.f32 %v5075_v28  ;;  %v1285_v37 = vsel %vm1282_vm7, %v1284_v56, %v1280_v16  ;;  %vm783_vm9 = vweird.f32 %v5074_v52  ;;  %vm1264_vm10 = vweird.f32 %v3927_v14 }
 0x19b   : > { %v1317_v26 = vmul.f32 %v2713_v3, %v1301_v59  ;;  %v1333_v51 = vmul.f32 %v2714_v32, %v1285_v37  ;;  %v782_v40 = vadd.f32 %v5075_v28, %v781_v39  ;;  %vm788_vm11 = vcmp.eq.f32.partialorder %v787_v2, 8.507059e+37  ;;  %vm785_vm12 = vmor %vm783_vm9, %vm784_vm8 }
 0x19c   : > { %v1260_v15 = vsub.f32 1.0, %v1259_v4  ;;  %v790_v24 = vor.u32 1.1754944e-38, %v789_v0  ;;  %v1269_v57 = vand.u32 2147483648, %v3867_v34  ;;  %vm1382_vm13 = vcmask 7168  }
 0x19d   : > { %1414 = vst [vmem:[#allocation2 + $0x28] sm:$0xff] %v1317_v26  ;;  %v1349_v63 = vmul.f32 %v1333_v51, %v1317_v26  ;;  %v786_v27 = vsel %vm785_vm12, %v5075_v28, %v782_v40  ;;  %v1267_v47 = vand.u32 2147483647, %v3867_v34  ;;  %v3042_v9 = vmov 0.0  }
 0x19e   : > { %v1261_v61 = vmul.f32 %v3927_v14, %v1260_v15  ;;  %1415 = vst.msk [vmem:[#allocation4] sm:$0xff] %vm1382_vm13, %v3042_v9  ;;  %v791_v49 = vsel %vm788_vm11, %v790_v24, %v786_v27  ;;  %vm1263_vm14 = vweird.f32 %v3867_v34  ;;  %v1270_v50 = vor.u32 1.1754944e-38, %v1269_v57  ;;  %v2716_v34 = vld [vmem:[%s3233_s15 + $0x70] sm:$0xff] }
 0x19f   : > { %1416 = vst.msk [vmem:[#allocation4 + $0x8] sm:$0xff] %vm1382_vm13, %v3042_v9  ;;  %1380 = vadd.xlane.f32.xlu2 %v1349_v63  ;;  %v1300_v29 = vmul.f32 10.0, %v791_v49  ;;  %vm1265_vm15 = vmor %vm1263_vm14, %vm1264_vm10  ;;  %vm1268_vm0 = vcmp.eq.f32.partialorder %v1267_v47, 8.507059e+37 }
 0x1a0   : > { %v1262_v19 = vadd.f32 %v3927_v14, %v1261_v61  ;;  %1417 = vst.msk [vmem:[#allocation4 + $0x10] sm:$0xff] %vm1382_vm13, %v3042_v9 }
 0x1a1   : > { %1418 = vst.msk [vmem:[#allocation4 + $0x18] sm:$0xff] %vm1382_vm13, %v3042_v9  ;;  %v1316_v18 = vmul.f32 %v2715_v42, %v1300_v29 }
 0x1a2   : > { %v1266_v36 = vsel %vm1265_vm15, %v3927_v14, %v1262_v19  ;;  %1419 = vst.msk [vmem:[#allocation4 + $0x20] sm:$0xff] %vm1382_vm13, %v3042_v9 }
 0x1a3   : > { %v1271_v54 = vsel %vm1268_vm0, %v1270_v50, %v1266_v36  ;;  %1420 = vst.msk [vmem:[#allocation4 + $0x28] sm:$0xff] %vm1382_vm13, %v3042_v9 }
 0x1a4   : > { %v1332_v55 = vmul.f32 %v2716_v34, %v1271_v54  ;;  %1413 = vst [vmem:[#allocation2 + $0x78] sm:$0xff] %v1316_v18 }
 0x1a5   : > { %1421 = vst.msk [vmem:[#allocation4 + $0x30] sm:$0xff] %vm1382_vm13, %v3042_v9 }
 0x1a6   : > { %v1348_v41 = vmul.f32 %v1332_v55, %v1316_v18  ;;  %1422 = vst.msk [vmem:[#allocation4 + $0x38] sm:$0xff] %vm1382_vm13, %v3042_v9 }
 0x1a7   : > { %1423 = vst.msk [vmem:[#allocation4 + $0x40] sm:$0xff] %vm1382_vm13, %v3042_v9 }
 0x1a8   : > { %1378 = vadd.xlane.f32.xlu1 %v1348_v41  ;;  %1424 = vst.msk [vmem:[#allocation4 + $0x48] sm:$0xff] %vm1382_vm13, %v3042_v9 }
 0x1a9   : > { %1425 = vst.msk [vmem:[#allocation4 + $0x50] sm:$0xff] %vm1382_vm13, %v3042_v9 }
 0x1aa   : > { %1426 = vst.msk [vmem:[#allocation4 + $0x58] sm:$0xff] %vm1382_vm13, %v3042_v9 }
 0x1ab   : > { %1427 = vst.msk [vmem:[#allocation4 + $0x60] sm:$0xff] %vm1382_vm13, %v3042_v9 }
 0x1ac   : > { %1428 = vst.msk [vmem:[#allocation4 + $0x68] sm:$0xff] %vm1382_vm13, %v3042_v9 }
 0x1ad   : > { %1429 = vst.msk [vmem:[#allocation4 + $0x70] sm:$0xff] %vm1382_vm13, %v3042_v9 }
 0x1ae   : > { %1430 = vst.msk [vmem:[#allocation4 + $0x78] sm:$0xff] %vm1382_vm13, %v3042_v9 }
 0x1b0   : > { %v1351_v14 = vpop.xlane.xlu2 %1350 }
 0x1b1   : > { %1383 = vst.msk [vmem:[#allocation3] sm:$0xff] %vm1382_vm13, %v1351_v14 }
 0x1b9   : > { %v1353_v25 = vpop.xlane.xlu0 %1352 }
 0x1ba   : > { %1384 = vst.msk [vmem:[#allocation3 + $0x8] sm:$0xff] %vm1382_vm13, %v1353_v25 }
 0x1be   : > { %v1357_v33 = vpop.xlane.xlu2 %1356 }
 0x1bf   : > { %1386 = vst.msk [vmem:[#allocation3 + $0x18] sm:$0xff] %vm1382_vm13, %v1357_v33 }
 0x1c7   : > { %v1359_v23 = vpop.xlane.xlu0 %1358 }
 0x1c8   : > { %1387 = vst.msk [vmem:[#allocation3 + $0x20] sm:$0xff] %vm1382_vm13, %v1359_v23 }
 0x1cc   : > { %v1355_v6 = vpop.xlane.xlu1 %1354 }
 0x1cd   : > { %1385 = vst.msk [vmem:[#allocation3 + $0x10] sm:$0xff] %vm1382_vm13, %v1355_v6 }
 0x1d5   : > { %v1365_v11 = vpop.xlane.xlu0 %1364 }
 0x1d6   : > { %1390 = vst.msk [vmem:[#allocation3 + $0x38] sm:$0xff] %vm1382_vm13, %v1365_v11 }
 0x1da   : > { %v1363_v13 = vpop.xlane.xlu2 %1362 }
 0x1db   : > { %1389 = vst.msk [vmem:[#allocation3 + $0x30] sm:$0xff] %vm1382_vm13, %v1363_v13 }
 0x1e3   : > { %v1361_v1 = vpop.xlane.xlu1 %1360 }
 0x1e4   : > { %1388 = vst.msk [vmem:[#allocation3 + $0x28] sm:$0xff] %vm1382_vm13, %v1361_v1 }
 0x1e8   : > { %v1371_v12 = vpop.xlane.xlu0 %1370 }
 0x1e9   : > { %1393 = vst.msk [vmem:[#allocation3 + $0x50] sm:$0xff] %vm1382_vm13, %v1371_v12 }
 0x1f1   : > { %v1369_v7 = vpop.xlane.xlu2 %1368 }
 0x1f2   : > { %1392 = vst.msk [vmem:[#allocation3 + $0x48] sm:$0xff] %vm1382_vm13, %v1369_v7 }
 0x1f6   : > { %v1367_v53 = vpop.xlane.xlu1 %1366 }
 0x1f7   : > { %1391 = vst.msk [vmem:[#allocation3 + $0x40] sm:$0xff] %vm1382_vm13, %v1367_v53 }
 0x1ff   : > { %v1377_v60 = vpop.xlane.xlu0 %1376 }
 0x200   : > { %1396 = vst.msk [vmem:[#allocation3 + $0x68] sm:$0xff] %vm1382_vm13, %v1377_v60 }
 0x204   : > { %v1375_v5 = vpop.xlane.xlu2 %1374 }
 0x205   : > { %1395 = vst.msk [vmem:[#allocation3 + $0x60] sm:$0xff] %vm1382_vm13, %v1375_v5 }
 0x20d   : > { %v1373_v46 = vpop.xlane.xlu1 %1372 }
 0x20e   : > { %1394 = vst.msk [vmem:[#allocation3 + $0x58] sm:$0xff] %vm1382_vm13, %v1373_v46 }
 0x212   : > { %v1381_v45 = vpop.xlane.xlu2 %1380 }
 0x213   : > { %1398 = vst.msk [vmem:[#allocation3 + $0x78] sm:$0xff] %vm1382_vm13, %v1381_v45 }
 0x21b   : > { %v1379_v44 = vpop.xlane.xlu1 %1378 }
 0x21c   : > { %1397 = vst.msk [vmem:[#allocation3 + $0x70] sm:$0xff] %vm1382_vm13, %v1379_v44 }
 0x21d PF: > { %v4309_v21 = vld [vmem:[%s3240_s11 + $0x78] sm:$0xff]  ;;  %v4312_v30 = vld [vmem:[%s3240_s11 + $0x68] sm:$0xff]  ;;  %v4324_v35 = vld [vmem:[%s3240_s11 + $0x70] sm:$0xff]  ;;  %p2395_p8 = scmp.ne.s32.totalorder %s3022_s18, 2 }
 0x21e   : > { %v4315_v62 = vld [vmem:[%s3240_s11 + $0x58] sm:$0xff]  ;;  %v1462_v10 = vmul.f32 %v4309_v21, %v4309_v21  ;;  %v1460_v17 = vmul.f32 %v4312_v30, %v4312_v30  ;;  %v4327_v31 = vld [vmem:[%s3240_s11 + $0x60] sm:$0xff]  ;;  %v4330_v52 = vld [vmem:[%s3240_s11 + $0x50] sm:$0xff]  ;;  %v1461_v28 = vmul.f32 %v4324_v35, %v4324_v35 }
 0x21f   : > { %v1458_v48 = vmul.f32 %v4315_v62, %v4315_v62  ;;  %v1459_v38 = vmul.f32 %v4327_v31, %v4327_v31  ;;  %v1457_v20 = vmul.f32 %v4330_v52, %v4330_v52  ;;  %v4339_v56 = vld [vmem:[%s3240_s11 + $0x48] sm:$0xff]  ;;  %v4342_v58 = vld [vmem:[%s3240_s11 + $0x40] sm:$0xff]  ;;  %v4345_v43 = vld [vmem:[%s3240_s11 + $0x38] sm:$0xff] }
 0x220   : > { %1493 = vadd.xlane.f32.xlu0 %v1462_v10  ;;  %1489 = vadd.xlane.f32.xlu1 %v1460_v17  ;;  %v1456_v22 = vmul.f32 %v4339_v56, %v4339_v56  ;;  %v1455_v8 = vmul.f32 %v4342_v58, %v4342_v58  ;;  %v1454_v59 = vmul.f32 %v4345_v43, %v4345_v43  ;;  %v4354_v2 = vld [vmem:[%s3240_s11 + $0x30] sm:$0xff]  ;;  %v4357_v0 = vld [vmem:[%s3240_s11 + $0x28] sm:$0xff]  ;;  %v1435_v4 = vld [vmem:[%s3240_s11 + $0x20] sm:$0xff] }
 0x221   : > { %1485 = vadd.xlane.f32.xlu2 %v1458_v48  ;;  %v1453_v16 = vmul.f32 %v4354_v2, %v4354_v2  ;;  %v1452_v39 = vmul.f32 %v4357_v0, %v4357_v0  ;;  %v1451_v37 = vmul.f32 %v1435_v4, %v1435_v4  ;;  %v1434_v3 = vld [vmem:[%s3240_s11 + $0x18] sm:$0xff]  ;;  %v1433_v26 = vld [vmem:[%s3240_s11 + $0x10] sm:$0xff]  ;;  %v1432_v32 = vld [vmem:[%s3240_s11 + $0x8] sm:$0xff] }
 0x222   : > { %v1450_v51 = vmul.f32 %v1434_v3, %v1434_v3  ;;  %v1449_v40 = vmul.f32 %v1433_v26, %v1433_v26  ;;  %v1448_v15 = vmul.f32 %v1432_v32, %v1432_v32  ;;  %v1431_v24 = vld [vmem:[%s3240_s11] sm:$0xff] }
 0x223   : > { %v1447_v57 = vmul.f32 %v1431_v24, %v1431_v24 }
 0x228   : > { %1491 = vadd.xlane.f32.xlu0 %v1461_v28  ;;  %1487 = vadd.xlane.f32.xlu1 %v1459_v38 }
 0x229   : > { %1483 = vadd.xlane.f32.xlu2 %v1457_v20 }
 0x230   : > { %1481 = vadd.xlane.f32.xlu0 %v1456_v22  ;;  %1479 = vadd.xlane.f32.xlu1 %v1455_v8 }
 0x231   : > { %1477 = vadd.xlane.f32.xlu2 %v1454_v59 }
 0x238   : > { %1475 = vadd.xlane.f32.xlu0 %v1453_v16  ;;  %1473 = vadd.xlane.f32.xlu1 %v1452_v39 }
 0x239   : > { %1471 = vadd.xlane.f32.xlu2 %v1451_v37 }
 0x240   : > { %1469 = vadd.xlane.f32.xlu0 %v1450_v51  ;;  %1467 = vadd.xlane.f32.xlu1 %v1449_v40 }
 0x241   : > { %1465 = vadd.xlane.f32.xlu2 %v1448_v15 }
 0x248   : > { %1463 = vadd.xlane.f32.xlu0 %v1447_v57 }
 0x293   : > { %v4368_v63 = vpop.xlane.xlu0 %1493  ;;  %v4370_v27 = vpop.xlane.xlu1 %1489 }
 0x294   : > { %2717 = vrsqrt.f32 %v4368_v63  ;;  %v4373_v61 = vpop.xlane.xlu2 %1485  ;;  %vm1682_vm1 = vcmp.eq.f32.partialorder %v4368_v63, inf  ;;  %vm1684_vm2 = vcmp.eq.f32.partialorder %v4368_v63, 0.0  ;;  %v1685_v22 = vand.u32 2147483648, %v4368_v63 }
 0x295   : > { %2719 = vrsqrt.f32 %v4370_v27  ;;  %vm1658_vm3 = vcmp.eq.f32.partialorder %v4370_v27, inf  ;;  %vm1660_vm4 = vcmp.eq.f32.partialorder %v4370_v27, 0.0  ;;  %v1661_v26 = vand.u32 2147483648, %v4370_v27 }
 0x296   : > { %2721 = vrsqrt.f32 %v4373_v61  ;;  %vm1634_vm5 = vcmp.eq.f32.partialorder %v4373_v61, inf  ;;  %vm1636_vm6 = vcmp.eq.f32.partialorder %v4373_v61, 0.0 }
 0x29a   : > { %v2718_v47 = vpop.eup %2717 }
 0x29b   : > { %v2720_v9 = vpop.eup %2719  ;;  %v1676_v49 = vmul.f32 %v2718_v47, %v4368_v63  ;;  %v4378_v19 = vpop.xlane.xlu0 %1491 }
 0x29c   : > { %v4380_v29 = vpop.xlane.xlu1 %1487  ;;  %v2722_v50 = vpop.eup %2721  ;;  %v1652_v36 = vmul.f32 %v2720_v9, %v4370_v27  ;;  %2723 = vrsqrt.f32 %v4378_v19  ;;  %vm1670_vm7 = vcmp.eq.f32.partialorder %v4378_v19, inf  ;;  %vm1672_vm9 = vcmp.eq.f32.partialorder %v4378_v19, 0.0 }
 0x29d   : > { %v4384_v42 = vpop.xlane.xlu2 %1483  ;;  %v1677_v18 = vmul.f32 %v2718_v47, %v1676_v49  ;;  %v1628_v54 = vmul.f32 %v2722_v50, %v4373_v61  ;;  %2725 = vrsqrt.f32 %v4380_v29  ;;  %vm1646_vm8 = vcmp.eq.f32.partialorder %v4380_v29, inf }
 0x29e   : > { %v1653_v34 = vmul.f32 %v2720_v9, %v1652_v36  ;;  %2727 = vrsqrt.f32 %v4384_v42  ;;  %vm1648_vm10 = vcmp.eq.f32.partialorder %v4380_v29, 0.0  ;;  %vm1622_vm11 = vcmp.eq.f32.partialorder %v4384_v42, inf }
 0x29f   : > { %v1678_v55 = vmul.f32 0.5, %v1677_v18  ;;  %v1629_v41 = vmul.f32 %v2722_v50, %v1628_v54  ;;  %v1637_v18 = vand.u32 2147483648, %v4373_v61  ;;  %vm1624_vm12 = vcmp.eq.f32.partialorder %v4384_v42, 0.0 }
 0x2a0   : > { %v1654_v14 = vmul.f32 0.5, %v1653_v34 }
 0x2a1   : > { %v1679_v25 = vsub.f32 1.5, %v1678_v55  ;;  %v1630_v33 = vmul.f32 0.5, %v1629_v41 }
 0x2a2   : > { %v2724_v23 = vpop.eup %2723  ;;  %v1655_v6 = vsub.f32 1.5, %v1654_v14 }
 0x2a3   : > { %v2726_v11 = vpop.eup %2725  ;;  %v1680_v13 = vmul.f32 %v2718_v47, %v1679_v25  ;;  %v1631_v1 = vsub.f32 1.5, %v1630_v33  ;;  %v1664_v12 = vmul.f32 %v2724_v23, %v4378_v19  ;;  %v4390_v7 = vpop.xlane.xlu0 %1481 }
 0x2a4   : > { %v1656_v53 = vmul.f32 %v2720_v9, %v1655_v6  ;;  %v1640_v60 = vmul.f32 %v2726_v11, %v4380_v29  ;;  %2729 = vrsqrt.f32 %v4390_v7  ;;  %v4394_v5 = vpop.xlane.xlu1 %1479  ;;  %v2728_v46 = vpop.eup %2727  ;;  %vm1610_vm13 = vcmp.eq.f32.partialorder %v4390_v7, inf }
 0x2a5   : > { %v1681_v45 = vmul.f32 %v1680_v13, %v4368_v63  ;;  %v1632_v44 = vmul.f32 %v2722_v50, %v1631_v1  ;;  %v1665_v10 = vmul.f32 %v2724_v23, %v1664_v12  ;;  %v1616_v28 = vmul.f32 %v2728_v46, %v4384_v42  ;;  %v4399_v38 = vpop.xlane.xlu2 %1477 }
 0x2a6   : > { %v1657_v17 = vmul.f32 %v1656_v53, %v4370_v27  ;;  %v1641_v48 = vmul.f32 %v2726_v11, %v1640_v60  ;;  %2731 = vrsqrt.f32 %v4394_v5  ;;  %v1673_v1 = vand.u32 2147483648, %v4378_v19 }
 0x2a7   : > { %v1666_v20 = vmul.f32 0.5, %v1665_v10  ;;  %v1633_v8 = vmul.f32 %v1632_v44, %v4373_v61  ;;  %v1617_v4 = vmul.f32 %v2728_v46, %v1616_v28  ;;  %v1683_v16 = vsel %vm1682_vm1, %v4368_v63, %v1681_v45 }
 0x2a8   : > { %v1642_v59 = vmul.f32 0.5, %v1641_v48  ;;  %v1659_v3 = vsel %vm1658_vm3, %v4370_v27, %v1657_v17  ;;  %v1686_v57 = vsel %vm1684_vm2, %v1685_v22, %v1683_v16  ;;  %2733 = vrsqrt.f32 %v4399_v38 }
 0x2a9   : > { %v1667_v39 = vsub.f32 1.5, %v1666_v20  ;;  %v1618_v51 = vmul.f32 0.5, %v1617_v4  ;;  %v1635_v47 = vsel %vm1634_vm5, %v4373_v61, %v1633_v8  ;;  %v1662_v36 = vsel %vm1660_vm4, %v1661_v26, %v1659_v3 }
 0x2aa   : > { %v2730_v37 = vpop.eup %2729  ;;  %v1643_v32 = vsub.f32 1.5, %v1642_v59  ;;  %v4426_v14 = vadd.f32 1e-06, %v1686_v57  ;;  %v1638_v25 = vsel %vm1636_vm6, %v1637_v18, %v1635_v47  ;;  %vm1612_vm14 = vcmp.eq.f32.partialorder %v4390_v7, 0.0 }
 0x2ab   : > { %v1668_v40 = vmul.f32 %v2724_v23, %v1667_v39  ;;  %v1604_v15 = vmul.f32 %v2730_v37, %v4390_v7  ;;  %v4414_v24 = vpop.xlane.xlu0 %1475  ;;  %v1619_v49 = vsub.f32 1.5, %v1618_v51  ;;  %v4433_v23 = vadd.f32 1e-06, %v1662_v36 }
 0x2ac   : > { %v1644_v9 = vmul.f32 %v2726_v11, %v1643_v32  ;;  %v2732_v50 = vpop.eup %2731  ;;  %v4431_v27 = vpop.xlane.xlu1 %1473  ;;  %v4442_v60 = vadd.f32 1e-06, %v1638_v25  ;;  %2735 = vrcp.f32 %v4426_v14  ;;  %v1613_v51 = vand.u32 2147483648, %v4390_v7 }
 0x2ad   : > { %v1669_v54 = vmul.f32 %v1668_v40, %v4378_v19  ;;  %v1605_v34 = vmul.f32 %v2730_v37, %v1604_v15  ;;  %v1620_v41 = vmul.f32 %v2728_v46, %v1619_v49  ;;  %v1592_v63 = vmul.f32 %v2732_v50, %v4394_v5  ;;  %v4437_v13 = vpop.xlane.xlu2 %1471 }
 0x2ae   : > { %v1645_v55 = vmul.f32 %v1644_v9, %v4380_v29  ;;  %v1649_v46 = vand.u32 2147483648, %v4380_v29  ;;  %2737 = vrcp.f32 %v4433_v23  ;;  %v2734_v28 = vpop.eup %2733  ;;  %vm1598_vm15 = vcmp.eq.f32.partialorder %v4394_v5, inf }
 0x2af   : > { %v1606_v33 = vmul.f32 0.5, %v1605_v34  ;;  %v1671_v6 = vsel %vm1670_vm7, %v4378_v19, %v1669_v54  ;;  %v1593_v11 = vmul.f32 %v2732_v50, %v1592_v63  ;;  %v1621_v61 = vmul.f32 %v1620_v41, %v4384_v42 }
 0x2b0   : > { %v1647_v12 = vsel %vm1646_vm8, %v4380_v29, %v1645_v55  ;;  %v1674_v44 = vsel %vm1672_vm9, %v1673_v1, %v1671_v6  ;;  %2739 = vrsqrt.f32 %v4414_v24  ;;  %v1625_v29 = vand.u32 2147483648, %v4384_v42 }
 0x2b1   : > { %v1607_v53 = vsub.f32 1.5, %v1606_v33  ;;  %v1594_v45 = vmul.f32 0.5, %v1593_v11  ;;  %v1650_v17 = vsel %vm1648_vm10, %v1649_v46, %v1647_v12  ;;  %v1623_v20 = vsel %vm1622_vm11, %v4384_v42, %v1621_v61 }
 0x2b2   : > { %2741 = vrcp.f32 %v4442_v60  ;;  %v4456_v8 = vadd.f32 1e-06, %v1674_v44  ;;  %v1580_v59 = vmul.f32 %v2734_v28, %v4399_v38  ;;  %v4460_v4 = vadd.f32 1e-06, %v1650_v17 }
 0x2b3   : > { %v1608_v10 = vmul.f32 %v2730_v37, %v1607_v53  ;;  %v4450_v48 = vpop.xlane.xlu0 %1469  ;;  %v1595_v22 = vsub.f32 1.5, %v1594_v45  ;;  %2743 = vrsqrt.f32 %v4431_v27  ;;  %v1626_v16 = vsel %vm1624_vm12, %v1625_v29, %v1623_v20  ;;  %v4466_v37 = vpop.eup %2735 }
 0x2b4   : > { %v1581_v39 = vmul.f32 %v2734_v28, %v1580_v59  ;;  %2745 = vrsqrt.f32 %v4437_v13  ;;  %v4471_v32 = vpop.xlane.xlu1 %1467  ;;  %v4473_v42 = vpop.eup %2737  ;;  %v4481_v47 = vadd.f32 1e-06, %v1626_v16  ;;  %vm1600_vm0 = vcmp.eq.f32.partialorder %v4394_v5, 0.0 }
 0x2b5   : > { %v1609_v19 = vmul.f32 %v1608_v10, %v4390_v7  ;;  %v1596_v26 = vmul.f32 %v2732_v50, %v1595_v22  ;;  %2747 = vrsqrt.f32 %v4450_v48  ;;  %v4478_v15 = vpop.xlane.xlu2 %1465  ;;  %v1601_v9 = vand.u32 2147483648, %v4394_v5 }
 0x2b6   : > { %2749 = vrcp.f32 %v4456_v8  ;;  %v1582_v40 = vmul.f32 0.5, %v1581_v39  ;;  %v2740_v57 = vpop.eup %2739  ;;  %vm1586_vm1 = vcmp.eq.f32.partialorder %v4399_v38, inf  ;;  %vm1588_vm2 = vcmp.eq.f32.partialorder %v4399_v38, 0.0 }
 0x2b7   : > { %v1611_v3 = vsel %vm1610_vm13, %v4390_v7, %v1609_v19  ;;  %2751 = vrcp.f32 %v4460_v4  ;;  %v1568_v18 = vmul.f32 %v2740_v57, %v4414_v24  ;;  %v1597_v34 = vmul.f32 %v1596_v26, %v4394_v5 }
 0x2b8   : > { %v4486_v49 = vpop.eup %2741  ;;  %v1614_v50 = vsel %vm1612_vm14, %v1613_v51, %v1611_v3  ;;  %v1583_v36 = vsub.f32 1.5, %v1582_v40  ;;  %2753 = vrsqrt.f32 %v4471_v32  ;;  %v1589_v55 = vand.u32 2147483648, %v4399_v38 }
 0x2b9   : > { %v2744_v54 = vpop.eup %2743  ;;  %2755 = vrsqrt.f32 %v4478_v15  ;;  %v1569_v25 = vmul.f32 %v2740_v57, %v1568_v18  ;;  %v1577_v7 = vand.u32 2147483648, %v4414_v24  ;;  %v4501_v1 = vadd.f32 1e-06, %v1614_v50 }
 0x2ba   : > { %v2746_v41 = vpop.eup %2745  ;;  %v1584_v63 = vmul.f32 %v2734_v28, %v1583_v36  ;;  %v1556_v33 = vmul.f32 %v2744_v54, %v4431_v27  ;;  %2757 = vrcp.f32 %v4481_v47  ;;  %vm1574_vm3 = vcmp.eq.f32.partialorder %v4414_v24, inf }
 0x2bb   : > { %v4498_v6 = vpop.xlane.xlu0 %1463  ;;  %v2748_v11 = vpop.eup %2747  ;;  %vm1562_vm4 = vcmp.eq.f32.partialorder %v4431_v27, inf  ;;  %v1565_v12 = vand.u32 2147483648, %v4431_v27  ;;  %v1544_v61 = vmul.f32 %v2746_v41, %v4437_v13  ;;  %v1570_v45 = vmul.f32 0.5, %v1569_v25 }
 0x2bc   : > { %v4507_v53 = vpop.eup %2749  ;;  %v1585_v46 = vmul.f32 %v1584_v63, %v4399_v38  ;;  %v1557_v44 = vmul.f32 %v2744_v54, %v1556_v33  ;;  %vm1550_vm5 = vcmp.eq.f32.partialorder %v4437_v13, inf  ;;  %v1532_v10 = vmul.f32 %v2748_v11, %v4450_v48 }
 0x2bd   : > { %v4512_v17 = vpop.eup %2751  ;;  %v1599_v28 = vsel %vm1598_vm15, %v4394_v5, %v1597_v34  ;;  %vm1564_vm6 = vcmp.eq.f32.partialorder %v4431_v27, 0.0  ;;  %v1545_v20 = vmul.f32 %v2746_v41, %v1544_v61  ;;  %v1553_v19 = vand.u32 2147483648, %v4437_v13 }
 0x2be   : > { %2759 = vrsqrt.f32 %v4498_v6  ;;  %v2754_v22 = vpop.eup %2753  ;;  %v1587_v29 = vsel %vm1586_vm1, %v4399_v38, %v1585_v46  ;;  %v1571_v59 = vsub.f32 1.5, %v1570_v45  ;;  %vm1576_vm7 = vcmp.eq.f32.partialorder %v4414_v24, 0.0 }
 0x2bf   : > { %v1558_v16 = vmul.f32 0.5, %v1557_v44  ;;  %vm1552_vm8 = vcmp.eq.f32.partialorder %v4437_v13, 0.0  ;;  %v1533_v39 = vmul.f32 %v2748_v11, %v1532_v10  ;;  %vm1538_vm9 = vcmp.eq.f32.partialorder %v4450_v48, inf  ;;  %v2756_v3 = vpop.eup %2755 }
 0x2c0   : > { %2761 = vrcp.f32 %v4501_v1  ;;  %v1546_v26 = vmul.f32 0.5, %v1545_v20  ;;  %v1520_v51 = vmul.f32 %v2754_v22, %v4471_v32  ;;  %v1914_v40 = vmul.f32 %v4466_v37, %v4426_v14  ;;  %v4532_v63 = vpop.eup %2757 }
 0x2c1   : > { %v1602_v50 = vsel %vm1600_vm0, %v1601_v9, %v1599_v28  ;;  %v1572_v36 = vmul.f32 %v2740_v57, %v1571_v59  ;;  %v1559_v18 = vsub.f32 1.5, %v1558_v16  ;;  %v1534_v34 = vmul.f32 0.5, %v1533_v39 }
 0x2c2   : > { %v1590_v25 = vsel %vm1588_vm2, %v1589_v55, %v1587_v29  ;;  %v1547_v33 = vsub.f32 1.5, %v1546_v26  ;;  %vm1540_vm10 = vcmp.eq.f32.partialorder %v4450_v48, 0.0  ;;  %v1521_v61 = vmul.f32 %v2754_v22, %v1520_v51 }
 0x2c3   : > { %v1508_v46 = vmul.f32 %v2756_v3, %v4478_v15  ;;  %v1573_v45 = vmul.f32 %v1572_v36, %v4414_v24  ;;  %v1560_v44 = vmul.f32 %v2744_v54, %v1559_v18  ;;  %v1535_v10 = vsub.f32 1.5, %v1534_v34 }
 0x2c4   : > { %v1915_v5 = vsub.f32 1.0, %v1914_v40  ;;  %v4539_v9 = vpop.eup %2759  ;;  %v1548_v57 = vmul.f32 %v2746_v41, %v1547_v33  ;;  %v1541_v28 = vand.u32 2147483648, %v4450_v48  ;;  %v1522_v20 = vmul.f32 0.5, %v1521_v61 }
 0x2c5   : > { %v1509_v59 = vmul.f32 %v2756_v3, %v1508_v46  ;;  %v4542_v38 = vadd.f32 1e-06, %v1602_v50  ;;  %v1575_v55 = vsel %vm1574_vm3, %v4414_v24, %v1573_v45  ;;  %v1561_v29 = vmul.f32 %v1560_v44, %v4431_v27 }
 0x2c6   : > { %v1536_v16 = vmul.f32 %v2748_v11, %v1535_v10  ;;  %v4548_v39 = vpop.eup %2761  ;;  %v4550_v54 = vadd.f32 1e-06, %v1590_v25  ;;  %v1549_v26 = vmul.f32 %v1548_v57, %v4437_v13  ;;  %v1523_v41 = vsub.f32 1.5, %v1522_v20 }
 0x2c7   : > { %v1510_v51 = vmul.f32 0.5, %v1509_v59  ;;  %v1563_v40 = vsel %vm1562_vm4, %v4431_v27, %v1561_v29  ;;  %v1496_v36 = vmul.f32 %v4539_v9, %v4498_v6  ;;  %v1916_v18 = vmul.f32 %v4466_v37, %v1915_v5 }
 0x2c8   : > { %v1537_v50 = vmul.f32 %v1536_v16, %v4450_v48  ;;  %v1578_v11 = vsel %vm1576_vm7, %v1577_v7, %v1575_v55  ;;  %v1551_v34 = vsel %vm1550_vm5, %v4437_v13, %v1549_v26  ;;  %v1524_v25 = vmul.f32 %v2754_v22, %v1523_v41 }
 0x2c9   : > { %v1511_v33 = vsub.f32 1.5, %v1510_v51  ;;  %v1566_v61 = vsel %vm1564_vm6, %v1565_v12, %v1563_v40  ;;  %vm1526_vm11 = vcmp.eq.f32.partialorder %v4471_v32, inf  ;;  %vm1528_vm12 = vcmp.eq.f32.partialorder %v4471_v32, 0.0 }
 0x2ca   : > { %v1529_v46 = vand.u32 2147483648, %v4471_v32  ;;  %v1554_v24 = vsel %vm1552_vm8, %v1553_v19, %v1551_v34  ;;  %v1539_v7 = vsel %vm1538_vm9, %v4450_v48, %v1537_v50  ;;  %v1525_v22 = vmul.f32 %v1524_v25, %v4471_v32 }
 0x2cb   : > { %v1512_v45 = vmul.f32 %v2756_v3, %v1511_v33  ;;  %2763 = vrcp.f32 %v4542_v38  ;;  %v4581_v27 = vadd.f32 1e-06, %v1578_v11  ;;  %vm1514_vm13 = vcmp.eq.f32.partialorder %v4478_v15, inf }
 0x2cc   : > { %v1917_v12 = vadd.f32 %v4466_v37, %v1916_v18  ;;  %2765 = vrcp.f32 %v4550_v54  ;;  %v4586_v44 = vadd.f32 1e-06, %v1566_v61  ;;  %vm1516_vm14 = vcmp.eq.f32.partialorder %v4478_v15, 0.0 }
 0x2cd   : > { %v1497_v13 = vmul.f32 %v4539_v9, %v1496_v36  ;;  %v4590_v19 = vadd.f32 1e-06, %v1554_v24  ;;  %v1542_v3 = vsel %vm1540_vm10, %v1541_v28, %v1539_v7  ;;  %vm1918_vm15 = vweird.f32 %v4426_v14 }
 0x2ce   : > { %vm1919_vm0 = vweird.f32 %v4466_v37  ;;  %v1527_v10 = vsel %vm1526_vm11, %v4471_v32, %v1525_v22  ;;  %v1513_v5 = vmul.f32 %v1512_v45, %v4478_v15  ;;  %v1922_v20 = vand.u32 2147483647, %v4426_v14 }
 0x2cf   : > { %vm4600_vm1 = vmor %vm1918_vm15, %vm1919_vm0  ;;  %v1924_v59 = vand.u32 2147483648, %v4426_v14  ;;  %2767 = vrcp.f32 %v4581_v27  ;;  %v1517_v48 = vand.u32 2147483648, %v4478_v15  ;;  %v1900_v55 = vmul.f32 %v4507_v53, %v4456_v8 }
 0x2d0   : > { %v1921_v28 = vsel %vm4600_vm1, %v4466_v37, %v1917_v12  ;;  %2769 = vrcp.f32 %v4586_v44  ;;  %v4614_v29 = vadd.f32 1e-06, %v1542_v3  ;;  %v1498_v16 = vmul.f32 0.5, %v1497_v13 }
 0x2d1   : > { %v1925_v26 = vor.u32 1.1754944e-38, %v1924_v59  ;;  %v4616_v41 = vpop.eup %2763  ;;  %2771 = vrcp.f32 %v4590_v19  ;;  %v1530_v14 = vsel %vm1528_vm12, %v1529_v46, %v1527_v10  ;;  %vm1923_vm2 = vcmp.eq.f32.partialorder %v1922_v20, 8.507059e+37 }
 0x2d2   : > { %v1901_v51 = vsub.f32 1.0, %v1900_v55  ;;  %v4621_v40 = vpop.eup %2765  ;;  %v1515_v37 = vsel %vm1514_vm13, %v4478_v15, %v1513_v5  ;;  %v1908_v36 = vand.u32 2147483647, %v4456_v8  ;;  %v1910_v18 = vand.u32 2147483648, %v4456_v8 }
 0x2d3   : > { %v1926_v50 = vsel %vm1923_vm2, %v1925_v26, %v1921_v28  ;;  %vm1905_vm3 = vweird.f32 %v4507_v53  ;;  %v1886_v32 = vmul.f32 %v4473_v42, %v4433_v23  ;;  %2773 = vrcp.f32 %v4614_v29 }
 0x2d4   : > { %v1942_v11 = vmul.f32 %v1926_v50, %v4309_v21  ;;  %v1902_v34 = vmul.f32 %v4507_v53, %v1901_v51  ;;  %v4634_v25 = vadd.f32 1e-06, %v1530_v14  ;;  %v1499_v33 = vsub.f32 1.5, %v1498_v16 }
 0x2d5   : > { %v1505_v61 = vand.u32 2147483648, %v4498_v6  ;;  %v4637_v46 = vpop.eup %2767  ;;  %v4641_v24 = vsel %vm1516_vm14, %v1517_v48, %v1515_v37  ;;  %vm1904_vm4 = vweird.f32 %v4456_v8  ;;  %v1887_v7 = vsub.f32 1.0, %v1886_v32 }
 0x2d6   : > { %1959 = vmatpush.xpose.msra.mxu0 %v1942_v11  ;;  %2401 = vmatpush.xpose.msra.mxu1 %v1942_v11  ;;  %v1903_v21 = vadd.f32 %v4507_v53, %v1902_v34  ;;  %v4645_v22 = vpop.eup %2769  ;;  %vm1906_vm5 = vmor %vm1904_vm4, %vm1905_vm3  ;;  %vm1909_vm6 = vcmp.eq.f32.partialorder %v1908_v36, 8.507059e+37  ;;  %v1911_v45 = vor.u32 1.1754944e-38, %v1910_v18  ;;  %v1896_v15 = vand.u32 2147483648, %v4433_v23 }
 0x2d7   : > { %2402 = vmatpush.xpose.msra.mxu2 %v1942_v11  ;;  %2403 = vmatpush.xpose.msra.mxu3 %v1942_v11  ;;  %v1872_v12 = vmul.f32 %v4512_v17, %v4460_v4  ;;  %v4652_v13 = vpop.eup %2771  ;;  %v1888_v8 = vmul.f32 %v4473_v42, %v1887_v7  ;;  %vm1891_vm7 = vweird.f32 %v4473_v42  ;;  %v1894_v10 = vand.u32 2147483647, %v4433_v23 }
 0x2d8   : > { %v1907_v3 = vsel %vm1906_vm5, %v4507_v53, %v1903_v21  ;;  %v1500_v5 = vmul.f32 %v4539_v9, %v1499_v33  ;;  %vm1890_vm8 = vweird.f32 %v4433_v23  ;;  %vm1877_vm9 = vweird.f32 %v4512_v17 }
 0x2d9   : > { %v1912_v57 = vsel %vm1909_vm6, %v1911_v45, %v1907_v3  ;;  %v1873_v20 = vsub.f32 1.0, %v1872_v12  ;;  %v1889_v48 = vadd.f32 %v4473_v42, %v1888_v8  ;;  %v1882_v53 = vand.u32 2147483648, %v4460_v4  ;;  %v4664_v28 = vpop.eup %2773  ;;  %vm1892_vm10 = vmor %vm1890_vm8, %vm1891_vm7 }
 0x2da   : > { %v1941_v59 = vmul.f32 %v1912_v57, %v4324_v35  ;;  %v1897_v55 = vor.u32 1.1754944e-38, %v1896_v15  ;;  %v1880_v9 = vand.u32 2147483647, %v4460_v4  ;;  %v1858_v23 = vmul.f32 %v4486_v49, %v4442_v60 }
 0x2db   : > { %v1874_v16 = vmul.f32 %v4512_v17, %v1873_v20  ;;  %2775 = vrcp.f32 %v4634_v25  ;;  %v1893_v35 = vsel %vm1892_vm10, %v4473_v42, %v1889_v48  ;;  %vm1895_vm11 = vcmp.eq.f32.partialorder %v1894_v10, 8.507059e+37 }
 0x2dc   : > { %1960 = vmatpush.xpose.msra.mxu0 %v1941_v59  ;;  %2404 = vmatpush.xpose.msra.mxu1 %v1941_v59  ;;  %vm1876_vm12 = vweird.f32 %v4460_v4  ;;  %vm1502_vm13 = vcmp.eq.f32.partialorder %v4498_v6, inf  ;;  %v1898_v26 = vsel %vm1895_vm11, %v1897_v55, %v1893_v35  ;;  %v1859_v51 = vsub.f32 1.0, %v1858_v23 }
 0x2dd   : > { %2405 = vmatpush.xpose.msra.mxu2 %v1941_v59  ;;  %2406 = vmatpush.xpose.msra.mxu3 %v1941_v59  ;;  %v1875_v14 = vadd.f32 %v4512_v17, %v1874_v16  ;;  %vm1863_vm14 = vweird.f32 %v4486_v49  ;;  %v1940_v37 = vmul.f32 %v1898_v26, %v4312_v30  ;;  %vm1878_vm15 = vmor %vm1876_vm12, %vm1877_vm9  ;;  %v1883_v50 = vor.u32 1.1754944e-38, %v1882_v53 }
 0x2de   : > { %v1868_v42 = vand.u32 2147483648, %v4442_v60  ;;  %v1844_v4 = vmul.f32 %v4532_v63, %v4481_v47  ;;  %vm1881_vm0 = vcmp.eq.f32.partialorder %v1880_v9, 8.507059e+37  ;;  %v1860_v18 = vmul.f32 %v4486_v49, %v1859_v51 }
 0x2df   : > { %v1879_v36 = vsel %vm1878_vm15, %v4512_v17, %v1875_v14  ;;  %v1866_v11 = vand.u32 2147483647, %v4442_v60  ;;  %v1501_v34 = vmul.f32 %v1500_v5, %v4498_v6  ;;  %v1852_v33 = vand.u32 2147483647, %v4481_v47 }
 0x2e0   : > { %1961 = vmatpush.xpose.msra.mxu0 %v1940_v37  ;;  %2407 = vmatpush.xpose.msra.mxu1 %v1940_v37  ;;  %v1884_v30 = vsel %vm1881_vm0, %v1883_v50, %v1879_v36  ;;  %v1845_v32 = vsub.f32 1.0, %v1844_v4  ;;  %vm1504_vm1 = vcmp.eq.f32.partialorder %v4498_v6, 0.0  ;;  %v1861_v21 = vadd.f32 %v4486_v49, %v1860_v18 }
 0x2e1   : > { %2408 = vmatpush.xpose.msra.mxu2 %v1940_v37  ;;  %2409 = vmatpush.xpose.msra.mxu3 %v1940_v37  ;;  %vm1862_vm2 = vweird.f32 %v4442_v60  ;;  %v1854_v17 = vand.u32 2147483648, %v4481_v47  ;;  %v1830_v7 = vmul.f32 %v4548_v39, %v4501_v1  ;;  %v4693_v45 = vpop.eup %2775  ;;  %v1939_v15 = vmul.f32 %v1884_v30, %v4327_v31 }
 0x2e2   : > { %vm1864_vm3 = vmor %vm1862_vm2, %vm1863_vm14  ;;  %v1869_v12 = vor.u32 1.1754944e-38, %v1868_v42  ;;  %v1846_v3 = vmul.f32 %v4532_v63, %v1845_v32  ;;  %vm1849_vm4 = vweird.f32 %v4532_v63  ;;  %vm1867_vm5 = vcmp.eq.f32.partialorder %v1866_v11, 8.507059e+37 }
 0x2e3   : > { %v1865_v8 = vsel %vm1864_vm3, %v4486_v49, %v1861_v21  ;;  %vm1848_vm6 = vweird.f32 %v4481_v47  ;;  %v1831_v60 = vsub.f32 1.0, %v1830_v7  ;;  %vm1853_vm7 = vcmp.eq.f32.partialorder %v1852_v33, 8.507059e+37 }
 0x2e4   : > { %1962 = vmatpush.xpose.msra.mxu0 %v1939_v15  ;;  %2410 = vmatpush.xpose.msra.mxu1 %v1939_v15  ;;  %v1870_v10 = vsel %vm1867_vm5, %v1869_v12, %v1865_v8  ;;  %v1847_v5 = vadd.f32 %v4532_v63, %v1846_v3  ;;  %v1816_v31 = vmul.f32 %v4616_v41, %v4542_v38  ;;  %vm1850_vm8 = vmor %vm1848_vm6, %vm1849_vm4  ;;  %v1855_v57 = vor.u32 1.1754944e-38, %v1854_v17 }
 0x2e5   : > { %2411 = vmatpush.xpose.msra.mxu2 %v1939_v15  ;;  %2412 = vmatpush.xpose.msra.mxu3 %v1939_v15  ;;  %v1832_v20 = vmul.f32 %v4548_v39, %v1831_v60  ;;  %vm1835_vm9 = vweird.f32 %v4548_v39  ;;  %v1840_v47 = vand.u32 2147483648, %v4501_v1  ;;  %v1938_v49 = vmul.f32 %v1870_v10, %v4315_v62 }
 0x2e6   : > { %v1851_v59 = vsel %vm1850_vm8, %v4532_v63, %v1847_v5  ;;  %v1838_v48 = vand.u32 2147483647, %v4501_v1  ;;  %v1817_v53 = vsub.f32 1.0, %v1816_v31  ;;  %vm1834_vm10 = vweird.f32 %v4501_v1  ;;  %v2815_v5 = vld [vmem:[%s3240_s11 + $0x10] sm:$0xff] }
 0x2e7   : > { %v1856_v55 = vsel %vm1853_vm7, %v1855_v57, %v1851_v59  ;;  %v1833_v16 = vadd.f32 %v4548_v39, %v1832_v20  ;;  %v1802_v9 = vmul.f32 %v4621_v40, %v4550_v54  ;;  %v1503_v23 = vsel %vm1502_vm13, %v4498_v6, %v1501_v34  ;;  %vm4718_vm11 = vmor %vm1834_vm10, %vm1835_vm9 }
 0x2e8   : > { %1963 = vmatpush.xpose.msra.mxu0 %v1938_v49  ;;  %2413 = vmatpush.xpose.msra.mxu1 %v1938_v49  ;;  %v1818_v63 = vmul.f32 %v4616_v41, %v1817_v53  ;;  %vm1821_vm12 = vweird.f32 %v4616_v41  ;;  %v1824_v35 = vand.u32 2147483647, %v4542_v38  ;;  %v1841_v26 = vor.u32 1.1754944e-38, %v1840_v47 }
 0x2e9   : > { %2414 = vmatpush.xpose.msra.mxu2 %v1938_v49  ;;  %2415 = vmatpush.xpose.msra.mxu3 %v1938_v49  ;;  %v1837_v1 = vsel %vm4718_vm11, %v4548_v39, %v1833_v16  ;;  %v1826_v14 = vand.u32 2147483648, %v4542_v38  ;;  %v1803_v51 = vsub.f32 1.0, %v1802_v9  ;;  %v1937_v37 = vmul.f32 %v1856_v55, %v4330_v52 }
 0x2ea   : > { %vm1839_vm13 = vcmp.eq.f32.partialorder %v1838_v48, 8.507059e+37  ;;  %v1819_v50 = vadd.f32 %v4616_v41, %v1818_v63  ;;  %vm1820_vm14 = vweird.f32 %v4542_v38  ;;  %v4733_v42 = vadd.f32 1e-06, %v4641_v24 }
 0x2eb   : > { %v1842_v4 = vsel %vm1839_vm13, %v1841_v26, %v1837_v1  ;;  %vm4735_vm15 = vmor %vm1820_vm14, %vm1821_vm12  ;;  %v1804_v39 = vmul.f32 %v4621_v40, %v1803_v51  ;;  %v1788_v18 = vmul.f32 %v4637_v46, %v4581_v27  ;;  %v1506_v52 = vsel %vm1504_vm1, %v1505_v61, %v1503_v23  ;;  %v1958_v51 = vld [vmem:[#allocation2 + $0x28] sm:$0xff] }
 0x2ec   : > { %1964 = vmatpush.xpose.msra.mxu0 %v1937_v37  ;;  %2416 = vmatpush.xpose.msra.mxu1 %v1937_v37  ;;  %v1823_v38 = vsel %vm4735_vm15, %v4616_v41, %v1819_v50  ;;  %vm1825_vm0 = vcmp.eq.f32.partialorder %v1824_v35, 8.507059e+37  ;;  %vm1807_vm2 = vweird.f32 %v4621_v40  ;;  %v1827_v24 = vor.u32 1.1754944e-38, %v1826_v14 }
 0x2ed   : > { %2417 = vmatpush.xpose.msra.mxu2 %v1937_v37  ;;  %2418 = vmatpush.xpose.msra.mxu3 %v1937_v37  ;;  %v1805_v11 = vadd.f32 %v4621_v40, %v1804_v39  ;;  %v1812_v34 = vand.u32 2147483648, %v4550_v54  ;;  %v1789_v30 = vsub.f32 1.0, %v1788_v18  ;;  %v1936_v6 = vmul.f32 %v1842_v4, %v4339_v56 }
 0x2ee   : > { %vm1806_vm1 = vweird.f32 %v4550_v54  ;;  %v1810_v61 = vand.u32 2147483647, %v4550_v54  ;;  %v1774_v41 = vmul.f32 %v4645_v22, %v4586_v44  ;;  %2777 = vrcp.f32 %v4733_v42 }
 0x2ef   : > { %v4758_v32 = vadd.f32 1e-06, %v1506_v52  ;;  %v1828_v33 = vsel %vm1825_vm0, %v1827_v24, %v1823_v38  ;;  %vm4760_vm3 = vmor %vm1806_vm1, %vm1807_vm2  ;;  %v1790_v17 = vmul.f32 %v4637_v46, %v1789_v30  ;;  %vm1792_vm4 = vweird.f32 %v4581_v27 }
 0x2f0   : > { %1965 = vmatpush.xpose.msra.mxu0 %v1936_v6  ;;  %2419 = vmatpush.xpose.msra.mxu1 %v1936_v6  ;;  %v1809_v56 = vsel %vm4760_vm3, %v4621_v40, %v1805_v11  ;;  %vm1793_vm5 = vweird.f32 %v4637_v46  ;;  %v1775_v54 = vsub.f32 1.0, %v1774_v41  ;;  %v1813_v7 = vor.u32 1.1754944e-38, %v1812_v34 }
 0x2f1   : > { %2420 = vmatpush.xpose.msra.mxu2 %v1936_v6  ;;  %2421 = vmatpush.xpose.msra.mxu3 %v1936_v6  ;;  %v1791_v15 = vadd.f32 %v4637_v46, %v1790_v17  ;;  %v1798_v12 = vand.u32 2147483648, %v4581_v27  ;;  %v1760_v3 = vmul.f32 %v4652_v13, %v4590_v19  ;;  %v1935_v8 = vmul.f32 %v1828_v33, %v4342_v58  ;;  %vm4777_vm7 = vmor %vm1792_vm4, %vm1793_vm5 }
 0x2f2   : > { %vm1811_vm6 = vcmp.eq.f32.partialorder %v1810_v61, 8.507059e+37  ;;  %v1796_v40 = vand.u32 2147483647, %v4581_v27  ;;  %v1776_v60 = vmul.f32 %v4645_v22, %v1775_v54  ;;  %vm1779_vm8 = vweird.f32 %v4645_v22  ;;  %v2813_v61 = vld [vmem:[%s3240_s11 + $0x20] sm:$0xff] }
 0x2f3   : > { %v1814_v10 = vsel %vm1811_vm6, %v1813_v7, %v1809_v56  ;;  %v1761_v31 = vsub.f32 1.0, %v1760_v3  ;;  %2779 = vrcp.f32 %v4758_v32  ;;  %v1795_v58 = vsel %vm4777_vm7, %v4637_v46, %v1791_v15  ;;  %v2814_v15 = vld [vmem:[%s3240_s11 + $0x18] sm:$0xff]  ;;  %v1943_v46 = vld [vmem:[#allocation2 + $0x30] sm:$0xff] }
 0x2f4   : > { %1966 = vmatpush.xpose.msra.mxu0 %v1935_v8  ;;  %2422 = vmatpush.xpose.msra.mxu1 %v1935_v8  ;;  %v1777_v27 = vadd.f32 %v4645_v22, %v1776_v60  ;;  %v1746_v57 = vmul.f32 %v4664_v28, %v4614_v29  ;;  %v4789_v20 = vpop.eup %2777  ;;  %v1799_v47 = vor.u32 1.1754944e-38, %v1798_v12  ;;  %vm1778_vm9 = vweird.f32 %v4586_v44 }
 0x2f5   : > { %2423 = vmatpush.xpose.msra.mxu2 %v1935_v8  ;;  %2424 = vmatpush.xpose.msra.mxu3 %v1935_v8  ;;  %v1784_v49 = vand.u32 2147483648, %v4586_v44  ;;  %v1762_v59 = vmul.f32 %v4652_v13, %v1761_v31  ;;  %v1934_v48 = vmul.f32 %v1814_v10, %v4345_v43  ;;  %vm1797_vm10 = vcmp.eq.f32.partialorder %v1796_v40, 8.507059e+37  ;;  %vm4797_vm11 = vmor %vm1778_vm9, %vm1779_vm8 }
 0x2f6   : > { %v1782_v53 = vand.u32 2147483647, %v4586_v44  ;;  %v1747_v55 = vsub.f32 1.0, %v1746_v57  ;;  %v1800_v16 = vsel %vm1797_vm10, %v1799_v47, %v1795_v58  ;;  %v1781_v9 = vsel %vm4797_vm11, %v4645_v22, %v1777_v27  ;;  %v2816_v47 = vld [vmem:[%s3240_s11 + $0x8] sm:$0xff] }
 0x2f7   : > { %v1763_v23 = vadd.f32 %v4652_v13, %v1762_v59  ;;  %vm1765_vm12 = vweird.f32 %v4652_v13  ;;  %v1732_v62 = vmul.f32 %v4693_v45, %v4634_v25  ;;  %v1785_v44 = vor.u32 1.1754944e-38, %v1784_v49 }
 0x2f8   : > { %1967 = vmatpush.xpose.msra.mxu0 %v1934_v48  ;;  %2425 = vmatpush.xpose.msra.mxu1 %v1934_v48  ;;  %v1748_v43 = vmul.f32 %v4664_v28, %v1747_v55  ;;  %v1768_v63 = vand.u32 2147483647, %v4590_v19  ;;  %v1770_v35 = vand.u32 2147483648, %v4590_v19  ;;  %v1933_v22 = vmul.f32 %v1800_v16, %v4354_v2  ;;  %v1951_v55 = vld [vmem:[#allocation2 + $0x40] sm:$0xff] }
 0x2f9   : > { %2426 = vmatpush.xpose.msra.mxu2 %v1934_v48  ;;  %2427 = vmatpush.xpose.msra.mxu3 %v1934_v48  ;;  %v4812_v1 = vpop.eup %2779  ;;  %vm1783_vm13 = vcmp.eq.f32.partialorder %v1782_v53, 8.507059e+37  ;;  %vm1764_vm14 = vweird.f32 %v4590_v19  ;;  %v1733_v26 = vsub.f32 1.0, %v1732_v62  ;;  %v1718_v37 = vmul.f32 %v4789_v20, %v4733_v42  ;;  %v2817_v48 = vld [vmem:[%s3240_s11] sm:$0xff]  ;;  %v1947_v53 = vld [vmem:[#allocation2 + $0x50] sm:$0xff] }
 0x2fa   : > { %v1786_v14 = vsel %vm1783_vm13, %v1785_v44, %v1781_v9  ;;  %vm4816_vm15 = vmor %vm1764_vm14, %vm1765_vm12  ;;  %v1749_v2 = vadd.f32 %v4664_v28, %v1748_v43  ;;  %vm1751_vm0 = vweird.f32 %v4664_v28  ;;  %vm1769_vm2 = vcmp.eq.f32.partialorder %v1768_v63, 8.507059e+37  ;;  %v1955_v16 = vld [vmem:[#allocation2 + $0x60] sm:$0xff]  ;;  %v1956_v62 = vld [vmem:[#allocation2 + $0x70] sm:$0xff] }
 0x2fb   : > { %v1767_v50 = vsel %vm4816_vm15, %v4652_v13, %v1763_v23  ;;  %v1734_v19 = vmul.f32 %v4693_v45, %v1733_v26  ;;  %v1771_v4 = vor.u32 1.1754944e-38, %v1770_v35  ;;  %v1756_v36 = vand.u32 2147483648, %v4614_v29  ;;  %v1944_v9 = vld [vmem:[#allocation2] sm:$0xff]  ;;  %v1948_v23 = vld [vmem:[#allocation2 + $0x68] sm:$0xff]  ;;  %v1945_v44 = vld [vmem:[#allocation2 + $0x58] sm:$0xff] }
 0x2fc   : > { %1968 = vmatpush.xpose.msra.mxu0 %v1933_v22  ;;  %2428 = vmatpush.xpose.msra.mxu1 %v1933_v22  ;;  %v1719_v39 = vsub.f32 1.0, %v1718_v37  ;;  %v1932_v18 = vmul.f32 %v1786_v14, %v4357_v0  ;;  %vm1750_vm1 = vweird.f32 %v4614_v29  ;;  %v1754_v13 = vand.u32 2147483647, %v4614_v29  ;;  %v1952_v43 = vld [vmem:[#allocation2 + $0x20] sm:$0xff]  ;;  %v1949_v63 = vld [vmem:[#allocation2 + $0x8] sm:$0xff]  ;;  %v1953_v35 = vld [vmem:[#allocation2 + $0x10] sm:$0xff] }
 0x2fd   : > { %2429 = vmatpush.xpose.msra.mxu2 %v1933_v22  ;;  %2430 = vmatpush.xpose.msra.mxu3 %v1933_v22  ;;  %v1704_v52 = vmul.f32 %v4812_v1, %v4758_v32  ;;  %v1772_v38 = vsel %vm1769_vm2, %v1771_v4, %v1767_v50  ;;  %vm4834_vm3 = vmor %vm1750_vm1, %vm1751_vm0  ;;  %vm1737_vm4 = vweird.f32 %v4693_v45  ;;  %v1735_v11 = vadd.f32 %v4693_v45, %v1734_v19  ;;  %v1950_v22 = vld [vmem:[#allocation2 + $0x48] sm:$0xff]  ;;  %v1946_v26 = vld [vmem:[#allocation2 + $0x18] sm:$0xff] }
 0x2fe   : > { %v1753_v0 = vsel %vm4834_vm3, %v4664_v28, %v1749_v2  ;;  %v1720_v29 = vmul.f32 %v4789_v20, %v1719_v39  ;;  %v1757_v30 = vor.u32 1.1754944e-38, %v1756_v36  ;;  %v1742_v6 = vand.u32 2147483648, %v4634_v25  ;;  %v1954_v14 = vld [vmem:[#allocation2 + $0x38] sm:$0xff] }
 0x2ff   : > { %v1705_v34 = vsub.f32 1.0, %v1704_v52  ;;  %v1931_v41 = vmul.f32 %v2813_v61, %v1772_v38  ;;  %vm1755_vm5 = vcmp.eq.f32.partialorder %v1754_v13, 8.507059e+37  ;;  %vm1736_vm6 = vweird.f32 %v4634_v25 }
 0x300   : > { %1969 = vmatpush.xpose.msra.mxu0 %v1932_v18  ;;  %2431 = vmatpush.xpose.msra.mxu1 %v1932_v18  ;;  %v1740_v33 = vand.u32 2147483647, %v4634_v25  ;;  %v1758_v21 = vsel %vm1755_vm5, %v1757_v30, %v1753_v0  ;;  %vm4850_vm7 = vmor %vm1736_vm6, %vm1737_vm4  ;;  %vm1722_vm8 = vweird.f32 %v4733_v42  ;;  %v1721_v56 = vadd.f32 %v4789_v20, %v1720_v29 }
 0x301   : > { %2432 = vmatpush.xpose.msra.mxu2 %v1932_v18  ;;  %2433 = vmatpush.xpose.msra.mxu3 %v1932_v18  ;;  %v1739_v17 = vsel %vm4850_vm7, %v4693_v45, %v1735_v11  ;;  %vm1723_vm9 = vweird.f32 %v4789_v20  ;;  %v1706_v25 = vmul.f32 %v4812_v1, %v1705_v34  ;;  %v1743_v54 = vor.u32 1.1754944e-38, %v1742_v6 }
 0x302   : > { %v1728_v7 = vand.u32 2147483648, %v4733_v42  ;;  %v1930_v12 = vmul.f32 %v2814_v15, %v1758_v21  ;;  %vm1741_vm10 = vcmp.eq.f32.partialorder %v1740_v33, 8.507059e+37  ;;  %v1726_v3 = vand.u32 2147483647, %v4733_v42  ;;  %vm4866_vm11 = vmor %vm1722_vm8, %vm1723_vm9 }
 0x303   : > { %v1744_v8 = vsel %vm1741_vm10, %v1743_v54, %v1739_v17  ;;  %v1725_v40 = vsel %vm4866_vm11, %v4789_v20, %v1721_v56  ;;  %v1707_v60 = vadd.f32 %v4812_v1, %v1706_v25  ;;  %vm1709_vm12 = vweird.f32 %v4812_v1 }
 0x304   : > { %1970 = vmatpush.xpose.msra.mxu0 %v1931_v41  ;;  %2434 = vmatpush.xpose.msra.mxu1 %v1931_v41  ;;  %v1729_v10 = vor.u32 1.1754944e-38, %v1728_v7  ;;  %v1714_v42 = vand.u32 2147483648, %v4758_v32  ;;  %v1929_v31 = vmul.f32 %v2815_v5, %v1744_v8  ;;  %vm1727_vm13 = vcmp.eq.f32.partialorder %v1726_v3, 8.507059e+37 }
 0x305   : > { %2435 = vmatpush.xpose.msra.mxu2 %v1931_v41  ;;  %2436 = vmatpush.xpose.msra.mxu3 %v1931_v41  ;;  %vm1708_vm14 = vweird.f32 %v4758_v32  ;;  %v1712_v58 = vand.u32 2147483647, %v4758_v32  ;;  %vm2120_vm2 = vcmask 7168  }
 0x306   : > { %v1730_v27 = vsel %vm1727_vm13, %v1729_v10, %v1725_v40  ;;  %vm1710_vm15 = vmor %vm1708_vm14, %vm1709_vm12  ;;  %v1715_v20 = vor.u32 1.1754944e-38, %v1714_v42 }
 0x307   : > { %v1711_v57 = vsel %vm1710_vm15, %v4812_v1, %v1707_v60  ;;  %v1928_v49 = vmul.f32 %v2816_v47, %v1730_v27  ;;  %vm1713_vm0 = vcmp.eq.f32.partialorder %v1712_v58, 8.507059e+37  ;;  %v1957_v1 = vld [vmem:[#allocation2 + $0x78] sm:$0xff] }
 0x308   : > { %1971 = vmatpush.xpose.msra.mxu0 %v1930_v12  ;;  %2437 = vmatpush.xpose.msra.mxu1 %v1930_v12  ;;  %v1716_v59 = vsel %vm1713_vm0, %v1715_v20, %v1711_v57 }
 0x309   : > { %2438 = vmatpush.xpose.msra.mxu2 %v1930_v12  ;;  %2439 = vmatpush.xpose.msra.mxu3 %v1930_v12  ;;  %v1927_v32 = vmul.f32 %v2817_v48, %v1716_v59 }
 0x30c   : > { %1972 = vmatpush.xpose.msra.mxu0 %v1929_v31  ;;  %2440 = vmatpush.xpose.msra.mxu1 %v1929_v31 }
 0x30d   : > { %2441 = vmatpush.xpose.msra.mxu2 %v1929_v31  ;;  %2442 = vmatpush.xpose.msra.mxu3 %v1929_v31 }
 0x310   : > { %1973 = vmatpush.xpose.msra.mxu0 %v1928_v49  ;;  %2443 = vmatpush.xpose.msra.mxu1 %v1928_v49 }
 0x311   : > { %2444 = vmatpush.xpose.msra.mxu2 %v1928_v49  ;;  %2445 = vmatpush.xpose.msra.mxu3 %v1928_v49 }
 0x314   : > { %1974 = vmatpush.xpose.msra.mxu0 %v1927_v32  ;;  %2446 = vmatpush.xpose.msra.mxu1 %v1927_v32 }
 0x315   : > { %2447 = vmatpush.xpose.msra.mxu2 %v1927_v32  ;;  %2448 = vmatpush.xpose.msra.mxu3 %v1927_v32 }
 0x317   : > { %1975 = vmatmul.f32.vlgmr.msra.gmra.mxu0 %v1943_v46  ;;  %1987 = vmatmul.f32.vlgmr.msra.gmra.mxu1 %v1947_v53  ;;  %v2024_v46 = vld [vmem:[#allocation4] sm:$0xff] }
 0x318   : > { %1999 = vmatmul.f32.vlgmr.msra.gmra.mxu2 %v1951_v55  ;;  %2011 = vmatmul.f32.vlgmr.msra.gmra.mxu3 %v1955_v16  ;;  %v2028_v53 = vld [vmem:[#allocation4 + $0x20] sm:$0xff] }
 0x31f   : > { %1978 = vmatmul.f32.gmra.mxu0 %v1944_v9  ;;  %1990 = vmatmul.f32.gmra.mxu1 %v1948_v23 }
 0x320   : > { %2002 = vmatmul.f32.gmra.mxu2 %v1952_v43  ;;  %2014 = vmatmul.f32.gmra.mxu3 %v1956_v62  ;;  %v2032_v43 = vld [vmem:[#allocation4 + $0x40] sm:$0xff] }
 0x321   : > { %v2036_v62 = vld [vmem:[#allocation4 + $0x60] sm:$0xff] }
 0x327   : > { %1981 = vmatmul.f32.gmra.mxu0 %v1945_v44  ;;  %1993 = vmatmul.f32.gmra.mxu1 %v1949_v63  ;;  %v2025_v63 = vld [vmem:[#allocation4 + $0x8] sm:$0xff] }
 0x328   : > { %2005 = vmatmul.f32.gmra.mxu2 %v1953_v35  ;;  %2017 = vmatmul.f32.gmra.mxu3 %v1957_v1 }
 0x32f   : > { %1996 = vmatmul.f32.gmra.mxu1 %v1950_v22  ;;  %1984 = vmatmul.f32.gmra.mxu0 %v1946_v26 }
 0x330   : > { %2008 = vmatmul.f32.gmra.mxu2 %v1954_v14  ;;  %2020 = vmatmul.f32.gmra.mxu3 %v1958_v51  ;;  %v2029_v51 = vld [vmem:[#allocation4 + $0x28] sm:$0xff] }
 0x394   : > { %v1976_v37 = vpop.f32.mrf.mxu0  ;;  %v1988_v50 = vpop.f32.mrf.mxu1 }
 0x395   : > { %v2040_v2 = vmul.f32 1.442695, %v1976_v37  ;;  %v2048_v19 = vmul.f32 1.442695, %v1988_v50  ;;  %v2033_v37 = vld [vmem:[#allocation4 + $0x48] sm:$0xff] }
 0x397   : > { %2781 = vpow2.f32 %v2040_v2 }
 0x398   : > { %2783 = vpow2.f32 %v2048_v19 }
 0x39b   : > { %v2000_v4 = vpop.f32.mrf.mxu2  ;;  %v2012_v36 = vpop.f32.mrf.mxu3 }
 0x39c   : > { %v2056_v39 = vmul.f32 1.442695, %v2000_v4  ;;  %v2064_v18 = vmul.f32 1.442695, %v2012_v36  ;;  %v1979_v13 = vpop.f32.mrf.mxu0  ;;  %v1991_v52 = vpop.f32.mrf.mxu1  ;;  %v2034_v36 = vld [vmem:[#allocation4 + $0x50] sm:$0xff] }
 0x39d   : > { %v2782_v38 = vpop.eup %2781  ;;  %v2042_v24 = vmul.f32 1.442695, %v1979_v13  ;;  %v2050_v11 = vmul.f32 1.442695, %v1991_v52 }
 0x39e   : > { %v2784_v0 = vpop.eup %2783  ;;  %2785 = vpow2.f32 %v2056_v39  ;;  %2072 = vadd.xlane.f32.xlu1 %v2782_v38  ;;  %v2026_v39 = vld [vmem:[#allocation4 + $0x10] sm:$0xff] }
 0x39f   : > { %2787 = vpow2.f32 %v2064_v18  ;;  %2080 = vadd.xlane.f32.xlu2 %v2784_v0  ;;  %v2030_v18 = vld [vmem:[#allocation4 + $0x30] sm:$0xff] }
 0x3a0   : > { %2789 = vpow2.f32 %v2042_v24 }
 0x3a1   : > { %2791 = vpow2.f32 %v2050_v11 }
 0x3a3   : > { %v2003_v29 = vpop.f32.mrf.mxu2  ;;  %v2015_v34 = vpop.f32.mrf.mxu3 }
 0x3a4   : > { %v2786_v30 = vpop.eup %2785  ;;  %v2058_v6 = vmul.f32 1.442695, %v2003_v29  ;;  %v1994_v61 = vpop.f32.mrf.mxu1  ;;  %v2066_v58 = vmul.f32 1.442695, %v2015_v34  ;;  %v2031_v29 = vld [vmem:[#allocation4 + $0x38] sm:$0xff] }
 0x3a5   : > { %v2788_v41 = vpop.eup %2787  ;;  %2088 = vadd.xlane.f32.xlu0 %v2786_v30  ;;  %v1982_v33 = vpop.f32.mrf.mxu0  ;;  %v2052_v17 = vmul.f32 1.442695, %v1994_v61  ;;  %v2035_v34 = vld [vmem:[#allocation4 + $0x58] sm:$0xff] }
 0x3a6   : > { %v2790_v21 = vpop.eup %2789  ;;  %2793 = vpow2.f32 %v2058_v6  ;;  %2096 = vadd.xlane.f32.xlu1 %v2788_v41  ;;  %v2044_v28 = vmul.f32 1.442695, %v1982_v33  ;;  %v2027_v30 = vld [vmem:[#allocation4 + $0x18] sm:$0xff] }
 0x3a7   : > { %2074 = vadd.xlane.f32.xlu2 %v2790_v21  ;;  %v2792_v56 = vpop.eup %2791 }
 0x3a8   : > { %2795 = vpow2.f32 %v2044_v28 }
 0x3a9   : > { %2797 = vpow2.f32 %v2052_v17  ;;  %v2037_v17 = vld [vmem:[#allocation4 + $0x68] sm:$0xff] }
 0x3ab   : > { %v2006_v25 = vpop.f32.mrf.mxu2  ;;  %v2018_v15 = vpop.f32.mrf.mxu3 }
 0x3ac   : > { %v2794_v54 = vpop.eup %2793  ;;  %v2060_v7 = vmul.f32 1.442695, %v2006_v25  ;;  %v1997_v12 = vpop.f32.mrf.mxu1  ;;  %v2068_v20 = vmul.f32 1.442695, %v2018_v15  ;;  %v2039_v25 = vld [vmem:[#allocation4 + $0x78] sm:$0xff] }
 0x3ad   : > { %2082 = vadd.xlane.f32.xlu0 %v2792_v56  ;;  %v1985_v3 = vpop.f32.mrf.mxu0  ;;  %v2054_v8 = vmul.f32 1.442695, %v1997_v12  ;;  %v2038_v56 = vld [vmem:[#allocation4 + $0x70] sm:$0xff] }
 0x3ae   : > { %2799 = vpow2.f32 %v2060_v7  ;;  %2090 = vadd.xlane.f32.xlu1 %v2794_v54  ;;  %v2046_v45 = vmul.f32 1.442695, %v1985_v3  ;;  %v2796_v40 = vpop.eup %2795 }
 0x3af   : > { %v2798_v60 = vpop.eup %2797  ;;  %2801 = vpow2.f32 %v2054_v8 }
 0x3b0   : > { %2803 = vpow2.f32 %v2046_v45 }
 0x3b3   : > { %v2009_v10 = vpop.f32.mrf.mxu2  ;;  %v2021_v31 = vpop.f32.mrf.mxu3 }
 0x3b4   : > { %v2800_v42 = vpop.eup %2799  ;;  %v2062_v5 = vmul.f32 1.442695, %v2009_v10  ;;  %v2070_v27 = vmul.f32 1.442695, %v2021_v31 }
 0x3b5   : > { %2092 = vadd.xlane.f32.xlu2 %v2800_v42  ;;  %2076 = vadd.xlane.f32.xlu0 %v2796_v40  ;;  %v2802_v57 = vpop.eup %2801 }
 0x3b6   : > { %2805 = vpow2.f32 %v2062_v5  ;;  %2084 = vadd.xlane.f32.xlu1 %v2798_v60  ;;  %v2804_v47 = vpop.eup %2803 }
 0x3b7   : > { %2807 = vpow2.f32 %v2066_v58 }
 0x3b8   : > { %2809 = vpow2.f32 %v2070_v27 }
 0x3b9   : > { %2811 = vpow2.f32 %v2068_v20 }
 0x3bc   : > { %v2806_v49 = vpop.eup %2805 }
 0x3bd   : > { %2086 = vadd.xlane.f32.xlu2 %v2802_v57  ;;  %2094 = vadd.xlane.f32.xlu0 %v2806_v49  ;;  %v2808_v59 = vpop.eup %2807 }
 0x3be   : > { %2078 = vadd.xlane.f32.xlu1 %v2804_v47  ;;  %v2810_v48 = vpop.eup %2809 }
 0x3bf   : > { %v2812_v32 = vpop.eup %2811 }
 0x3c5   : > { %2098 = vadd.xlane.f32.xlu2 %v2808_v59  ;;  %2100 = vadd.xlane.f32.xlu0 %v2812_v32 }
 0x3c6   : > { %2102 = vadd.xlane.f32.xlu1 %v2810_v48 }
 0x411   : > { %v2073_v55 = vpop.xlane.xlu1 %2072 }
 0x412   : > { %v2104_v16 = vadd.f32 %v2073_v55, %v2024_v46  ;;  %v2081_v9 = vpop.xlane.xlu2 %2080 }
 0x413   : > { %v2108_v23 = vadd.f32 %v2081_v9, %v2028_v53 }
 0x414   : > { %2121 = vst.msk [vmem:[#allocation4] sm:$0xff] %vm2120_vm2, %v2104_v16 }
 0x415   : > { %2125 = vst.msk [vmem:[#allocation4 + $0x20] sm:$0xff] %vm2120_vm2, %v2108_v23 }
 0x418   : > { %v2089_v44 = vpop.xlane.xlu0 %2088 }
 0x419   : > { %v2112_v35 = vadd.f32 %v2089_v44, %v2032_v43  ;;  %v2097_v1 = vpop.xlane.xlu1 %2096 }
 0x41a   : > { %v2116_v22 = vadd.f32 %v2097_v1, %v2036_v62  ;;  %v2075_v26 = vpop.xlane.xlu2 %2074 }
 0x41b   : > { %2129 = vst.msk [vmem:[#allocation4 + $0x40] sm:$0xff] %vm2120_vm2, %v2112_v35  ;;  %v2105_v14 = vadd.f32 %v2075_v26, %v2025_v63 }
 0x41c   : > { %2133 = vst.msk [vmem:[#allocation4 + $0x60] sm:$0xff] %vm2120_vm2, %v2116_v22 }
 0x41d   : > { %2122 = vst.msk [vmem:[#allocation4 + $0x8] sm:$0xff] %vm2120_vm2, %v2105_v14 }
 0x420   : > { %v2083_v50 = vpop.xlane.xlu0 %2082 }
 0x421   : > { %v2109_v2 = vadd.f32 %v2083_v50, %v2029_v51  ;;  %v2091_v19 = vpop.xlane.xlu1 %2090 }
 0x422   : > { %v2113_v4 = vadd.f32 %v2091_v19, %v2033_v37 }
 0x423   : > { %2126 = vst.msk [vmem:[#allocation4 + $0x28] sm:$0xff] %vm2120_vm2, %v2109_v2 }
 0x424   : > { %2130 = vst.msk [vmem:[#allocation4 + $0x48] sm:$0xff] %vm2120_vm2, %v2113_v4 }
 0x428   : > { %v2093_v13 = vpop.xlane.xlu2 %2092  ;;  %v2077_v52 = vpop.xlane.xlu0 %2076 }
 0x429   : > { %v2114_v38 = vadd.f32 %v2093_v13, %v2034_v36  ;;  %v2106_v24 = vadd.f32 %v2077_v52, %v2026_v39  ;;  %v2085_v0 = vpop.xlane.xlu1 %2084 }
 0x42a   : > { %v2110_v11 = vadd.f32 %v2085_v0, %v2030_v18 }
 0x42b   : > { %2131 = vst.msk [vmem:[#allocation4 + $0x50] sm:$0xff] %vm2120_vm2, %v2114_v38 }
 0x42c   : > { %2123 = vst.msk [vmem:[#allocation4 + $0x10] sm:$0xff] %vm2120_vm2, %v2106_v24 }
 0x42d   : > { %2127 = vst.msk [vmem:[#allocation4 + $0x30] sm:$0xff] %vm2120_vm2, %v2110_v11 }
 0x430   : > { %v2087_v6 = vpop.xlane.xlu2 %2086  ;;  %v2095_v61 = vpop.xlane.xlu0 %2094 }
 0x431   : > { %v2111_v41 = vadd.f32 %v2087_v6, %v2031_v29  ;;  %v2115_v33 = vadd.f32 %v2095_v61, %v2035_v34  ;;  %v2079_v21 = vpop.xlane.xlu1 %2078 }
 0x432   : > { %v2107_v28 = vadd.f32 %v2079_v21, %v2027_v30 }
 0x433   : > { %2128 = vst.msk [vmem:[#allocation4 + $0x38] sm:$0xff] %vm2120_vm2, %v2111_v41 }
 0x434   : > { %2132 = vst.msk [vmem:[#allocation4 + $0x58] sm:$0xff] %vm2120_vm2, %v2115_v33 }
 0x435   : > { %2124 = vst.msk [vmem:[#allocation4 + $0x18] sm:$0xff] %vm2120_vm2, %v2107_v28 }
 0x438   : > { %v2099_v54 = vpop.xlane.xlu2 %2098  ;;  %v2101_v7 = vpop.xlane.xlu0 %2100 }
 0x439   : > { %v2117_v15 = vadd.f32 %v2099_v54, %v2037_v17  ;;  %v2118_v12 = vadd.f32 %v2101_v7, %v2038_v56  ;;  %v2103_v3 = vpop.xlane.xlu1 %2102  ;;  %2140 = sbr.rel (%p2395_p8) target bundleno = 1116 (0x45c), region = 52 }
 0x43a   : > { %v2119_v8 = vadd.f32 %v2103_v3, %v2039_v25 }
 0x43b   : > { %2134 = vst.msk [vmem:[#allocation4 + $0x68] sm:$0xff] %vm2120_vm2, %v2117_v15 }
 0x43c   : > { %2135 = vst.msk [vmem:[#allocation4 + $0x70] sm:$0xff] %vm2120_vm2, %v2118_v12 }
 0x43d   : > { %2136 = vst.msk [vmem:[#allocation4 + $0x78] sm:$0xff] %vm2120_vm2, %v2119_v8 }
 0x43e   : > { %v2141_v45 = vld [vmem:[#allocation4] sm:$0xff]  ;;  %v2142_v40 = vld [vmem:[#allocation4 + $0x8] sm:$0xff]  ;;  %v2143_v42 = vld [vmem:[#allocation4 + $0x10] sm:$0xff] }
 0x43f   : > { %v2157_v60 = vadd.f32 1e-06, %v2141_v45  ;;  %v2158_v10 = vadd.f32 1e-06, %v2142_v40  ;;  %v2159_v5 = vadd.f32 1e-06, %v2143_v42 }
 0x440   : > { %v2144_v31 = vld [vmem:[#allocation4 + $0x18] sm:$0xff]  ;;  %v2145_v27 = vld [vmem:[#allocation4 + $0x20] sm:$0xff]  ;;  %v2146_v57 = vld [vmem:[#allocation4 + $0x28] sm:$0xff] }
 0x441   : > { %2818 = vlog2.f32 %v2157_v60  ;;  %v2160_v58 = vadd.f32 1e-06, %v2144_v31  ;;  %v2161_v20 = vadd.f32 1e-06, %v2145_v27  ;;  %v2162_v47 = vadd.f32 1e-06, %v2146_v57 }
 0x442   : > { %2820 = vlog2.f32 %v2158_v10  ;;  %v2147_v49 = vld [vmem:[#allocation4 + $0x30] sm:$0xff]  ;;  %v2148_v48 = vld [vmem:[#allocation4 + $0x38] sm:$0xff]  ;;  %v2149_v46 = vld [vmem:[#allocation4 + $0x40] sm:$0xff] }
 0x443   : > { %2822 = vlog2.f32 %v2159_v5  ;;  %v2163_v59 = vadd.f32 1e-06, %v2147_v49  ;;  %v2164_v32 = vadd.f32 1e-06, %v2148_v48  ;;  %v2150_v53 = vld [vmem:[#allocation4 + $0x48] sm:$0xff]  ;;  %v2151_v16 = vld [vmem:[#allocation4 + $0x50] sm:$0xff] }
 0x444   : > { %2824 = vlog2.f32 %v2160_v58  ;;  %v2165_v55 = vadd.f32 1e-06, %v2149_v46  ;;  %v2166_v9 = vadd.f32 1e-06, %v2150_v53  ;;  %v2152_v23 = vld [vmem:[#allocation4 + $0x58] sm:$0xff]  ;;  %v2205_v62 = vld [vmem:[#allocation3] sm:$0xff] }
 0x445   : > { %2826 = vlog2.f32 %v2161_v20  ;;  %v2167_v44 = vadd.f32 1e-06, %v2151_v16  ;;  %v2153_v63 = vld [vmem:[#allocation4 + $0x60] sm:$0xff]  ;;  %v2154_v35 = vld [vmem:[#allocation4 + $0x68] sm:$0xff]  ;;  %v2168_v14 = vadd.f32 1e-06, %v2152_v23 }
 0x446   : > { %2828 = vlog2.f32 %v2162_v47  ;;  %v2206_v26 = vld [vmem:[#allocation3 + $0x8] sm:$0xff]  ;;  %v2207_v50 = vld [vmem:[#allocation3 + $0x10] sm:$0xff]  ;;  %v2169_v2 = vadd.f32 1e-06, %v2153_v63  ;;  %v2208_v18 = vld [vmem:[#allocation3 + $0x18] sm:$0xff] }
 0x447   : > { %v2819_v43 = vpop.eup %2818  ;;  %2830 = vlog2.f32 %v2163_v59  ;;  %v2155_v19 = vld [vmem:[#allocation4 + $0x70] sm:$0xff]  ;;  %v2170_v13 = vadd.f32 1e-06, %v2154_v35  ;;  %v2156_v52 = vld [vmem:[#allocation4 + $0x78] sm:$0xff]  ;;  %v2209_v11 = vld [vmem:[#allocation3 + $0x20] sm:$0xff] }
 0x448   : > { %v2821_v1 = vpop.eup %2820  ;;  %v2174_v22 = vmul.f32 0.6931472, %v2819_v43  ;;  %2832 = vlog2.f32 %v2164_v32  ;;  %v2171_v29 = vadd.f32 1e-06, %v2155_v19  ;;  %v2210_v61 = vld [vmem:[#allocation3 + $0x28] sm:$0xff]  ;;  %v2211_v17 = vld [vmem:[#allocation3 + $0x30] sm:$0xff] }
 0x449   : > { %v2823_v51 = vpop.eup %2822  ;;  %v2176_v37 = vmul.f32 0.6931472, %v2821_v1  ;;  %2834 = vlog2.f32 %v2165_v55  ;;  %v2172_v41 = vadd.f32 1e-06, %v2156_v52  ;;  %v2212_v7 = vld [vmem:[#allocation3 + $0x38] sm:$0xff]  ;;  %v2213_v8 = vld [vmem:[#allocation3 + $0x40] sm:$0xff] }
 0x44a   : > { %v2825_v4 = vpop.eup %2824  ;;  %v2221_v36 = vsub.f32 %v2174_v22, %v2205_v62  ;;  %v2178_v39 = vmul.f32 0.6931472, %v2823_v51  ;;  %2836 = vlog2.f32 %v2166_v9  ;;  %v2214_v10 = vld [vmem:[#allocation3 + $0x48] sm:$0xff]  ;;  %v2215_v58 = vld [vmem:[#allocation3 + $0x50] sm:$0xff]  ;;  %v2216_v47 = vld [vmem:[#allocation3 + $0x58] sm:$0xff] }
 0x44b   : > { %v2827_v38 = vpop.eup %2826  ;;  %v2222_v24 = vsub.f32 %v2176_v37, %v2206_v26  ;;  %v2180_v0 = vmul.f32 0.6931472, %v2825_v4  ;;  %2838 = vlog2.f32 %v2167_v44  ;;  %v2217_v32 = vld [vmem:[#allocation3 + $0x60] sm:$0xff]  ;;  %v2218_v16 = vld [vmem:[#allocation3 + $0x68] sm:$0xff]  ;;  %v2219_v62 = vld [vmem:[#allocation3 + $0x70] sm:$0xff] }
 0x44c   : > { %v2829_v34 = vpop.eup %2828  ;;  %2237 = vst.msk [vmem:[%s3250_s27] sm:$0xff] %vm2120_vm2, %v2221_v36  ;;  %v2223_v30 = vsub.f32 %v2178_v39, %v2207_v50  ;;  %v2182_v6 = vmul.f32 0.6931472, %v2827_v38  ;;  %2840 = vlog2.f32 %v2168_v14  ;;  %v2220_v1 = vld [vmem:[#allocation3 + $0x78] sm:$0xff] }
 0x44d   : > { %v2831_v33 = vpop.eup %2830  ;;  %2238 = vst.msk [vmem:[%s3250_s27 + $0x8] sm:$0xff] %vm2120_vm2, %v2222_v24  ;;  %v2224_v21 = vsub.f32 %v2180_v0, %v2208_v18  ;;  %v2184_v28 = vmul.f32 0.6931472, %v2829_v34  ;;  %2842 = vlog2.f32 %v2169_v2 }
 0x44e   : > { %v2833_v56 = vpop.eup %2832  ;;  %2239 = vst.msk [vmem:[%s3250_s27 + $0x10] sm:$0xff] %vm2120_vm2, %v2223_v30  ;;  %v2225_v25 = vsub.f32 %v2182_v6, %v2209_v11  ;;  %v2186_v54 = vmul.f32 0.6931472, %v2831_v33  ;;  %2844 = vlog2.f32 %v2170_v13 }
 0x44f   : > { %v2835_v15 = vpop.eup %2834  ;;  %2240 = vst.msk [vmem:[%s3250_s27 + $0x18] sm:$0xff] %vm2120_vm2, %v2224_v21  ;;  %v2226_v12 = vsub.f32 %v2184_v28, %v2210_v61  ;;  %v2188_v3 = vmul.f32 0.6931472, %v2833_v56  ;;  %2846 = vlog2.f32 %v2171_v29 }
 0x450   : > { %v2837_v45 = vpop.eup %2836  ;;  %2241 = vst.msk [vmem:[%s3250_s27 + $0x20] sm:$0xff] %vm2120_vm2, %v2225_v25  ;;  %v2227_v40 = vsub.f32 %v2186_v54, %v2211_v17  ;;  %v2190_v60 = vmul.f32 0.6931472, %v2835_v15  ;;  %2848 = vlog2.f32 %v2172_v41 }
 0x451   : > { %v2839_v42 = vpop.eup %2838  ;;  %2242 = vst.msk [vmem:[%s3250_s27 + $0x28] sm:$0xff] %vm2120_vm2, %v2226_v12  ;;  %v2228_v5 = vsub.f32 %v2188_v3, %v2212_v7  ;;  %v2192_v31 = vmul.f32 0.6931472, %v2837_v45 }
 0x452   : > { %v2841_v27 = vpop.eup %2840  ;;  %2243 = vst.msk [vmem:[%s3250_s27 + $0x30] sm:$0xff] %vm2120_vm2, %v2227_v40  ;;  %v2229_v57 = vsub.f32 %v2190_v60, %v2213_v8  ;;  %v2194_v20 = vmul.f32 0.6931472, %v2839_v42 }
 0x453   : > { %v2843_v49 = vpop.eup %2842  ;;  %2244 = vst.msk [vmem:[%s3250_s27 + $0x38] sm:$0xff] %vm2120_vm2, %v2228_v5  ;;  %v2230_v59 = vsub.f32 %v2192_v31, %v2214_v10  ;;  %v2196_v48 = vmul.f32 0.6931472, %v2841_v27 }
 0x454   : > { %v2845_v46 = vpop.eup %2844  ;;  %2245 = vst.msk [vmem:[%s3250_s27 + $0x40] sm:$0xff] %vm2120_vm2, %v2229_v57  ;;  %v2231_v53 = vsub.f32 %v2194_v20, %v2215_v58  ;;  %v2198_v55 = vmul.f32 0.6931472, %v2843_v49 }
 0x455   : > { %v2847_v9 = vpop.eup %2846  ;;  %2246 = vst.msk [vmem:[%s3250_s27 + $0x48] sm:$0xff] %vm2120_vm2, %v2230_v59  ;;  %v2232_v23 = vsub.f32 %v2196_v48, %v2216_v47  ;;  %v2200_v43 = vmul.f32 0.6931472, %v2845_v46 }
 0x456   : > { %v2849_v44 = vpop.eup %2848  ;;  %2247 = vst.msk [vmem:[%s3250_s27 + $0x50] sm:$0xff] %vm2120_vm2, %v2231_v53  ;;  %v2233_v63 = vsub.f32 %v2198_v55, %v2217_v32  ;;  %v2202_v35 = vmul.f32 0.6931472, %v2847_v9 }
 0x457   : > { %2248 = vst.msk [vmem:[%s3250_s27 + $0x58] sm:$0xff] %vm2120_vm2, %v2232_v23  ;;  %v2234_v22 = vsub.f32 %v2200_v43, %v2218_v16  ;;  %v2204_v26 = vmul.f32 0.6931472, %v2849_v44 }
 0x458   : > { %2249 = vst.msk [vmem:[%s3250_s27 + $0x60] sm:$0xff] %vm2120_vm2, %v2233_v63  ;;  %v2235_v14 = vsub.f32 %v2202_v35, %v2219_v62 }
 0x459   : > { %2250 = vst.msk [vmem:[%s3250_s27 + $0x68] sm:$0xff] %vm2120_vm2, %v2234_v22  ;;  %v2236_v51 = vsub.f32 %v2204_v26, %v2220_v1 }
 0x45a   : > { %2251 = vst.msk [vmem:[%s3250_s27 + $0x70] sm:$0xff] %vm2120_vm2, %v2235_v14 }
 0x45b   : > { %2252 = vst.msk [vmem:[%s3250_s27 + $0x78] sm:$0xff] %vm2120_vm2, %v2236_v51 }
 0x45c PF: > { %s19_s22 = sadd.s32 1, %s3038_s22   ;;  %s5096_s4 = sld [smem:[#allocation13_spill]] }
 0x45d   : > { %p16_p9 = scmp.ge.s32.totalorder %s19_s22, 8   ;;  %s5097_s12 = smov %s3002_s13 }
 0x45e   : > { %s5098_s13 = smov %s3006_s14  ;;  %s5099_s14 = smov %s3201_s7 }
 0x45f   : > { %s5100_s15 = smov %s3014_s16  ;;  %s5101_s16 = smov %s3018_s17 }
 0x460   : > { %s5102_s17 = smov %s3212_s0  ;;  %s5103_s18 = smov %s3030_s20 }
 0x461   : > { %s5104_s19 = smov %s3034_s21  ;;  %s5106_s21 = smov %s5112_s24 }
 0x462   : > { %s5105_s20 = smov %s5096_s4  ;;  %18 = sbr.rel (!%p16_p9) target bundleno = 12 (0xc), region = 104 }
 0x467   :  { %2275 = vsyncpa [#allocation6], 1 }
 0x468   :  { %2277 = vsyncpa [#allocation6 + $0x1], 1 }
 0x469   :  { %2278 = vsyncpa [#allocation8], 1 }
 0x46a   :  { %2280 = vsyncpa [#allocation8 + $0x1], 1 }

</bundles_post_ra>
